<compile_context>
chip_gen: v7x
topology: tpu7x:2x2x1
jax: 0.10.0
libtpu: 0.0.40
codegen_flags: <defaults>
</compile_context>

<pallas_src>
import functools
import math

import jax
import jax.numpy as jnp
from jax.experimental import pallas as pl
from jax.experimental.pallas import tpu as pltpu

LN_EPS = 1e-5
NEG_INF = -1e9


@functools.lru_cache(maxsize=1)
def _vmem_capacity_bytes():
    try:
        info = pltpu.get_tpu_info()
        cap = getattr(info, "vmem_capacity_bytes", None)
        if cap:
            return int(cap)
    except Exception:
        pass
    return 128 * 1024 * 1024


def _default_vmem_limit():
    # Raise the scoped-VMEM limit above the 16/32 MiB defaults, leaving headroom.
    return min(_vmem_capacity_bytes() * 3 // 4, 100 * 1024 * 1024)


def _pick_tile(dim, target, aligns=(128, 16, 8)):
    """Largest divisor of `dim` <= target that is a multiple of one of `aligns`
    (preferring MXU/bf16-friendly alignments).  Falls back to the full dim.
    TODO(synk): pad-to-multiple + masked tail would avoid degenerate tiles for
    awkward B*S; divisor search is kept for simplicity."""
    if dim <= target:
        return dim
    best = 0
    for align in aligns:
        c = align
        while c <= target:
            if dim % c == 0 and c > best:
                best = c
            c += align
    return best if best > 0 else dim


# ----------------------------------------------------------------------------
# Embedding prologue kernels (fused: blend + pos/token-type add + LayerNorm)
# ----------------------------------------------------------------------------

def _graph_embed_ln_kernel(pos_row_ref, pos_col_ref, attn_row_ref, we_ref,
                           pe_ref, tok_ref, g_ref, b_ref, o_ref):
    """Code branch prologue, one batch element per grid step:
      nodes_to_token_mask[i,j] = (pos[i]==0)&(pos[j]>=2)&attn[j]  (binary, bf16)
      avg = (mask @ word_emb) * 1/rowsum          (normalize after matmul)
      emb = blend(word_emb, avg) + pos_emb + token_type_emb ; LayerNorm -> bf16
    """
    pos_r = pos_row_ref[0]                                   # (1, S) int32
    pos_c = pos_col_ref[0]                                   # (S, 1) int32
    attn_r = attn_row_ref[0]                                 # (1, S) f32
    emb = we_ref[0]                                          # (S, D) f32

    nodes_c = (pos_c == 0)                                   # (S, 1) bool
    tok_attn_r = (pos_r >= 2) & (attn_r != 0.0)              # (1, S) bool
    ntm = nodes_c & tok_attn_r                               # (S, S) bool

    denom = jnp.sum(ntm.astype(jnp.float32), axis=-1, keepdims=True) + 1e-10
    # bf16 mask matmul (exact for a 0/1 mask), f32 accumulation on the MXU.
    avg = jnp.dot(ntm.astype(jnp.bfloat16), emb.astype(jnp.bfloat16),
                  preferred_element_type=jnp.float32)
    avg = avg * pl.reciprocal(denom, approx=True)            # (S, 1) divide only

    nodes_f = nodes_c.astype(jnp.float32)
    x = emb * (1.0 - nodes_f) + avg * nodes_f                # graph-guided blend
    x = x + pe_ref[0] + tok_ref[...]                         # embeddings add
    mu = jnp.mean(x, axis=-1, keepdims=True)
    var = jnp.mean(jnp.square(x - mu), axis=-1, keepdims=True)
    o_ref[0] = ((x - mu) * jax.lax.rsqrt(var + LN_EPS) * g_ref[...]
                + b_ref[...]).astype(o_ref.dtype)


def graph_guided_embed_ln(params, position_idx, attn_mask, word_embeds):
    B, S = position_idx.shape
    D = word_embeds.shape[-1]
    pos_row = position_idx.reshape(B, 1, S).astype(jnp.int32)
    pos_col = position_idx.reshape(B, S, 1).astype(jnp.int32)
    attn_row = attn_mask.reshape(B, 1, S).astype(jnp.float32)
    pos_emb = params["position_embeddings"][position_idx]     # JAX gather (B,S,D)
    tok = params["token_type_embeddings"][0].reshape(1, D)
    vec = pl.BlockSpec((1, D), lambda b: (0, 0))
    out = pl.pallas_call(
        _graph_embed_ln_kernel,
        out_shape=jax.ShapeDtypeStruct((B, S, D), jnp.bfloat16),
        grid=(B,),
        in_specs=[
            pl.BlockSpec((1, 1, S), lambda b: (b, 0, 0)),
            pl.BlockSpec((1, S, 1), lambda b: (b, 0, 0)),
            pl.BlockSpec((1, 1, S), lambda b: (b, 0, 0)),
            pl.BlockSpec((1, S, D), lambda b: (b, 0, 0)),
            pl.BlockSpec((1, S, D), lambda b: (b, 0, 0)),
            vec, vec, vec,
        ],
        out_specs=pl.BlockSpec((1, S, D), lambda b: (b, 0, 0)),
        compiler_params=pltpu.CompilerParams(dimension_semantics=("parallel",)),
    )(pos_row, pos_col, attn_row,
      word_embeds.astype(jnp.float32), pos_emb.astype(jnp.float32),
      tok.astype(jnp.float32),
      params["emb_ln_g"].reshape(1, D).astype(jnp.float32),
      params["emb_ln_b"].reshape(1, D).astype(jnp.float32))
    return out.reshape(B * S, D)


def _embed_ln_kernel(we_ref, pe_ref, tok_ref, g_ref, b_ref, o_ref):
    x = we_ref[...] + pe_ref[...] + tok_ref[...]
    mu = jnp.mean(x, axis=-1, keepdims=True)
    var = jnp.mean(jnp.square(x - mu), axis=-1, keepdims=True)
    o_ref[...] = ((x - mu) * jax.lax.rsqrt(var + LN_EPS) * g_ref[...]
                  + b_ref[...]).astype(o_ref.dtype)


def embed_ln(params, word_embeds, position_ids):
    """NL branch prologue: word + pos + token-type, LayerNorm, one fused kernel."""
    B, S, D = word_embeds.shape
    pos_emb = params["position_embeddings"][position_ids]     # JAX gather (B,S,D)
    tok = params["token_type_embeddings"][0].reshape(1, D)
    M = B * S
    tm = _pick_tile(M, 512)
    vec = pl.BlockSpec((1, D), lambda i: (0, 0))
    return pl.pallas_call(
        _embed_ln_kernel,
        out_shape=jax.ShapeDtypeStruct((M, D), jnp.bfloat16),
        grid=(M // tm,),
        in_specs=[
            pl.BlockSpec((tm, D), lambda i: (i, 0)),
            pl.BlockSpec((tm, D), lambda i: (i, 0)),
            vec, vec, vec,
        ],
        out_specs=pl.BlockSpec((tm, D), lambda i: (i, 0)),
        compiler_params=pltpu.CompilerParams(dimension_semantics=("parallel",)),
    )(word_embeds.reshape(M, D).astype(jnp.float32),
      pos_emb.reshape(M, D).astype(jnp.float32),
      tok.astype(jnp.float32),
      params["emb_ln_g"].reshape(1, D).astype(jnp.float32),
      params["emb_ln_b"].reshape(1, D).astype(jnp.float32))


# ----------------------------------------------------------------------------
# Fused dense: matmul + bias [+ GELU] [+ residual + LayerNorm]
#   * K <= 1024  -> full-K blocks, single (parallel) M grid axis, no scratch
#   * K  > 1024  -> (M, K) grid with f32 VMEM accumulator
# ----------------------------------------------------------------------------

def fused_dense(x, w, b, *, residual=None, ln_params=None, activation=None,
                out_dtype=jnp.bfloat16, tk_target=512, full_k_threshold=1024):
    M, K = x.shape
    N = w.shape[1]
    cap = _vmem_capacity_bytes()
    tm_target = 512 if cap <= 64 * 1024 * 1024 else 1024      # v7x: 64 MiB VMEM
    tm = _pick_tile(M, tm_target)
    full_k = K <= full_k_threshold
    tk = K if full_k else _pick_tile(K, tk_target, (128,))
    n_k = K // tk
    has_res = residual is not None
    has_ln = ln_params is not None

    def epilogue(y, r_ref, g_ref, bb_ref, o_ref):
        if activation == "gelu":
            # TODO(synk): reference uses exact (erf) GELU; tanh-approx used for
            # robust Mosaic lowering — numerically near-identical.
            y = jax.nn.gelu(y, approximate=True)
        if has_res:
            y = y + r_ref[...].astype(jnp.float32)
        if has_ln:
            mu = jnp.mean(y, axis=-1, keepdims=True)
            var = jnp.mean(jnp.square(y - mu), axis=-1, keepdims=True)
            y = (y - mu) * jax.lax.rsqrt(var + LN_EPS) * g_ref[...] + bb_ref[...]
        o_ref[...] = y.astype(o_ref.dtype)

    if full_k:
        def kernel(*refs):
            it = iter(refs)
            x_ref = next(it); w_ref = next(it); b_ref = next(it)
            r_ref = next(it) if has_res else None
            g_ref = next(it) if has_ln else None
            bb_ref = next(it) if has_ln else None
            o_ref = next(it)
            y = jnp.dot(x_ref[...], w_ref[...],
                        preferred_element_type=jnp.float32) + b_ref[...]
            epilogue(y, r_ref, g_ref, bb_ref, o_ref)

        grid = (M // tm,)
        x_spec = pl.BlockSpec((tm, K), lambda i: (i, 0))
        w_spec = pl.BlockSpec((K, N), lambda i: (0, 0))
        vec_spec = pl.BlockSpec((1, N), lambda i: (0, 0))
        res_spec = pl.BlockSpec((tm, N), lambda i: (i, 0))
        out_spec = pl.BlockSpec((tm, N), lambda i: (i, 0))
        scratch = []
        dims = ("parallel",)
    else:
        def kernel(*refs):
            it = iter(refs)
            x_ref = next(it); w_ref = next(it); b_ref = next(it)
            r_ref = next(it) if has_res else None
            g_ref = next(it) if has_ln else None
            bb_ref = next(it) if has_ln else None
            o_ref = next(it); acc_ref = next(it)
            k_idx = pl.program_id(1)

            @pl.when(k_idx == 0)
            def _():
                acc_ref[...] = jnp.zeros_like(acc_ref)

            acc_ref[...] += jnp.dot(x_ref[...], w_ref[...],
                                    preferred_element_type=jnp.float32)

            @pl.when(k_idx == n_k - 1)
            def _():
                epilogue(acc_ref[...] + b_ref[...], r_ref, g_ref, bb_ref, o_ref)

        grid = (M // tm, n_k)
        x_spec = pl.BlockSpec((tm, tk), lambda i, k: (i, k))
        w_spec = pl.BlockSpec((tk, N), lambda i, k: (k, 0))
        vec_spec = pl.BlockSpec((1, N), lambda i, k: (0, 0))
        res_spec = pl.BlockSpec((tm, N), lambda i, k: (i, 0))
        out_spec = pl.BlockSpec((tm, N), lambda i, k: (i, 0))
        scratch = [pltpu.VMEM((tm, N), jnp.float32)]
        dims = ("parallel", "arbitrary")

    in_specs = [x_spec, w_spec, vec_spec]
    inputs = [x.astype(jnp.bfloat16), w.astype(jnp.bfloat16),
              b.reshape(1, N).astype(jnp.float32)]
    if has_res:
        in_specs.append(res_spec)
        inputs.append(residual.astype(jnp.bfloat16))
    if has_ln:
        g, beta = ln_params
        in_specs += [vec_spec, vec_spec]
        inputs += [g.reshape(1, N).astype(jnp.float32),
                   beta.reshape(1, N).astype(jnp.float32)]

    return pl.pallas_call(
        kernel,
        out_shape=jax.ShapeDtypeStruct((M, N), out_dtype),
        grid=grid,
        in_specs=in_specs,
        out_specs=out_spec,
        scratch_shapes=scratch,
        compiler_params=pltpu.CompilerParams(
            dimension_semantics=dims,
            vmem_limit_bytes=_default_vmem_limit()),
    )(*inputs)


# ----------------------------------------------------------------------------
# Multi-head attention over the fused (B, S, 3D) QKV tensor.
#   grid = (B, S // tq): q rows tiled (parallel work for 2-TC chips); k/v block
#   index is constant across the q-tile axis so it is DMA'd once per batch.
#   Heads processed in pairs with immediate lane-dense stores.
# ----------------------------------------------------------------------------

def _attention_kernel(qkvq_ref, qkv_ref, m_ref, o_ref, *, num_heads, dh, scale):
    D = num_heads * dh
    q_rows = qkvq_ref[0]                                # (tq, 3D) bf16 (q slice used)
    kv_all = qkv_ref[0]                                 # (S, 3D) bf16
    m = m_ref[0]                                        # (1, S) f32 additive mask

    # Fold 1/sqrt(dh) into q once (instead of H*S*S multiplies on the scores).
    q_all = (q_rows[:, :D].astype(jnp.float32) * scale).astype(jnp.bfloat16)
    k_all = kv_all[:, D:2 * D]
    v_all = kv_all[:, 2 * D:3 * D]

    for h0 in range(0, num_heads, 2):                   # head pairs -> 2*dh-wide stores
        hs = min(2, num_heads - h0)
        lo = h0 * dh
        w = hs * dh
        outs = []
        for j in range(hs):
            off = lo + j * dh
            qh = q_all[:, off:off + dh]
            kh = k_all[:, off:off + dh]
            vh = v_all[:, off:off + dh]
            # Q @ K^T without materializing a transpose: contract last dims.
            s = jax.lax.dot_general(qh, kh, (((1,), (1,)), ((), ())),
                                    preferred_element_type=jnp.float32)
            s = s + m
            s = s - jnp.max(s, axis=-1, keepdims=True)
            p = jnp.exp(s)
            p = p * pl.reciprocal(jnp.sum(p, axis=-1, keepdims=True), approx=True)
            outs.append(jnp.dot(p.astype(vh.dtype), vh,
                                preferred_element_type=jnp.float32))
        pair = outs[0] if hs == 1 else jnp.concatenate(outs, axis=-1)
        # Immediate store -> short live ranges; 2*dh lanes wide (128 at D=768,H=12).
        o_ref[0, :, lo:lo + w] = pair.astype(o_ref.dtype)


def multihead_attention(qkv, ext_mask, num_heads, scale):
    B, S, D3 = qkv.shape
    D = D3 // 3
    dh = D // num_heads
    tq = _pick_tile(S, 256, (128, 8))
    nq = S // tq
    kern = functools.partial(_attention_kernel, num_heads=num_heads, dh=dh, scale=scale)
    return pl.pallas_call(
        kern,
        out_shape=jax.ShapeDtypeStruct((B, S, D), jnp.bfloat16),
        grid=(B, nq),
        in_specs=[
            pl.BlockSpec((1, tq, D3), lambda b, qi: (b, qi, 0)),   # q rows of this tile
            pl.BlockSpec((1, S, D3), lambda b, qi: (b, 0, 0)),     # full-S k/v, 1 DMA / b
            pl.BlockSpec((1, 1, S), lambda b, qi: (b, 0, 0)),
        ],
        out_specs=pl.BlockSpec((1, tq, D), lambda b, qi: (b, qi, 0)),
        compiler_params=pltpu.CompilerParams(
            dimension_semantics=("parallel", "parallel")),
    )(qkv, qkv, ext_mask)


# ----------------------------------------------------------------------------
# RoBERTa-style encoder (small, deterministic synthetic weights)
# ----------------------------------------------------------------------------

def init_params(key, vocab, max_pos, D, ffn, n_layers):
    keys = jax.random.split(key, 4 + n_layers)

    def norm(k, shape, scale=0.02):
        return (scale * jax.random.normal(k, shape)).astype(jnp.float32)

    params = {
        "word_embeddings": norm(keys[0], (vocab, D)),
        "position_embeddings": norm(keys[1], (max_pos, D)),
        "token_type_embeddings": norm(keys[2], (2, D)),
        "emb_ln_g": jnp.ones((D,), jnp.float32),
        "emb_ln_b": jnp.zeros((D,), jnp.float32),
        "pooler_w": norm(keys[3], (D, D)),
        "pooler_b": jnp.zeros((D,), jnp.float32),
        "layers": [],
    }
    for i in range(n_layers):
        lk = jax.random.split(keys[4 + i], 6)
        wq, wk, wv = norm(lk[0], (D, D)), norm(lk[1], (D, D)), norm(lk[2], (D, D))
        params["layers"].append({
            # fused QKV projection weight (D, 3D) / bias (3D,)
            "wqkv": jnp.concatenate([wq, wk, wv], axis=1),
            "bqkv": jnp.zeros((3 * D,), jnp.float32),
            "wo": norm(lk[3], (D, D)), "bo": jnp.zeros((D,), jnp.float32),
            "ln1_g": jnp.ones((D,), jnp.float32), "ln1_b": jnp.zeros((D,), jnp.float32),
            "w1": norm(lk[4], (D, ffn)), "b1": jnp.zeros((ffn,), jnp.float32),
            "w2": norm(lk[5], (ffn, D)), "b2": jnp.zeros((D,), jnp.float32),
            "ln2_g": jnp.ones((D,), jnp.float32), "ln2_b": jnp.zeros((D,), jnp.float32),
        })
    return params


def encoder_layers_forward(params, num_heads, h2d, ext_mask, B, S):
    """Runs transformer layers + pooler on the (B*S, D) bf16 embedded input.
    Returns pooler output (== encoder(...)[1]) of shape (B, D)."""
    D = h2d.shape[-1]
    dh = D // num_heads
    scale = 1.0 / math.sqrt(dh)

    for layer in params["layers"]:
        x2d = h2d                                                      # (B*S, D) bf16

        # Fused QKV projection; the (B,S,3D) slab is consumed directly by the
        # attention kernel (no JAX-side q/k/v slice copies).
        qkv = fused_dense(x2d, layer["wqkv"], layer["bqkv"])           # (B*S, 3D) bf16
        ctx = multihead_attention(qkv.reshape(B, S, 3 * D), ext_mask,
                                  num_heads, scale)                    # (B, S, D) bf16
        ctx2d = ctx.reshape(B * S, D)

        # Attention output projection fused with residual add + LayerNorm.
        h2d = fused_dense(ctx2d, layer["wo"], layer["bo"],
                          residual=x2d,
                          ln_params=(layer["ln1_g"], layer["ln1_b"]))

        # FFN: dense + GELU fused, then dense + residual + LayerNorm fused.
        ffn = fused_dense(h2d, layer["w1"], layer["b1"], activation="gelu")
        h2d = fused_dense(ffn, layer["w2"], layer["b2"],
                          residual=h2d,
                          ln_params=(layer["ln2_g"], layer["ln2_b"]))

    h = h2d.reshape(B, S, D)
    cls = h[:, 0, :].astype(jnp.float32)                               # (B, D)
    # Pooler: (B, D) x (D, D) matmul — sub-(8,128) occupancy, plain JAX is best.
    pooled = jnp.tanh(cls @ params["pooler_w"] + params["pooler_b"])
    return pooled


# ----------------------------------------------------------------------------
# Model.forward equivalents
# ----------------------------------------------------------------------------

def model_forward_code(params, num_heads, code_inputs, attn_mask, position_idx):
    """`Model.forward(code_inputs, attn_mask, position_idx)` branch."""
    B, S = code_inputs.shape
    # TODO(synk): reference GraphCodeBERT can take a per-example (S,S) graph
    # mask; a (B,S) key-padding mask (same as the previous version) is used.
    word_embeds = params["word_embeddings"][code_inputs]               # JAX gather
    h2d = graph_guided_embed_ln(params, position_idx, attn_mask, word_embeds)
    ext_mask = ((1.0 - attn_mask.astype(jnp.float32)) * NEG_INF).reshape(B, 1, S)
    return encoder_layers_forward(params, num_heads, h2d, ext_mask, B, S)


def model_forward_nl(params, num_heads, nl_inputs, pad_token_id=1):
    """`Model.forward(nl_inputs=...)` branch."""
    B, S = nl_inputs.shape
    mask = (nl_inputs != pad_token_id).astype(jnp.int32)
    # RoBERTa-style position ids from input ids (padding_idx = 1).
    position_ids = jnp.cumsum(mask, axis=1) * mask + pad_token_id
    word_embeds = params["word_embeddings"][nl_inputs]                 # JAX gather
    h2d = embed_ln(params, word_embeds, position_ids)
    ext_mask = ((1.0 - mask.astype(jnp.float32)) * NEG_INF).reshape(B, 1, S)
    return encoder_layers_forward(params, num_heads, h2d, ext_mask, B, S)


# ----------------------------------------------------------------------------
# Main
# ----------------------------------------------------------------------------

if __name__ == "__main__":
    B, S, D, NUM_HEADS, FFN, N_LAYERS, VOCAB = 2, 8, 32, 4, 64, 2, 50
    MAX_POS = S + 4

    root = jax.random.PRNGKey(0)
    k_params, k_code, k_nl = jax.random.split(root, 3)

    params = init_params(k_params, VOCAB, MAX_POS, D, FFN, N_LAYERS)

    # GraphCodeBERT convention: tokens get positions >= 2, DFG nodes 0, padding 1.
    position_idx = jnp.array(
        [[2, 3, 4, 5, 6, 0, 0, 1],
         [2, 3, 4, 5, 0, 0, 1, 1]], dtype=jnp.int32)
    attn_mask = (position_idx != 1).astype(jnp.int32)                  # (B, S)
    code_inputs = jax.random.randint(k_code, (B, S), 0, VOCAB, dtype=jnp.int32)

    nl_inputs = jax.random.randint(k_nl, (B, S), 2, VOCAB, dtype=jnp.int32)
    nl_inputs = nl_inputs.at[:, -2:].set(1)                            # pad token id = 1

    fwd_code = jax.jit(model_forward_code, static_argnums=(1,))
    fwd_nl = jax.jit(model_forward_nl, static_argnums=(1,))

    code_vec = fwd_code(params, NUM_HEADS, code_inputs, attn_mask, position_idx)
    nl_vec = fwd_nl(params, NUM_HEADS, nl_inputs)
    jax.block_until_ready((code_vec, nl_vec))

    assert code_vec.shape == (B, D) and nl_vec.shape == (B, D)
    assert bool(jnp.all(jnp.isfinite(code_vec))) and bool(jnp.all(jnp.isfinite(nl_vec)))
    print("KERNEL_OK")
</pallas_src>

<mosaic_0001>
module attributes {stable_mosaic.version = 11 : i64} {
  func.func @kernel(%arg0: i32, %arg1: memref<16x32xbf16, #tpu.memory_space<vmem>>, %arg2: memref<32x96xbf16, #tpu.memory_space<vmem>>, %arg3: memref<1x96xf32, #tpu.memory_space<vmem>>, %arg4: memref<16x96xbf16, #tpu.memory_space<vmem>>) attributes {dimension_semantics = [#tpu.dimension_semantics<parallel>], iteration_bounds = array<i64: 1>, scalar_prefetch = 0 : i64, scratch_operands = 0 : i64, tpu.core_type = #tpu.core_type<tc>, window_params = [{transform_indices = @transform_0, window_bounds = array<i64: 16, 32>}, {pipeline_mode = #tpu.pipeline_mode<synchronous>, transform_indices = @transform_1, window_bounds = array<i64: 32, 96>}, {pipeline_mode = #tpu.pipeline_mode<synchronous>, transform_indices = @transform_2, window_bounds = array<i64: 1, 96>}, {transform_indices = @transform_3, window_bounds = array<i64: 16, 96>}]} {
    %c0 = arith.constant 0 : index
    %c0_0 = arith.constant 0 : index
    %0 = vector.load %arg1[%c0, %c0_0] : memref<16x32xbf16, #tpu.memory_space<vmem>>, vector<16x32xbf16>
    %c0_1 = arith.constant 0 : index
    %c0_2 = arith.constant 0 : index
    %1 = vector.load %arg2[%c0_1, %c0_2] : memref<32x96xbf16, #tpu.memory_space<vmem>>, vector<32x96xbf16>
    %cst = arith.constant dense<0.000000e+00> : vector<16x96xf32>
    %2 = tpu.matmul %0, %1, %cst {dimension_numbers = #tpu.dot_dimension_numbers<[1], [0], [0], [1], [0, 0, 1, 1], [], []>} : vector<16x32xbf16>, vector<32x96xbf16>, vector<16x96xf32> -> vector<16x96xf32>
    %c0_3 = arith.constant 0 : index
    %c0_4 = arith.constant 0 : index
    %3 = vector.load %arg3[%c0_3, %c0_4] : memref<1x96xf32, #tpu.memory_space<vmem>>, vector<1x96xf32>
    %4 = vector.broadcast %3 : vector<1x96xf32> to vector<16x96xf32>
    %5 = arith.addf %2, %4 : vector<16x96xf32>
    %6 = arith.truncf %5 : vector<16x96xf32> to vector<16x96xbf16>
    %c0_5 = arith.constant 0 : index
    %c0_6 = arith.constant 0 : index
    %7 = vector.load %arg4[%c0_5, %c0_6] : memref<16x96xbf16, #tpu.memory_space<vmem>>, vector<16x96xbf16>
    tpu.vector_store %arg4[%c0_5, %c0_6], %6 {strides = array<i32>} : memref<16x96xbf16, #tpu.memory_space<vmem>>, vector<16x96xbf16>,
    return
  }
  func.func @transform_0(%arg0: i32) -> (i32, i32) {
    %c0_i32 = arith.constant 0 : i32
    %c0_i32_0 = arith.constant 0 : i32
    return %arg0, %c0_i32 : i32, i32
  }
  func.func @transform_1(%arg0: i32) -> (i32, i32) {
    %c0_i32 = arith.constant 0 : i32
    %c0_i32_0 = arith.constant 0 : i32
    %c0_i32_1 = arith.constant 0 : i32
    return %c0_i32, %c0_i32_0 : i32, i32
  }
  func.func @transform_2(%arg0: i32) -> (i32, i32) {
    %c0_i32 = arith.constant 0 : i32
    %c0_i32_0 = arith.constant 0 : i32
    %c0_i32_1 = arith.constant 0 : i32
    return %c0_i32, %c0_i32_0 : i32, i32
  }
  func.func @transform_3(%arg0: i32) -> (i32, i32) {
    %c0_i32 = arith.constant 0 : i32
    %c0_i32_0 = arith.constant 0 : i32
    return %arg0, %c0_i32 : i32, i32
  }
}

module attributes {stable_mosaic.version = 11 : i64} {
  func.func @_attention_kernel(%arg0: i32, %arg1: i32, %arg2: memref<1x8x96xbf16, #tpu.memory_space<vmem>>, %arg3: memref<1x8x96xbf16, #tpu.memory_space<vmem>>, %arg4: memref<1x1x8xf32, #tpu.memory_space<vmem>>, %arg5: memref<1x8x32xbf16, #tpu.memory_space<vmem>>) attributes {dimension_semantics = [#tpu.dimension_semantics<parallel>, #tpu.dimension_semantics<parallel>], iteration_bounds = array<i64: 2, 1>, scalar_prefetch = 0 : i64, scratch_operands = 0 : i64, tpu.core_type = #tpu.core_type<tc>, window_params = [{transform_indices = @transform_0, window_bounds = array<i64: 1, 8, 96>}, {transform_indices = @transform_1, window_bounds = array<i64: 1, 8, 96>}, {transform_indices = @transform_2, window_bounds = array<i64: 1, 1, 8>}, {transform_indices = @transform_3, window_bounds = array<i64: 1, 8, 32>}]} {
    %c0 = arith.constant 0 : index
    %c0_0 = arith.constant 0 : index
    %c0_1 = arith.constant 0 : index
    %0 = vector.load %arg2[%c0, %c0_0, %c0_1] : memref<1x8x96xbf16, #tpu.memory_space<vmem>>, vector<1x8x96xbf16>
    %1 = vector.shape_cast %0 : vector<1x8x96xbf16> to vector<8x96xbf16>
    %c0_2 = arith.constant 0 : index
    %c0_3 = arith.constant 0 : index
    %c0_4 = arith.constant 0 : index
    %2 = vector.load %arg3[%c0_2, %c0_3, %c0_4] : memref<1x8x96xbf16, #tpu.memory_space<vmem>>, vector<1x8x96xbf16>
    %3 = vector.shape_cast %2 : vector<1x8x96xbf16> to vector<8x96xbf16>
    %c0_5 = arith.constant 0 : index
    %c0_6 = arith.constant 0 : index
    %c0_7 = arith.constant 0 : index
    %4 = vector.load %arg4[%c0_5, %c0_6, %c0_7] : memref<1x1x8xf32, #tpu.memory_space<vmem>>, vector<1x1x8xf32>
    %5 = vector.shape_cast %4 : vector<1x1x8xf32> to vector<1x8xf32>
    %6 = vector.extract_strided_slice %1 {offsets = [0, 0], sizes = [8, 32], strides = [1, 1]} : vector<8x96xbf16> to vector<8x32xbf16>
    %7 = arith.extf %6 : vector<8x32xbf16> to vector<8x32xf32>
    %cst = arith.constant 0.353553385 : f32
    %8 = vector.broadcast %cst : f32 to vector<8x32xf32>
    %9 = arith.mulf %7, %8 : vector<8x32xf32>
    %10 = arith.truncf %9 : vector<8x32xf32> to vector<8x32xbf16>
    %11 = vector.extract_strided_slice %3 {offsets = [0, 32], sizes = [8, 32], strides = [1, 1]} : vector<8x96xbf16> to vector<8x32xbf16>
    %12 = vector.extract_strided_slice %3 {offsets = [0, 64], sizes = [8, 32], strides = [1, 1]} : vector<8x96xbf16> to vector<8x32xbf16>
    %13 = vector.extract_strided_slice %10 {offsets = [0, 0], sizes = [8, 8], strides = [1, 1]} : vector<8x32xbf16> to vector<8x8xbf16>
    %14 = vector.extract_strided_slice %11 {offsets = [0, 0], sizes = [8, 8], strides = [1, 1]} : vector<8x32xbf16> to vector<8x8xbf16>
    %15 = vector.extract_strided_slice %12 {offsets = [0, 0], sizes = [8, 8], strides = [1, 1]} : vector<8x32xbf16> to vector<8x8xbf16>
    %cst_8 = arith.constant dense<0.000000e+00> : vector<8x8xf32>
    %16 = tpu.matmul %13, %14, %cst_8 {dimension_numbers = #tpu.dot_dimension_numbers<[1], [1], [0], [0], [0, 0, 1, 0], [], []>} : vector<8x8xbf16>, vector<8x8xbf16>, vector<8x8xf32> -> vector<8x8xf32>
    %17 = vector.broadcast %5 : vector<1x8xf32> to vector<8x8xf32>
    %18 = arith.addf %16, %17 : vector<8x8xf32>
    %cst_9 = arith.constant dense<0xFF800000> : vector<8xf32>
    %19 = vector.multi_reduction <maximumf>, %18, %cst_9 [1] : vector<8x8xf32> to vector<8xf32>
    %20 = vector.shape_cast %19 : vector<8xf32> to vector<8x1xf32>
    %21 = vector.broadcast %20 : vector<8x1xf32> to vector<8x8xf32>
    %22 = arith.subf %18, %21 : vector<8x8xf32>
    %23 = math.exp %22 : vector<8x8xf32>
    %cst_10 = arith.constant dense<0.000000e+00> : vector<8xf32>
    %24 = vector.multi_reduction <add>, %23, %cst_10 [1] : vector<8x8xf32> to vector<8xf32>
    %25 = vector.shape_cast %24 : vector<8xf32> to vector<8x1xf32>
    %26 = tpu.reciprocal %25 {approx = true} : vector<8x1xf32> -> vector<8x1xf32>
    %27 = vector.broadcast %26 : vector<8x1xf32> to vector<8x8xf32>
    %28 = arith.mulf %23, %27 : vector<8x8xf32>
    %29 = arith.truncf %28 : vector<8x8xf32> to vector<8x8xbf16>
    %cst_11 = arith.constant dense<0.000000e+00> : vector<8x8xf32>
    %30 = tpu.matmul %29, %15, %cst_11 {dimension_numbers = #tpu.dot_dimension_numbers<[1], [0], [0], [1], [0, 0, 1, 1], [], []>} : vector<8x8xbf16>, vector<8x8xbf16>, vector<8x8xf32> -> vector<8x8xf32>
    %31 = vector.extract_strided_slice %10 {offsets = [0, 8], sizes = [8, 8], strides = [1, 1]} : vector<8x32xbf16> to vector<8x8xbf16>
    %32 = vector.extract_strided_slice %11 {offsets = [0, 8], sizes = [8, 8], strides = [1, 1]} : vector<8x32xbf16> to vector<8x8xbf16>
    %33 = vector.extract_strided_slice %12 {offsets = [0, 8], sizes = [8, 8], strides = [1, 1]} : vector<8x32xbf16> to vector<8x8xbf16>
    %cst_12 = arith.constant dense<0.000000e+00> : vector<8x8xf32>
    %34 = tpu.matmul %31, %32, %cst_12 {dimension_numbers = #tpu.dot_dimension_numbers<[1], [1], [0], [0], [0, 0, 1, 0], [], []>} : vector<8x8xbf16>, vector<8x8xbf16>, vector<8x8xf32> -> vector<8x8xf32>
    %35 = vector.broadcast %5 : vector<1x8xf32> to vector<8x8xf32>
    %36 = arith.addf %34, %35 : vector<8x8xf32>
    %cst_13 = arith.constant dense<0xFF800000> : vector<8xf32>
    %37 = vector.multi_reduction <maximumf>, %36, %cst_13 [1] : vector<8x8xf32> to vector<8xf32>
    %38 = vector.shape_cast %37 : vector<8xf32> to vector<8x1xf32>
    %39 = vector.broadcast %38 : vector<8x1xf32> to vector<8x8xf32>
    %40 = arith.subf %36, %39 : vector<8x8xf32>
    %41 = math.exp %40 : vector<8x8xf32>
    %cst_14 = arith.constant dense<0.000000e+00> : vector<8xf32>
    %42 = vector.multi_reduction <add>, %41, %cst_14 [1] : vector<8x8xf32> to vector<8xf32>
    %43 = vector.shape_cast %42 : vector<8xf32> to vector<8x1xf32>
    %44 = tpu.reciprocal %43 {approx = true} : vector<8x1xf32> -> vector<8x1xf32>
    %45 = vector.broadcast %44 : vector<8x1xf32> to vector<8x8xf32>
    %46 = arith.mulf %41, %45 : vector<8x8xf32>
    %47 = arith.truncf %46 : vector<8x8xf32> to vector<8x8xbf16>
    %cst_15 = arith.constant dense<0.000000e+00> : vector<8x8xf32>
    %48 = tpu.matmul %47, %33, %cst_15 {dimension_numbers = #tpu.dot_dimension_numbers<[1], [0], [0], [1], [0, 0, 1, 1], [], []>} : vector<8x8xbf16>, vector<8x8xbf16>, vector<8x8xf32> -> vector<8x8xf32>
    %49 = tpu.concatenate %30, %48 in 1 : vector<8x8xf32>, vector<8x8xf32> -> vector<8x16xf32>
    %50 = arith.truncf %49 : vector<8x16xf32> to vector<8x16xbf16>
    %c0_16 = arith.constant 0 : index
    %c0_17 = arith.constant 0 : index
    %c0_18 = arith.constant 0 : index
    %51 = vector.load %arg5[%c0_16, %c0_17, %c0_18] : memref<1x8x32xbf16, #tpu.memory_space<vmem>>, vector<1x8x16xbf16>
    %52 = vector.shape_cast %51 : vector<1x8x16xbf16> to vector<8x16xbf16>
    %53 = vector.shape_cast %50 : vector<8x16xbf16> to vector<1x8x16xbf16>
    tpu.vector_store %arg5[%c0_16, %c0_17, %c0_18], %53 {strides = array<i32>} : memref<1x8x32xbf16, #tpu.memory_space<vmem>>, vector<1x8x16xbf16>,
    %54 = vector.extract_strided_slice %10 {offsets = [0, 16], sizes = [8, 8], strides = [1, 1]} : vector<8x32xbf16> to vector<8x8xbf16>
    %55 = vector.extract_strided_slice %11 {offsets = [0, 16], sizes = [8, 8], strides = [1, 1]} : vector<8x32xbf16> to vector<8x8xbf16>
    %56 = vector.extract_strided_slice %12 {offsets = [0, 16], sizes = [8, 8], strides = [1, 1]} : vector<8x32xbf16> to vector<8x8xbf16>
    %cst_19 = arith.constant dense<0.000000e+00> : vector<8x8xf32>
    %57 = tpu.matmul %54, %55, %cst_19 {dimension_numbers = #tpu.dot_dimension_numbers<[1], [1], [0], [0], [0, 0, 1, 0], [], []>} : vector<8x8xbf16>, vector<8x8xbf16>, vector<8x8xf32> -> vector<8x8xf32>
    %58 = vector.broadcast %5 : vector<1x8xf32> to vector<8x8xf32>
    %59 = arith.addf %57, %58 : vector<8x8xf32>
    %cst_20 = arith.constant dense<0xFF800000> : vector<8xf32>
    %60 = vector.multi_reduction <maximumf>, %59, %cst_20 [1] : vector<8x8xf32> to vector<8xf32>
    %61 = vector.shape_cast %60 : vector<8xf32> to vector<8x1xf32>
    %62 = vector.broadcast %61 : vector<8x1xf32> to vector<8x8xf32>
    %63 = arith.subf %59, %62 : vector<8x8xf32>
    %64 = math.exp %63 : vector<8x8xf32>
    %cst_21 = arith.constant dense<0.000000e+00> : vector<8xf32>
    %65 = vector.multi_reduction <add>, %64, %cst_21 [1] : vector<8x8xf32> to vector<8xf32>
    %66 = vector.shape_cast %65 : vector<8xf32> to vector<8x1xf32>
    %67 = tpu.reciprocal %66 {approx = true} : vector<8x1xf32> -> vector<8x1xf32>
    %68 = vector.broadcast %67 : vector<8x1xf32> to vector<8x8xf32>
    %69 = arith.mulf %64, %68 : vector<8x8xf32>
    %70 = arith.truncf %69 : vector<8x8xf32> to vector<8x8xbf16>
    %cst_22 = arith.constant dense<0.000000e+00> : vector<8x8xf32>
    %71 = tpu.matmul %70, %56, %cst_22 {dimension_numbers = #tpu.dot_dimension_numbers<[1], [0], [0], [1], [0, 0, 1, 1], [], []>} : vector<8x8xbf16>, vector<8x8xbf16>, vector<8x8xf32> -> vector<8x8xf32>
    %72 = vector.extract_strided_slice %10 {offsets = [0, 24], sizes = [8, 8], strides = [1, 1]} : vector<8x32xbf16> to vector<8x8xbf16>
    %73 = vector.extract_strided_slice %11 {offsets = [0, 24], sizes = [8, 8], strides = [1, 1]} : vector<8x32xbf16> to vector<8x8xbf16>
    %74 = vector.extract_strided_slice %12 {offsets = [0, 24], sizes = [8, 8], strides = [1, 1]} : vector<8x32xbf16> to vector<8x8xbf16>
    %cst_23 = arith.constant dense<0.000000e+00> : vector<8x8xf32>
    %75 = tpu.matmul %72, %73, %cst_23 {dimension_numbers = #tpu.dot_dimension_numbers<[1], [1], [0], [0], [0, 0, 1, 0], [], []>} : vector<8x8xbf16>, vector<8x8xbf16>, vector<8x8xf32> -> vector<8x8xf32>
    %76 = vector.broadcast %5 : vector<1x8xf32> to vector<8x8xf32>
    %77 = arith.addf %75, %76 : vector<8x8xf32>
    %cst_24 = arith.constant dense<0xFF800000> : vector<8xf32>
    %78 = vector.multi_reduction <maximumf>, %77, %cst_24 [1] : vector<8x8xf32> to vector<8xf32>
    %79 = vector.shape_cast %78 : vector<8xf32> to vector<8x1xf32>
    %80 = vector.broadcast %79 : vector<8x1xf32> to vector<8x8xf32>
    %81 = arith.subf %77, %80 : vector<8x8xf32>
    %82 = math.exp %81 : vector<8x8xf32>
    %cst_25 = arith.constant dense<0.000000e+00> : vector<8xf32>
    %83 = vector.multi_reduction <add>, %82, %cst_25 [1] : vector<8x8xf32> to vector<8xf32>
    %84 = vector.shape_cast %83 : vector<8xf32> to vector<8x1xf32>
    %85 = tpu.reciprocal %84 {approx = true} : vector<8x1xf32> -> vector<8x1xf32>
    %86 = vector.broadcast %85 : vector<8x1xf32> to vector<8x8xf32>
    %87 = arith.mulf %82, %86 : vector<8x8xf32>
    %88 = arith.truncf %87 : vector<8x8xf32> to vector<8x8xbf16>
    %cst_26 = arith.constant dense<0.000000e+00> : vector<8x8xf32>
    %89 = tpu.matmul %88, %74, %cst_26 {dimension_numbers = #tpu.dot_dimension_numbers<[1], [0], [0], [1], [0, 0, 1, 1], [], []>} : vector<8x8xbf16>, vector<8x8xbf16>, vector<8x8xf32> -> vector<8x8xf32>
    %90 = tpu.concatenate %71, %89 in 1 : vector<8x8xf32>, vector<8x8xf32> -> vector<8x16xf32>
    %91 = arith.truncf %90 : vector<8x16xf32> to vector<8x16xbf16>
    %c0_27 = arith.constant 0 : index
    %c0_28 = arith.constant 0 : index
    %c16 = arith.constant 16 : index
    %92 = vector.load %arg5[%c0_27, %c0_28, %c16] : memref<1x8x32xbf16, #tpu.memory_space<vmem>>, vector<1x8x16xbf16>
    %93 = vector.shape_cast %92 : vector<1x8x16xbf16> to vector<8x16xbf16>
    %94 = vector.shape_cast %91 : vector<8x16xbf16> to vector<1x8x16xbf16>
    tpu.vector_store %arg5[%c0_27, %c0_28, %c16], %94 {strides = array<i32>} : memref<1x8x32xbf16, #tpu.memory_space<vmem>>, vector<1x8x16xbf16>,
    return
  }
  func.func @transform_0(%arg0: i32, %arg1: i32) -> (i32, i32, i32) {
    %c0_i32 = arith.constant 0 : i32
    %c0_i32_0 = arith.constant 0 : i32
    return %arg0, %arg1, %c0_i32 : i32, i32, i32
  }
  func.func @transform_1(%arg0: i32, %arg1: i32) -> (i32, i32, i32) {
    %c0_i32 = arith.constant 0 : i32
    %c0_i32_0 = arith.constant 0 : i32
    %c0_i32_1 = arith.constant 0 : i32
    return %arg0, %c0_i32, %c0_i32_0 : i32, i32, i32
  }
  func.func @transform_2(%arg0: i32, %arg1: i32) -> (i32, i32, i32) {
    %c0_i32 = arith.constant 0 : i32
    %c0_i32_0 = arith.constant 0 : i32
    %c0_i32_1 = arith.constant 0 : i32
    return %arg0, %c0_i32, %c0_i32_0 : i32, i32, i32
  }
  func.func @transform_3(%arg0: i32, %arg1: i32) -> (i32, i32, i32) {
    %c0_i32 = arith.constant 0 : i32
    %c0_i32_0 = arith.constant 0 : i32
    return %arg0, %arg1, %c0_i32 : i32, i32, i32
  }
}

module attributes {stable_mosaic.version = 11 : i64} {
  func.func @_graph_embed_ln_kernel(%arg0: i32, %arg1: memref<1x1x8xi32, #tpu.memory_space<vmem>>, %arg2: memref<1x8x1xi32, #tpu.memory_space<vmem>>, %arg3: memref<1x1x8xf32, #tpu.memory_space<vmem>>, %arg4: memref<1x8x32xf32, #tpu.memory_space<vmem>>, %arg5: memref<1x8x32xf32, #tpu.memory_space<vmem>>, %arg6: memref<1x32xf32, #tpu.memory_space<vmem>>, %arg7: memref<1x32xf32, #tpu.memory_space<vmem>>, %arg8: memref<1x32xf32, #tpu.memory_space<vmem>>, %arg9: memref<1x8x32xbf16, #tpu.memory_space<vmem>>) attributes {dimension_semantics = [#tpu.dimension_semantics<parallel>], iteration_bounds = array<i64: 2>, scalar_prefetch = 0 : i64, scratch_operands = 0 : i64, tpu.core_type = #tpu.core_type<tc>, window_params = [{transform_indices = @transform_0, window_bounds = array<i64: 1, 1, 8>}, {transform_indices = @transform_1, window_bounds = array<i64: 1, 8, 1>}, {transform_indices = @transform_2, window_bounds = array<i64: 1, 1, 8>}, {transform_indices = @transform_3, window_bounds = array<i64: 1, 8, 32>}, {transform_indices = @transform_4, window_bounds = array<i64: 1, 8, 32>}, {pipeline_mode = #tpu.pipeline_mode<synchronous>, transform_indices = @transform_5, window_bounds = array<i64: 1, 32>}, {pipeline_mode = #tpu.pipeline_mode<synchronous>, transform_indices = @transform_6, window_bounds = array<i64: 1, 32>}, {pipeline_mode = #tpu.pipeline_mode<synchronous>, transform_indices = @transform_7, window_bounds = array<i64: 1, 32>}, {transform_indices = @transform_8, window_bounds = array<i64: 1, 8, 32>}]} {
    %c0 = arith.constant 0 : index
    %c0_0 = arith.constant 0 : index
    %c0_1 = arith.constant 0 : index
    %0 = vector.load %arg1[%c0, %c0_0, %c0_1] : memref<1x1x8xi32, #tpu.memory_space<vmem>>, vector<1x1x8xi32>
    %1 = vector.shape_cast %0 : vector<1x1x8xi32> to vector<1x8xi32>
    %c0_2 = arith.constant 0 : index
    %c0_3 = arith.constant 0 : index
    %c0_4 = arith.constant 0 : index
    %2 = vector.load %arg2[%c0_2, %c0_3, %c0_4] : memref<1x8x1xi32, #tpu.memory_space<vmem>>, vector<1x8x1xi32>
    %3 = vector.shape_cast %2 : vector<1x8x1xi32> to vector<8x1xi32>
    %c0_5 = arith.constant 0 : index
    %c0_6 = arith.constant 0 : index
    %c0_7 = arith.constant 0 : index
    %4 = vector.load %arg3[%c0_5, %c0_6, %c0_7] : memref<1x1x8xf32, #tpu.memory_space<vmem>>, vector<1x1x8xf32>
    %5 = vector.shape_cast %4 : vector<1x1x8xf32> to vector<1x8xf32>
    %c0_8 = arith.constant 0 : index
    %c0_9 = arith.constant 0 : index
    %c0_10 = arith.constant 0 : index
    %6 = vector.load %arg4[%c0_8, %c0_9, %c0_10] : memref<1x8x32xf32, #tpu.memory_space<vmem>>, vector<1x8x32xf32>
    %7 = vector.shape_cast %6 : vector<1x8x32xf32> to vector<8x32xf32>
    %c0_i32 = arith.constant 0 : i32
    %8 = vector.broadcast %c0_i32 : i32 to vector<8x1xi32>
    %9 = arith.cmpi eq, %3, %8 : vector<8x1xi32>
    %c2_i32 = arith.constant 2 : i32
    %10 = vector.broadcast %c2_i32 : i32 to vector<1x8xi32>
    %11 = arith.cmpi sge, %1, %10 : vector<1x8xi32>
    %cst = arith.constant 0.000000e+00 : f32
    %12 = vector.broadcast %cst : f32 to vector<1x8xf32>
    %13 = arith.cmpf one, %5, %12 : vector<1x8xf32>
    %14 = arith.andi %11, %13 : vector<1x8xi1>
    %15 = vector.broadcast %9 : vector<8x1xi1> to vector<8x8xi1>
    %16 = vector.broadcast %14 : vector<1x8xi1> to vector<8x8xi1>
    %17 = arith.andi %15, %16 : vector<8x8xi1>
    %18 = arith.extui %17 : vector<8x8xi1> to vector<8x8xi32>
    %19 = arith.sitofp %18 : vector<8x8xi32> to vector<8x8xf32>
    %cst_11 = arith.constant dense<0.000000e+00> : vector<8xf32>
    %20 = vector.multi_reduction <add>, %19, %cst_11 [1] : vector<8x8xf32> to vector<8xf32>
    %21 = vector.shape_cast %20 : vector<8xf32> to vector<8x1xf32>
    %cst_12 = arith.constant 1.000000e-10 : f32
    %22 = vector.broadcast %cst_12 : f32 to vector<8x1xf32>
    %23 = arith.addf %21, %22 : vector<8x1xf32>
    %24 = arith.extui %17 : vector<8x8xi1> to vector<8x8xi32>
    %25 = arith.sitofp %24 : vector<8x8xi32> to vector<8x8xf32>
    %26 = arith.truncf %25 : vector<8x8xf32> to vector<8x8xbf16>
    %27 = arith.truncf %7 : vector<8x32xf32> to vector<8x32xbf16>
    %cst_13 = arith.constant dense<0.000000e+00> : vector<8x32xf32>
    %28 = tpu.matmul %26, %27, %cst_13 {dimension_numbers = #tpu.dot_dimension_numbers<[1], [0], [0], [1], [0, 0, 1, 1], [], []>} : vector<8x8xbf16>, vector<8x32xbf16>, vector<8x32xf32> -> vector<8x32xf32>
    %29 = tpu.reciprocal %23 {approx = true} : vector<8x1xf32> -> vector<8x1xf32>
    %30 = vector.broadcast %29 : vector<8x1xf32> to vector<8x32xf32>
    %31 = arith.mulf %28, %30 : vector<8x32xf32>
    %32 = arith.extui %9 : vector<8x1xi1> to vector<8x1xi32>
    %33 = arith.sitofp %32 : vector<8x1xi32> to vector<8x1xf32>
    %cst_14 = arith.constant 1.000000e+00 : f32
    %34 = vector.broadcast %cst_14 : f32 to vector<8x1xf32>
    %35 = arith.subf %34, %33 : vector<8x1xf32>
    %36 = vector.broadcast %35 : vector<8x1xf32> to vector<8x32xf32>
    %37 = arith.mulf %7, %36 : vector<8x32xf32>
    %38 = vector.broadcast %33 : vector<8x1xf32> to vector<8x32xf32>
    %39 = arith.mulf %31, %38 : vector<8x32xf32>
    %40 = arith.addf %37, %39 : vector<8x32xf32>
    %c0_15 = arith.constant 0 : index
    %c0_16 = arith.constant 0 : index
    %c0_17 = arith.constant 0 : index
    %41 = vector.load %arg5[%c0_15, %c0_16, %c0_17] : memref<1x8x32xf32, #tpu.memory_space<vmem>>, vector<1x8x32xf32>
    %42 = vector.shape_cast %41 : vector<1x8x32xf32> to vector<8x32xf32>
    %43 = arith.addf %40, %42 : vector<8x32xf32>
    %c0_18 = arith.constant 0 : index
    %c0_19 = arith.constant 0 : index
    %44 = vector.load %arg6[%c0_18, %c0_19] : memref<1x32xf32, #tpu.memory_space<vmem>>, vector<1x32xf32>
    %45 = vector.broadcast %44 : vector<1x32xf32> to vector<8x32xf32>
    %46 = arith.addf %43, %45 : vector<8x32xf32>
    %cst_20 = arith.constant dense<0.000000e+00> : vector<8xf32>
    %47 = vector.multi_reduction <add>, %46, %cst_20 [1] : vector<8x32xf32> to vector<8xf32>
    %48 = vector.shape_cast %47 : vector<8xf32> to vector<8x1xf32>
    %cst_21 = arith.constant 3.200000e+01 : f32
    %49 = vector.broadcast %cst_21 : f32 to vector<8x1xf32>
    %50 = arith.divf %48, %49 : vector<8x1xf32>
    %51 = vector.broadcast %50 : vector<8x1xf32> to vector<8x32xf32>
    %52 = arith.subf %46, %51 : vector<8x32xf32>
    %53 = arith.mulf %52, %52 : vector<8x32xf32>
    %cst_22 = arith.constant dense<0.000000e+00> : vector<8xf32>
    %54 = vector.multi_reduction <add>, %53, %cst_22 [1] : vector<8x32xf32> to vector<8xf32>
    %55 = vector.shape_cast %54 : vector<8xf32> to vector<8x1xf32>
    %cst_23 = arith.constant 3.200000e+01 : f32
    %56 = vector.broadcast %cst_23 : f32 to vector<8x1xf32>
    %57 = arith.divf %55, %56 : vector<8x1xf32>
    %58 = vector.broadcast %50 : vector<8x1xf32> to vector<8x32xf32>
    %59 = arith.subf %46, %58 : vector<8x32xf32>
    %cst_24 = arith.constant 9.99999974E-6 : f32
    %60 = vector.broadcast %cst_24 : f32 to vector<8x1xf32>
    %61 = arith.addf %57, %60 : vector<8x1xf32>
    %62 = math.rsqrt %61 : vector<8x1xf32>
    %63 = vector.broadcast %62 : vector<8x1xf32> to vector<8x32xf32>
    %64 = arith.mulf %59, %63 : vector<8x32xf32>
    %c0_25 = arith.constant 0 : index
    %c0_26 = arith.constant 0 : index
    %65 = vector.load %arg7[%c0_25, %c0_26] : memref<1x32xf32, #tpu.memory_space<vmem>>, vector<1x32xf32>
    %66 = vector.broadcast %65 : vector<1x32xf32> to vector<8x32xf32>
    %67 = arith.mulf %64, %66 : vector<8x32xf32>
    %c0_27 = arith.constant 0 : index
    %c0_28 = arith.constant 0 : index
    %68 = vector.load %arg8[%c0_27, %c0_28] : memref<1x32xf32, #tpu.memory_space<vmem>>, vector<1x32xf32>
    %69 = vector.broadcast %68 : vector<1x32xf32> to vector<8x32xf32>
    %70 = arith.addf %67, %69 : vector<8x32xf32>
    %71 = arith.truncf %70 : vector<8x32xf32> to vector<8x32xbf16>
    %c0_29 = arith.constant 0 : index
    %c0_30 = arith.constant 0 : index
    %c0_31 = arith.constant 0 : index
    %72 = vector.load %arg9[%c0_29, %c0_30, %c0_31] : memref<1x8x32xbf16, #tpu.memory_space<vmem>>, vector<1x8x32xbf16>
    %73 = vector.shape_cast %72 : vector<1x8x32xbf16> to vector<8x32xbf16>
    %74 = vector.shape_cast %71 : vector<8x32xbf16> to vector<1x8x32xbf16>
    tpu.vector_store %arg9[%c0_29, %c0_30, %c0_31], %74 {strides = array<i32>} : memref<1x8x32xbf16, #tpu.memory_space<vmem>>, vector<1x8x32xbf16>,
    return
  }
  func.func @transform_0(%arg0: i32) -> (i32, i32, i32) {
    %c0_i32 = arith.constant 0 : i32
    %c0_i32_0 = arith.constant 0 : i32
    %c0_i32_1 = arith.constant 0 : i32
    return %arg0, %c0_i32, %c0_i32_0 : i32, i32, i32
  }
  func.func @transform_1(%arg0: i32) -> (i32, i32, i32) {
    %c0_i32 = arith.constant 0 : i32
    %c0_i32_0 = arith.constant 0 : i32
    %c0_i32_1 = arith.constant 0 : i32
    return %arg0, %c0_i32, %c0_i32_0 : i32, i32, i32
  }
  func.func @transform_2(%arg0: i32) -> (i32, i32, i32) {
    %c0_i32 = arith.constant 0 : i32
    %c0_i32_0 = arith.constant 0 : i32
    %c0_i32_1 = arith.constant 0 : i32
    return %arg0, %c0_i32, %c0_i32_0 : i32, i32, i32
  }
  func.func @transform_3(%arg0: i32) -> (i32, i32, i32) {
    %c0_i32 = arith.constant 0 : i32
    %c0_i32_0 = arith.constant 0 : i32
    %c0_i32_1 = arith.constant 0 : i32
    return %arg0, %c0_i32, %c0_i32_0 : i32, i32, i32
  }
  func.func @transform_4(%arg0: i32) -> (i32, i32, i32) {
    %c0_i32 = arith.constant 0 : i32
    %c0_i32_0 = arith.constant 0 : i32
    %c0_i32_1 = arith.constant 0 : i32
    return %arg0, %c0_i32, %c0_i32_0 : i32, i32, i32
  }
  func.func @transform_5(%arg0: i32) -> (i32, i32) {
    %c0_i32 = arith.constant 0 : i32
    %c0_i32_0 = arith.constant 0 : i32
    %c0_i32_1 = arith.constant 0 : i32
    return %c0_i32, %c0_i32_0 : i32, i32
  }
  func.func @transform_6(%arg0: i32) -> (i32, i32) {
    %c0_i32 = arith.constant 0 : i32
    %c0_i32_0 = arith.constant 0 : i32
    %c0_i32_1 = arith.constant 0 : i32
    return %c0_i32, %c0_i32_0 : i32, i32
  }
  func.func @transform_7(%arg0: i32) -> (i32, i32) {
    %c0_i32 = arith.constant 0 : i32
    %c0_i32_0 = arith.constant 0 : i32
    %c0_i32_1 = arith.constant 0 : i32
    return %c0_i32, %c0_i32_0 : i32, i32
  }
  func.func @transform_8(%arg0: i32) -> (i32, i32, i32) {
    %c0_i32 = arith.constant 0 : i32
    %c0_i32_0 = arith.constant 0 : i32
    %c0_i32_1 = arith.constant 0 : i32
    return %arg0, %c0_i32, %c0_i32_0 : i32, i32, i32
  }
}

module attributes {stable_mosaic.version = 11 : i64} {
  func.func @kernel(%arg0: i32, %arg1: memref<16x32xbf16, #tpu.memory_space<vmem>>, %arg2: memref<32x32xbf16, #tpu.memory_space<vmem>>, %arg3: memref<1x32xf32, #tpu.memory_space<vmem>>, %arg4: memref<16x32xbf16, #tpu.memory_space<vmem>>, %arg5: memref<1x32xf32, #tpu.memory_space<vmem>>, %arg6: memref<1x32xf32, #tpu.memory_space<vmem>>, %arg7: memref<16x32xbf16, #tpu.memory_space<vmem>>) attributes {dimension_semantics = [#tpu.dimension_semantics<parallel>], iteration_bounds = array<i64: 1>, scalar_prefetch = 0 : i64, scratch_operands = 0 : i64, tpu.core_type = #tpu.core_type<tc>, window_params = [{transform_indices = @transform_0, window_bounds = array<i64: 16, 32>}, {pipeline_mode = #tpu.pipeline_mode<synchronous>, transform_indices = @transform_1, window_bounds = array<i64: 32, 32>}, {pipeline_mode = #tpu.pipeline_mode<synchronous>, transform_indices = @transform_2, window_bounds = array<i64: 1, 32>}, {transform_indices = @transform_3, window_bounds = array<i64: 16, 32>}, {pipeline_mode = #tpu.pipeline_mode<synchronous>, transform_indices = @transform_4, window_bounds = array<i64: 1, 32>}, {pipeline_mode = #tpu.pipeline_mode<synchronous>, transform_indices = @transform_5, window_bounds = array<i64: 1, 32>}, {transform_indices = @transform_6, window_bounds = array<i64: 16, 32>}]} {
    %c0 = arith.constant 0 : index
    %c0_0 = arith.constant 0 : index
    %0 = vector.load %arg1[%c0, %c0_0] : memref<16x32xbf16, #tpu.memory_space<vmem>>, vector<16x32xbf16>
    %c0_1 = arith.constant 0 : index
    %c0_2 = arith.constant 0 : index
    %1 = vector.load %arg2[%c0_1, %c0_2] : memref<32x32xbf16, #tpu.memory_space<vmem>>, vector<32x32xbf16>
    %cst = arith.constant dense<0.000000e+00> : vector<16x32xf32>
    %2 = tpu.matmul %0, %1, %cst {dimension_numbers = #tpu.dot_dimension_numbers<[1], [0], [0], [1], [0, 0, 1, 1], [], []>} : vector<16x32xbf16>, vector<32x32xbf16>, vector<16x32xf32> -> vector<16x32xf32>
    %c0_3 = arith.constant 0 : index
    %c0_4 = arith.constant 0 : index
    %3 = vector.load %arg3[%c0_3, %c0_4] : memref<1x32xf32, #tpu.memory_space<vmem>>, vector<1x32xf32>
    %4 = vector.broadcast %3 : vector<1x32xf32> to vector<16x32xf32>
    %5 = arith.addf %2, %4 : vector<16x32xf32>
    %c0_5 = arith.constant 0 : index
    %c0_6 = arith.constant 0 : index
    %6 = vector.load %arg4[%c0_5, %c0_6] : memref<16x32xbf16, #tpu.memory_space<vmem>>, vector<16x32xbf16>
    %7 = arith.extf %6 : vector<16x32xbf16> to vector<16x32xf32>
    %8 = arith.addf %5, %7 : vector<16x32xf32>
    %cst_7 = arith.constant dense<0.000000e+00> : vector<16xf32>
    %9 = vector.multi_reduction <add>, %8, %cst_7 [1] : vector<16x32xf32> to vector<16xf32>
    %10 = vector.shape_cast %9 : vector<16xf32> to vector<16x1xf32>
    %cst_8 = arith.constant 3.200000e+01 : f32
    %11 = vector.broadcast %cst_8 : f32 to vector<16x1xf32>
    %12 = arith.divf %10, %11 : vector<16x1xf32>
    %13 = vector.broadcast %12 : vector<16x1xf32> to vector<16x32xf32>
    %14 = arith.subf %8, %13 : vector<16x32xf32>
    %15 = arith.mulf %14, %14 : vector<16x32xf32>
    %cst_9 = arith.constant dense<0.000000e+00> : vector<16xf32>
    %16 = vector.multi_reduction <add>, %15, %cst_9 [1] : vector<16x32xf32> to vector<16xf32>
    %17 = vector.shape_cast %16 : vector<16xf32> to vector<16x1xf32>
    %cst_10 = arith.constant 3.200000e+01 : f32
    %18 = vector.broadcast %cst_10 : f32 to vector<16x1xf32>
    %19 = arith.divf %17, %18 : vector<16x1xf32>
    %20 = vector.broadcast %12 : vector<16x1xf32> to vector<16x32xf32>
    %21 = arith.subf %8, %20 : vector<16x32xf32>
    %cst_11 = arith.constant 9.99999974E-6 : f32
    %22 = vector.broadcast %cst_11 : f32 to vector<16x1xf32>
    %23 = arith.addf %19, %22 : vector<16x1xf32>
    %24 = math.rsqrt %23 : vector<16x1xf32>
    %25 = vector.broadcast %24 : vector<16x1xf32> to vector<16x32xf32>
    %26 = arith.mulf %21, %25 : vector<16x32xf32>
    %c0_12 = arith.constant 0 : index
    %c0_13 = arith.constant 0 : index
    %27 = vector.load %arg5[%c0_12, %c0_13] : memref<1x32xf32, #tpu.memory_space<vmem>>, vector<1x32xf32>
    %28 = vector.broadcast %27 : vector<1x32xf32> to vector<16x32xf32>
    %29 = arith.mulf %26, %28 : vector<16x32xf32>
    %c0_14 = arith.constant 0 : index
    %c0_15 = arith.constant 0 : index
    %30 = vector.load %arg6[%c0_14, %c0_15] : memref<1x32xf32, #tpu.memory_space<vmem>>, vector<1x32xf32>
    %31 = vector.broadcast %30 : vector<1x32xf32> to vector<16x32xf32>
    %32 = arith.addf %29, %31 : vector<16x32xf32>
    %33 = arith.truncf %32 : vector<16x32xf32> to vector<16x32xbf16>
    %c0_16 = arith.constant 0 : index
    %c0_17 = arith.constant 0 : index
    %34 = vector.load %arg7[%c0_16, %c0_17] : memref<16x32xbf16, #tpu.memory_space<vmem>>, vector<16x32xbf16>
    tpu.vector_store %arg7[%c0_16, %c0_17], %33 {strides = array<i32>} : memref<16x32xbf16, #tpu.memory_space<vmem>>, vector<16x32xbf16>,
    return
  }
  func.func @transform_0(%arg0: i32) -> (i32, i32) {
    %c0_i32 = arith.constant 0 : i32
    %c0_i32_0 = arith.constant 0 : i32
    return %arg0, %c0_i32 : i32, i32
  }
  func.func @transform_1(%arg0: i32) -> (i32, i32) {
    %c0_i32 = arith.constant 0 : i32
    %c0_i32_0 = arith.constant 0 : i32
    %c0_i32_1 = arith.constant 0 : i32
    return %c0_i32, %c0_i32_0 : i32, i32
  }
  func.func @transform_2(%arg0: i32) -> (i32, i32) {
    %c0_i32 = arith.constant 0 : i32
    %c0_i32_0 = arith.constant 0 : i32
    %c0_i32_1 = arith.constant 0 : i32
    return %c0_i32, %c0_i32_0 : i32, i32
  }
  func.func @transform_3(%arg0: i32) -> (i32, i32) {
    %c0_i32 = arith.constant 0 : i32
    %c0_i32_0 = arith.constant 0 : i32
    return %arg0, %c0_i32 : i32, i32
  }
  func.func @transform_4(%arg0: i32) -> (i32, i32) {
    %c0_i32 = arith.constant 0 : i32
    %c0_i32_0 = arith.constant 0 : i32
    %c0_i32_1 = arith.constant 0 : i32
    return %c0_i32, %c0_i32_0 : i32, i32
  }
  func.func @transform_5(%arg0: i32) -> (i32, i32) {
    %c0_i32 = arith.constant 0 : i32
    %c0_i32_0 = arith.constant 0 : i32
    %c0_i32_1 = arith.constant 0 : i32
    return %c0_i32, %c0_i32_0 : i32, i32
  }
  func.func @transform_6(%arg0: i32) -> (i32, i32) {
    %c0_i32 = arith.constant 0 : i32
    %c0_i32_0 = arith.constant 0 : i32
    return %arg0, %c0_i32 : i32, i32
  }
}

module attributes {stable_mosaic.version = 11 : i64} {
  func.func @kernel(%arg0: i32, %arg1: memref<16x32xbf16, #tpu.memory_space<vmem>>, %arg2: memref<32x64xbf16, #tpu.memory_space<vmem>>, %arg3: memref<1x64xf32, #tpu.memory_space<vmem>>, %arg4: memref<16x64xbf16, #tpu.memory_space<vmem>>) attributes {dimension_semantics = [#tpu.dimension_semantics<parallel>], iteration_bounds = array<i64: 1>, scalar_prefetch = 0 : i64, scratch_operands = 0 : i64, tpu.core_type = #tpu.core_type<tc>, window_params = [{transform_indices = @transform_0, window_bounds = array<i64: 16, 32>}, {pipeline_mode = #tpu.pipeline_mode<synchronous>, transform_indices = @transform_1, window_bounds = array<i64: 32, 64>}, {pipeline_mode = #tpu.pipeline_mode<synchronous>, transform_indices = @transform_2, window_bounds = array<i64: 1, 64>}, {transform_indices = @transform_3, window_bounds = array<i64: 16, 64>}]} {
    %c0 = arith.constant 0 : index
    %c0_0 = arith.constant 0 : index
    %0 = vector.load %arg1[%c0, %c0_0] : memref<16x32xbf16, #tpu.memory_space<vmem>>, vector<16x32xbf16>
    %c0_1 = arith.constant 0 : index
    %c0_2 = arith.constant 0 : index
    %1 = vector.load %arg2[%c0_1, %c0_2] : memref<32x64xbf16, #tpu.memory_space<vmem>>, vector<32x64xbf16>
    %cst = arith.constant dense<0.000000e+00> : vector<16x64xf32>
    %2 = tpu.matmul %0, %1, %cst {dimension_numbers = #tpu.dot_dimension_numbers<[1], [0], [0], [1], [0, 0, 1, 1], [], []>} : vector<16x32xbf16>, vector<32x64xbf16>, vector<16x64xf32> -> vector<16x64xf32>
    %c0_3 = arith.constant 0 : index
    %c0_4 = arith.constant 0 : index
    %3 = vector.load %arg3[%c0_3, %c0_4] : memref<1x64xf32, #tpu.memory_space<vmem>>, vector<1x64xf32>
    %4 = vector.broadcast %3 : vector<1x64xf32> to vector<16x64xf32>
    %5 = arith.addf %2, %4 : vector<16x64xf32>
    %6 = arith.mulf %5, %5 : vector<16x64xf32>
    %7 = arith.mulf %5, %6 : vector<16x64xf32>
    %cst_5 = arith.constant 4.471500e-02 : f32
    %8 = vector.broadcast %cst_5 : f32 to vector<16x64xf32>
    %9 = arith.mulf %8, %7 : vector<16x64xf32>
    %10 = arith.addf %5, %9 : vector<16x64xf32>
    %cst_6 = arith.constant 0.797884583 : f32
    %11 = vector.broadcast %cst_6 : f32 to vector<16x64xf32>
    %12 = arith.mulf %11, %10 : vector<16x64xf32>
    %13 = math.tanh %12 : vector<16x64xf32>
    %cst_7 = arith.constant 1.000000e+00 : f32
    %14 = vector.broadcast %cst_7 : f32 to vector<16x64xf32>
    %15 = arith.addf %14, %13 : vector<16x64xf32>
    %cst_8 = arith.constant 5.000000e-01 : f32
    %16 = vector.broadcast %cst_8 : f32 to vector<16x64xf32>
    %17 = arith.mulf %16, %15 : vector<16x64xf32>
    %18 = arith.mulf %5, %17 : vector<16x64xf32>
    %19 = arith.truncf %18 : vector<16x64xf32> to vector<16x64xbf16>
    %c0_9 = arith.constant 0 : index
    %c0_10 = arith.constant 0 : index
    %20 = vector.load %arg4[%c0_9, %c0_10] : memref<16x64xbf16, #tpu.memory_space<vmem>>, vector<16x64xbf16>
    tpu.vector_store %arg4[%c0_9, %c0_10], %19 {strides = array<i32>} : memref<16x64xbf16, #tpu.memory_space<vmem>>, vector<16x64xbf16>,
    return
  }
  func.func @transform_0(%arg0: i32) -> (i32, i32) {
    %c0_i32 = arith.constant 0 : i32
    %c0_i32_0 = arith.constant 0 : i32
    return %arg0, %c0_i32 : i32, i32
  }
  func.func @transform_1(%arg0: i32) -> (i32, i32) {
    %c0_i32 = arith.constant 0 : i32
    %c0_i32_0 = arith.constant 0 : i32
    %c0_i32_1 = arith.constant 0 : i32
    return %c0_i32, %c0_i32_0 : i32, i32
  }
  func.func @transform_2(%arg0: i32) -> (i32, i32) {
    %c0_i32 = arith.constant 0 : i32
    %c0_i32_0 = arith.constant 0 : i32
    %c0_i32_1 = arith.constant 0 : i32
    return %c0_i32, %c0_i32_0 : i32, i32
  }
  func.func @transform_3(%arg0: i32) -> (i32, i32) {
    %c0_i32 = arith.constant 0 : i32
    %c0_i32_0 = arith.constant 0 : i32
    return %arg0, %c0_i32 : i32, i32
  }
}

module attributes {stable_mosaic.version = 11 : i64} {
  func.func @kernel(%arg0: i32, %arg1: memref<16x64xbf16, #tpu.memory_space<vmem>>, %arg2: memref<64x32xbf16, #tpu.memory_space<vmem>>, %arg3: memref<1x32xf32, #tpu.memory_space<vmem>>, %arg4: memref<16x32xbf16, #tpu.memory_space<vmem>>, %arg5: memref<1x32xf32, #tpu.memory_space<vmem>>, %arg6: memref<1x32xf32, #tpu.memory_space<vmem>>, %arg7: memref<16x32xbf16, #tpu.memory_space<vmem>>) attributes {dimension_semantics = [#tpu.dimension_semantics<parallel>], iteration_bounds = array<i64: 1>, scalar_prefetch = 0 : i64, scratch_operands = 0 : i64, tpu.core_type = #tpu.core_type<tc>, window_params = [{transform_indices = @transform_0, window_bounds = array<i64: 16, 64>}, {pipeline_mode = #tpu.pipeline_mode<synchronous>, transform_indices = @transform_1, window_bounds = array<i64: 64, 32>}, {pipeline_mode = #tpu.pipeline_mode<synchronous>, transform_indices = @transform_2, window_bounds = array<i64: 1, 32>}, {transform_indices = @transform_3, window_bounds = array<i64: 16, 32>}, {pipeline_mode = #tpu.pipeline_mode<synchronous>, transform_indices = @transform_4, window_bounds = array<i64: 1, 32>}, {pipeline_mode = #tpu.pipeline_mode<synchronous>, transform_indices = @transform_5, window_bounds = array<i64: 1, 32>}, {transform_indices = @transform_6, window_bounds = array<i64: 16, 32>}]} {
    %c0 = arith.constant 0 : index
    %c0_0 = arith.constant 0 : index
    %0 = vector.load %arg1[%c0, %c0_0] : memref<16x64xbf16, #tpu.memory_space<vmem>>, vector<16x64xbf16>
    %c0_1 = arith.constant 0 : index
    %c0_2 = arith.constant 0 : index
    %1 = vector.load %arg2[%c0_1, %c0_2] : memref<64x32xbf16, #tpu.memory_space<vmem>>, vector<64x32xbf16>
    %cst = arith.constant dense<0.000000e+00> : vector<16x32xf32>
    %2 = tpu.matmul %0, %1, %cst {dimension_numbers = #tpu.dot_dimension_numbers<[1], [0], [0], [1], [0, 0, 1, 1], [], []>} : vector<16x64xbf16>, vector<64x32xbf16>, vector<16x32xf32> -> vector<16x32xf32>
    %c0_3 = arith.constant 0 : index
    %c0_4 = arith.constant 0 : index
    %3 = vector.load %arg3[%c0_3, %c0_4] : memref<1x32xf32, #tpu.memory_space<vmem>>, vector<1x32xf32>
    %4 = vector.broadcast %3 : vector<1x32xf32> to vector<16x32xf32>
    %5 = arith.addf %2, %4 : vector<16x32xf32>
    %c0_5 = arith.constant 0 : index
    %c0_6 = arith.constant 0 : index
    %6 = vector.load %arg4[%c0_5, %c0_6] : memref<16x32xbf16, #tpu.memory_space<vmem>>, vector<16x32xbf16>
    %7 = arith.extf %6 : vector<16x32xbf16> to vector<16x32xf32>
    %8 = arith.addf %5, %7 : vector<16x32xf32>
    %cst_7 = arith.constant dense<0.000000e+00> : vector<16xf32>
    %9 = vector.multi_reduction <add>, %8, %cst_7 [1] : vector<16x32xf32> to vector<16xf32>
    %10 = vector.shape_cast %9 : vector<16xf32> to vector<16x1xf32>
    %cst_8 = arith.constant 3.200000e+01 : f32
    %11 = vector.broadcast %cst_8 : f32 to vector<16x1xf32>
    %12 = arith.divf %10, %11 : vector<16x1xf32>
    %13 = vector.broadcast %12 : vector<16x1xf32> to vector<16x32xf32>
    %14 = arith.subf %8, %13 : vector<16x32xf32>
    %15 = arith.mulf %14, %14 : vector<16x32xf32>
    %cst_9 = arith.constant dense<0.000000e+00> : vector<16xf32>
    %16 = vector.multi_reduction <add>, %15, %cst_9 [1] : vector<16x32xf32> to vector<16xf32>
    %17 = vector.shape_cast %16 : vector<16xf32> to vector<16x1xf32>
    %cst_10 = arith.constant 3.200000e+01 : f32
    %18 = vector.broadcast %cst_10 : f32 to vector<16x1xf32>
    %19 = arith.divf %17, %18 : vector<16x1xf32>
    %20 = vector.broadcast %12 : vector<16x1xf32> to vector<16x32xf32>
    %21 = arith.subf %8, %20 : vector<16x32xf32>
    %cst_11 = arith.constant 9.99999974E-6 : f32
    %22 = vector.broadcast %cst_11 : f32 to vector<16x1xf32>
    %23 = arith.addf %19, %22 : vector<16x1xf32>
    %24 = math.rsqrt %23 : vector<16x1xf32>
    %25 = vector.broadcast %24 : vector<16x1xf32> to vector<16x32xf32>
    %26 = arith.mulf %21, %25 : vector<16x32xf32>
    %c0_12 = arith.constant 0 : index
    %c0_13 = arith.constant 0 : index
    %27 = vector.load %arg5[%c0_12, %c0_13] : memref<1x32xf32, #tpu.memory_space<vmem>>, vector<1x32xf32>
    %28 = vector.broadcast %27 : vector<1x32xf32> to vector<16x32xf32>
    %29 = arith.mulf %26, %28 : vector<16x32xf32>
    %c0_14 = arith.constant 0 : index
    %c0_15 = arith.constant 0 : index
    %30 = vector.load %arg6[%c0_14, %c0_15] : memref<1x32xf32, #tpu.memory_space<vmem>>, vector<1x32xf32>
    %31 = vector.broadcast %30 : vector<1x32xf32> to vector<16x32xf32>
    %32 = arith.addf %29, %31 : vector<16x32xf32>
    %33 = arith.truncf %32 : vector<16x32xf32> to vector<16x32xbf16>
    %c0_16 = arith.constant 0 : index
    %c0_17 = arith.constant 0 : index
    %34 = vector.load %arg7[%c0_16, %c0_17] : memref<16x32xbf16, #tpu.memory_space<vmem>>, vector<16x32xbf16>
    tpu.vector_store %arg7[%c0_16, %c0_17], %33 {strides = array<i32>} : memref<16x32xbf16, #tpu.memory_space<vmem>>, vector<16x32xbf16>,
    return
  }
  func.func @transform_0(%arg0: i32) -> (i32, i32) {
    %c0_i32 = arith.constant 0 : i32
    %c0_i32_0 = arith.constant 0 : i32
    return %arg0, %c0_i32 : i32, i32
  }
  func.func @transform_1(%arg0: i32) -> (i32, i32) {
    %c0_i32 = arith.constant 0 : i32
    %c0_i32_0 = arith.constant 0 : i32
    %c0_i32_1 = arith.constant 0 : i32
    return %c0_i32, %c0_i32_0 : i32, i32
  }
  func.func @transform_2(%arg0: i32) -> (i32, i32) {
    %c0_i32 = arith.constant 0 : i32
    %c0_i32_0 = arith.constant 0 : i32
    %c0_i32_1 = arith.constant 0 : i32
    return %c0_i32, %c0_i32_0 : i32, i32
  }
  func.func @transform_3(%arg0: i32) -> (i32, i32) {
    %c0_i32 = arith.constant 0 : i32
    %c0_i32_0 = arith.constant 0 : i32
    return %arg0, %c0_i32 : i32, i32
  }
  func.func @transform_4(%arg0: i32) -> (i32, i32) {
    %c0_i32 = arith.constant 0 : i32
    %c0_i32_0 = arith.constant 0 : i32
    %c0_i32_1 = arith.constant 0 : i32
    return %c0_i32, %c0_i32_0 : i32, i32
  }
  func.func @transform_5(%arg0: i32) -> (i32, i32) {
    %c0_i32 = arith.constant 0 : i32
    %c0_i32_0 = arith.constant 0 : i32
    %c0_i32_1 = arith.constant 0 : i32
    return %c0_i32, %c0_i32_0 : i32, i32
  }
  func.func @transform_6(%arg0: i32) -> (i32, i32) {
    %c0_i32 = arith.constant 0 : i32
    %c0_i32_0 = arith.constant 0 : i32
    return %arg0, %c0_i32 : i32, i32
  }
}

module attributes {stable_mosaic.version = 11 : i64} {
  func.func @_attention_kernel(%arg0: i32, %arg1: i32, %arg2: memref<1x8x96xbf16, #tpu.memory_space<vmem>>, %arg3: memref<1x8x96xbf16, #tpu.memory_space<vmem>>, %arg4: memref<1x1x8xf32, #tpu.memory_space<vmem>>, %arg5: memref<1x8x32xbf16, #tpu.memory_space<vmem>>) attributes {dimension_semantics = [#tpu.dimension_semantics<parallel>, #tpu.dimension_semantics<parallel>], iteration_bounds = array<i64: 2, 1>, scalar_prefetch = 0 : i64, scratch_operands = 0 : i64, tpu.core_type = #tpu.core_type<tc>, window_params = [{transform_indices = @transform_0, window_bounds = array<i64: 1, 8, 96>}, {transform_indices = @transform_1, window_bounds = array<i64: 1, 8, 96>}, {transform_indices = @transform_2, window_bounds = array<i64: 1, 1, 8>}, {transform_indices = @transform_3, window_bounds = array<i64: 1, 8, 32>}]} {
    %c0 = arith.constant 0 : index
    %c0_0 = arith.constant 0 : index
    %c0_1 = arith.constant 0 : index
    %0 = vector.load %arg2[%c0, %c0_0, %c0_1] : memref<1x8x96xbf16, #tpu.memory_space<vmem>>, vector<1x8x96xbf16>
    %1 = vector.shape_cast %0 : vector<1x8x96xbf16> to vector<8x96xbf16>
    %c0_2 = arith.constant 0 : index
    %c0_3 = arith.constant 0 : index
    %c0_4 = arith.constant 0 : index
    %2 = vector.load %arg3[%c0_2, %c0_3, %c0_4] : memref<1x8x96xbf16, #tpu.memory_space<vmem>>, vector<1x8x96xbf16>
    %3 = vector.shape_cast %2 : vector<1x8x96xbf16> to vector<8x96xbf16>
    %c0_5 = arith.constant 0 : index
    %c0_6 = arith.constant 0 : index
    %c0_7 = arith.constant 0 : index
    %4 = vector.load %arg4[%c0_5, %c0_6, %c0_7] : memref<1x1x8xf32, #tpu.memory_space<vmem>>, vector<1x1x8xf32>
    %5 = vector.shape_cast %4 : vector<1x1x8xf32> to vector<1x8xf32>
    %6 = vector.extract_strided_slice %1 {offsets = [0, 0], sizes = [8, 32], strides = [1, 1]} : vector<8x96xbf16> to vector<8x32xbf16>
    %7 = arith.extf %6 : vector<8x32xbf16> to vector<8x32xf32>
    %cst = arith.constant 0.353553385 : f32
    %8 = vector.broadcast %cst : f32 to vector<8x32xf32>
    %9 = arith.mulf %7, %8 : vector<8x32xf32>
    %10 = arith.truncf %9 : vector<8x32xf32> to vector<8x32xbf16>
    %11 = vector.extract_strided_slice %3 {offsets = [0, 32], sizes = [8, 32], strides = [1, 1]} : vector<8x96xbf16> to vector<8x32xbf16>
    %12 = vector.extract_strided_slice %3 {offsets = [0, 64], sizes = [8, 32], strides = [1, 1]} : vector<8x96xbf16> to vector<8x32xbf16>
    %13 = vector.extract_strided_slice %10 {offsets = [0, 0], sizes = [8, 8], strides = [1, 1]} : vector<8x32xbf16> to vector<8x8xbf16>
    %14 = vector.extract_strided_slice %11 {offsets = [0, 0], sizes = [8, 8], strides = [1, 1]} : vector<8x32xbf16> to vector<8x8xbf16>
    %15 = vector.extract_strided_slice %12 {offsets = [0, 0], sizes = [8, 8], strides = [1, 1]} : vector<8x32xbf16> to vector<8x8xbf16>
    %cst_8 = arith.constant dense<0.000000e+00> : vector<8x8xf32>
    %16 = tpu.matmul %13, %14, %cst_8 {dimension_numbers = #tpu.dot_dimension_numbers<[1], [1], [0], [0], [0, 0, 1, 0], [], []>} : vector<8x8xbf16>, vector<8x8xbf16>, vector<8x8xf32> -> vector<8x8xf32>
    %17 = vector.broadcast %5 : vector<1x8xf32> to vector<8x8xf32>
    %18 = arith.addf %16, %17 : vector<8x8xf32>
    %cst_9 = arith.constant dense<0xFF800000> : vector<8xf32>
    %19 = vector.multi_reduction <maximumf>, %18, %cst_9 [1] : vector<8x8xf32> to vector<8xf32>
    %20 = vector.shape_cast %19 : vector<8xf32> to vector<8x1xf32>
    %21 = vector.broadcast %20 : vector<8x1xf32> to vector<8x8xf32>
    %22 = arith.subf %18, %21 : vector<8x8xf32>
    %23 = math.exp %22 : vector<8x8xf32>
    %cst_10 = arith.constant dense<0.000000e+00> : vector<8xf32>
    %24 = vector.multi_reduction <add>, %23, %cst_10 [1] : vector<8x8xf32> to vector<8xf32>
    %25 = vector.shape_cast %24 : vector<8xf32> to vector<8x1xf32>
    %26 = tpu.reciprocal %25 {approx = true} : vector<8x1xf32> -> vector<8x1xf32>
    %27 = vector.broadcast %26 : vector<8x1xf32> to vector<8x8xf32>
    %28 = arith.mulf %23, %27 : vector<8x8xf32>
    %29 = arith.truncf %28 : vector<8x8xf32> to vector<8x8xbf16>
    %cst_11 = arith.constant dense<0.000000e+00> : vector<8x8xf32>
    %30 = tpu.matmul %29, %15, %cst_11 {dimension_numbers = #tpu.dot_dimension_numbers<[1], [0], [0], [1], [0, 0, 1, 1], [], []>} : vector<8x8xbf16>, vector<8x8xbf16>, vector<8x8xf32> -> vector<8x8xf32>
    %31 = vector.extract_strided_slice %10 {offsets = [0, 8], sizes = [8, 8], strides = [1, 1]} : vector<8x32xbf16> to vector<8x8xbf16>
    %32 = vector.extract_strided_slice %11 {offsets = [0, 8], sizes = [8, 8], strides = [1, 1]} : vector<8x32xbf16> to vector<8x8xbf16>
    %33 = vector.extract_strided_slice %12 {offsets = [0, 8], sizes = [8, 8], strides = [1, 1]} : vector<8x32xbf16> to vector<8x8xbf16>
    %cst_12 = arith.constant dense<0.000000e+00> : vector<8x8xf32>
    %34 = tpu.matmul %31, %32, %cst_12 {dimension_numbers = #tpu.dot_dimension_numbers<[1], [1], [0], [0], [0, 0, 1, 0], [], []>} : vector<8x8xbf16>, vector<8x8xbf16>, vector<8x8xf32> -> vector<8x8xf32>
    %35 = vector.broadcast %5 : vector<1x8xf32> to vector<8x8xf32>
    %36 = arith.addf %34, %35 : vector<8x8xf32>
    %cst_13 = arith.constant dense<0xFF800000> : vector<8xf32>
    %37 = vector.multi_reduction <maximumf>, %36, %cst_13 [1] : vector<8x8xf32> to vector<8xf32>
    %38 = vector.shape_cast %37 : vector<8xf32> to vector<8x1xf32>
    %39 = vector.broadcast %38 : vector<8x1xf32> to vector<8x8xf32>
    %40 = arith.subf %36, %39 : vector<8x8xf32>
    %41 = math.exp %40 : vector<8x8xf32>
    %cst_14 = arith.constant dense<0.000000e+00> : vector<8xf32>
    %42 = vector.multi_reduction <add>, %41, %cst_14 [1] : vector<8x8xf32> to vector<8xf32>
    %43 = vector.shape_cast %42 : vector<8xf32> to vector<8x1xf32>
    %44 = tpu.reciprocal %43 {approx = true} : vector<8x1xf32> -> vector<8x1xf32>
    %45 = vector.broadcast %44 : vector<8x1xf32> to vector<8x8xf32>
    %46 = arith.mulf %41, %45 : vector<8x8xf32>
    %47 = arith.truncf %46 : vector<8x8xf32> to vector<8x8xbf16>
    %cst_15 = arith.constant dense<0.000000e+00> : vector<8x8xf32>
    %48 = tpu.matmul %47, %33, %cst_15 {dimension_numbers = #tpu.dot_dimension_numbers<[1], [0], [0], [1], [0, 0, 1, 1], [], []>} : vector<8x8xbf16>, vector<8x8xbf16>, vector<8x8xf32> -> vector<8x8xf32>
    %49 = tpu.concatenate %30, %48 in 1 : vector<8x8xf32>, vector<8x8xf32> -> vector<8x16xf32>
    %50 = arith.truncf %49 : vector<8x16xf32> to vector<8x16xbf16>
    %c0_16 = arith.constant 0 : index
    %c0_17 = arith.constant 0 : index
    %c0_18 = arith.constant 0 : index
    %51 = vector.load %arg5[%c0_16, %c0_17, %c0_18] : memref<1x8x32xbf16, #tpu.memory_space<vmem>>, vector<1x8x16xbf16>
    %52 = vector.shape_cast %51 : vector<1x8x16xbf16> to vector<8x16xbf16>
    %53 = vector.shape_cast %50 : vector<8x16xbf16> to vector<1x8x16xbf16>
    tpu.vector_store %arg5[%c0_16, %c0_17, %c0_18], %53 {strides = array<i32>} : memref<1x8x32xbf16, #tpu.memory_space<vmem>>, vector<1x8x16xbf16>,
    %54 = vector.extract_strided_slice %10 {offsets = [0, 16], sizes = [8, 8], strides = [1, 1]} : vector<8x32xbf16> to vector<8x8xbf16>
    %55 = vector.extract_strided_slice %11 {offsets = [0, 16], sizes = [8, 8], strides = [1, 1]} : vector<8x32xbf16> to vector<8x8xbf16>
    %56 = vector.extract_strided_slice %12 {offsets = [0, 16], sizes = [8, 8], strides = [1, 1]} : vector<8x32xbf16> to vector<8x8xbf16>
    %cst_19 = arith.constant dense<0.000000e+00> : vector<8x8xf32>
    %57 = tpu.matmul %54, %55, %cst_19 {dimension_numbers = #tpu.dot_dimension_numbers<[1], [1], [0], [0], [0, 0, 1, 0], [], []>} : vector<8x8xbf16>, vector<8x8xbf16>, vector<8x8xf32> -> vector<8x8xf32>
    %58 = vector.broadcast %5 : vector<1x8xf32> to vector<8x8xf32>
    %59 = arith.addf %57, %58 : vector<8x8xf32>
    %cst_20 = arith.constant dense<0xFF800000> : vector<8xf32>
    %60 = vector.multi_reduction <maximumf>, %59, %cst_20 [1] : vector<8x8xf32> to vector<8xf32>
    %61 = vector.shape_cast %60 : vector<8xf32> to vector<8x1xf32>
    %62 = vector.broadcast %61 : vector<8x1xf32> to vector<8x8xf32>
    %63 = arith.subf %59, %62 : vector<8x8xf32>
    %64 = math.exp %63 : vector<8x8xf32>
    %cst_21 = arith.constant dense<0.000000e+00> : vector<8xf32>
    %65 = vector.multi_reduction <add>, %64, %cst_21 [1] : vector<8x8xf32> to vector<8xf32>
    %66 = vector.shape_cast %65 : vector<8xf32> to vector<8x1xf32>
    %67 = tpu.reciprocal %66 {approx = true} : vector<8x1xf32> -> vector<8x1xf32>
    %68 = vector.broadcast %67 : vector<8x1xf32> to vector<8x8xf32>
    %69 = arith.mulf %64, %68 : vector<8x8xf32>
    %70 = arith.truncf %69 : vector<8x8xf32> to vector<8x8xbf16>
    %cst_22 = arith.constant dense<0.000000e+00> : vector<8x8xf32>
    %71 = tpu.matmul %70, %56, %cst_22 {dimension_numbers = #tpu.dot_dimension_numbers<[1], [0], [0], [1], [0, 0, 1, 1], [], []>} : vector<8x8xbf16>, vector<8x8xbf16>, vector<8x8xf32> -> vector<8x8xf32>
    %72 = vector.extract_strided_slice %10 {offsets = [0, 24], sizes = [8, 8], strides = [1, 1]} : vector<8x32xbf16> to vector<8x8xbf16>
    %73 = vector.extract_strided_slice %11 {offsets = [0, 24], sizes = [8, 8], strides = [1, 1]} : vector<8x32xbf16> to vector<8x8xbf16>
    %74 = vector.extract_strided_slice %12 {offsets = [0, 24], sizes = [8, 8], strides = [1, 1]} : vector<8x32xbf16> to vector<8x8xbf16>
    %cst_23 = arith.constant dense<0.000000e+00> : vector<8x8xf32>
    %75 = tpu.matmul %72, %73, %cst_23 {dimension_numbers = #tpu.dot_dimension_numbers<[1], [1], [0], [0], [0, 0, 1, 0], [], []>} : vector<8x8xbf16>, vector<8x8xbf16>, vector<8x8xf32> -> vector<8x8xf32>
    %76 = vector.broadcast %5 : vector<1x8xf32> to vector<8x8xf32>
    %77 = arith.addf %75, %76 : vector<8x8xf32>
    %cst_24 = arith.constant dense<0xFF800000> : vector<8xf32>
    %78 = vector.multi_reduction <maximumf>, %77, %cst_24 [1] : vector<8x8xf32> to vector<8xf32>
    %79 = vector.shape_cast %78 : vector<8xf32> to vector<8x1xf32>
    %80 = vector.broadcast %79 : vector<8x1xf32> to vector<8x8xf32>
    %81 = arith.subf %77, %80 : vector<8x8xf32>
    %82 = math.exp %81 : vector<8x8xf32>
    %cst_25 = arith.constant dense<0.000000e+00> : vector<8xf32>
    %83 = vector.multi_reduction <add>, %82, %cst_25 [1] : vector<8x8xf32> to vector<8xf32>
    %84 = vector.shape_cast %83 : vector<8xf32> to vector<8x1xf32>
    %85 = tpu.reciprocal %84 {approx = true} : vector<8x1xf32> -> vector<8x1xf32>
    %86 = vector.broadcast %85 : vector<8x1xf32> to vector<8x8xf32>
    %87 = arith.mulf %82, %86 : vector<8x8xf32>
    %88 = arith.truncf %87 : vector<8x8xf32> to vector<8x8xbf16>
    %cst_26 = arith.constant dense<0.000000e+00> : vector<8x8xf32>
    %89 = tpu.matmul %88, %74, %cst_26 {dimension_numbers = #tpu.dot_dimension_numbers<[1], [0], [0], [1], [0, 0, 1, 1], [], []>} : vector<8x8xbf16>, vector<8x8xbf16>, vector<8x8xf32> -> vector<8x8xf32>
    %90 = tpu.concatenate %71, %89 in 1 : vector<8x8xf32>, vector<8x8xf32> -> vector<8x16xf32>
    %91 = arith.truncf %90 : vector<8x16xf32> to vector<8x16xbf16>
    %c0_27 = arith.constant 0 : index
    %c0_28 = arith.constant 0 : index
    %c16 = arith.constant 16 : index
    %92 = vector.load %arg5[%c0_27, %c0_28, %c16] : memref<1x8x32xbf16, #tpu.memory_space<vmem>>, vector<1x8x16xbf16>
    %93 = vector.shape_cast %92 : vector<1x8x16xbf16> to vector<8x16xbf16>
    %94 = vector.shape_cast %91 : vector<8x16xbf16> to vector<1x8x16xbf16>
    tpu.vector_store %arg5[%c0_27, %c0_28, %c16], %94 {strides = array<i32>} : memref<1x8x32xbf16, #tpu.memory_space<vmem>>, vector<1x8x16xbf16>,
    return
  }
  func.func @transform_0(%arg0: i32, %arg1: i32) -> (i32, i32, i32) {
    %c0_i32 = arith.constant 0 : i32
    %c0_i32_0 = arith.constant 0 : i32
    return %arg0, %arg1, %c0_i32 : i32, i32, i32
  }
  func.func @transform_1(%arg0: i32, %arg1: i32) -> (i32, i32, i32) {
    %c0_i32 = arith.constant 0 : i32
    %c0_i32_0 = arith.constant 0 : i32
    %c0_i32_1 = arith.constant 0 : i32
    return %arg0, %c0_i32, %c0_i32_0 : i32, i32, i32
  }
  func.func @transform_2(%arg0: i32, %arg1: i32) -> (i32, i32, i32) {
    %c0_i32 = arith.constant 0 : i32
    %c0_i32_0 = arith.constant 0 : i32
    %c0_i32_1 = arith.constant 0 : i32
    return %arg0, %c0_i32, %c0_i32_0 : i32, i32, i32
  }
  func.func @transform_3(%arg0: i32, %arg1: i32) -> (i32, i32, i32) {
    %c0_i32 = arith.constant 0 : i32
    %c0_i32_0 = arith.constant 0 : i32
    return %arg0, %arg1, %c0_i32 : i32, i32, i32
  }
}

</mosaic_0001>

<bundles_post_ra>
// kernel: model_forward_code.12
= control target key start
LH: loop header
LB: loop body
LE: loop exit
PB: predicated region body
PF: predicated region fallthrough
CT: control target
= control target key end

     0   :  { %8 = vsyncpa [#allocation3], 0  ;;  %s376_s0 = inlined_call_operand.hbm [shape: bf16[16,32], index: 0, kind: input, shape index: {}]   ;;  %s377_s1 = inlined_call_operand.hbm [shape: bf16[32,96], index: 1, kind: input, shape index: {}]   ;;  %s378_s2 = inlined_call_operand.hbm [shape: f32[1,96], index: 2, kind: input, shape index: {}]   ;;  %s379_s3 = inlined_call_operand.hbm [shape: bf16[16,96], index: 3, kind: output, shape index: {}]  }
   0x1   :  { %9 = vsyncpa [#allocation6], 0 }
   0x2   :  { %10 = vsyncpa [#allocation4], 0  ;;  %s284_s12 = smov [#allocation5]   ;;  %s285_s14 = smov [#allocation2]  }
   0x3   :  { %s28_s13 = sshll.u32 %s284_s12, 4  ;;  %s16_s15 = sshll.u32 %s285_s14, 4  ;;  %s29_s13 = int_to_ptr.vmem [resolvable:$true] %s28_s13  ;;  %s312_s15 = int_to_ptr.vmem [resolvable:$true] %s16_s15 }
   0x4   :  { %s190_s18 = scalar_lea.hbm %s377_s1, 256 }
   0x5   :  { %p191_p0 = scmp.ne.s32.totalorder %s377_s1, %s190_s18  ;;  %p194_p1 = scmp.lt.u32.totalorder %s190_s18, %s377_s1 }
   0x7   :  { %p196_p2 = pnand %p194_p1, %p191_p0 }
   0x9   :  { %199 = shalt.err (!%p196_p2)
}
   0xa   :  { %s200_s23 = scalar_lea.vmem %s29_s13, 256  ;;  %p205_p4 = scmp.lt.s32.totalorder %s29_s13, %s29_s13 }
   0xb   :  { %p201_p3 = scmp.ne.s32.totalorder %s29_s13, %s200_s23  ;;  %p206_p5 = scmp.lt.s32.totalorder %s200_s23, %s200_s23 }
   0xd   :  { %p207_p6 = por %p206_p5, %p205_p4 }
   0xf   :  { %p208_p7 = pnand %p207_p6, %p201_p3 }
  0x11   :  { %211 = shalt.err (!%p208_p7)
}
  0x12   :  { %s286_s24 = smov 64   ;;  %s287_s25 = smov 4  }
  0x13   :  { %34 = dma.hbm_to_vmem [thread:$0]  %s377_s1, 256, %s29_s13, [#allocation6], %s286_s24, %s286_s24, %s287_s25  }
  0x14   :  { %s212_s30 = scalar_lea.hbm %s376_s0, 128 }
  0x15   :  { %p213_p8 = scmp.ne.s32.totalorder %s376_s0, %s212_s30  ;;  %p216_p9 = scmp.lt.u32.totalorder %s212_s30, %s376_s0 }
  0x17   :  { %p218_p10 = pnand %p216_p9, %p213_p8 }
  0x19   :  { %221 = shalt.err (!%p218_p10)
}
  0x1a   :  { %s222_s8 = scalar_lea.vmem %s312_s15, 128  ;;  %p227_p12 = scmp.lt.s32.totalorder %s312_s15, %s312_s15 }
  0x1b   :  { %p223_p11 = scmp.ne.s32.totalorder %s312_s15, %s222_s8  ;;  %p228_p13 = scmp.lt.s32.totalorder %s222_s8, %s222_s8 }
  0x1d   :  { %p229_p0 = por %p228_p13, %p227_p12 }
  0x1f   :  { %p230_p1 = pnand %p229_p0, %p223_p11 }
  0x21   :  { %233 = shalt.err (!%p230_p1)
}
  0x22   :  { %22 = dma.hbm_to_vmem [thread:$0]  %s376_s0, 128, %s312_s15, [#allocation3], %s286_s24, %s286_s24, %s287_s25  }
  0x23   :  { %s288_s10 = smov [#allocation7]   ;;  %s234_s14 = scalar_lea.hbm %s378_s2, 16 }
  0x24   :  { %s41_s11 = sshll.u32 %s288_s10, 4  ;;  %p235_p2 = scmp.ne.s32.totalorder %s378_s2, %s234_s14  ;;  %s42_s11 = int_to_ptr.vmem [resolvable:$true] %s41_s11 }
  0x25   :  { %p238_p3 = scmp.lt.u32.totalorder %s234_s14, %s378_s2 }
  0x27   :  { %p240_p4 = pnand %p238_p3, %p235_p2 }
  0x29   :  { %243 = shalt.err (!%p240_p4)
}
  0x2a   :  { %s244_s20 = scalar_lea.vmem %s42_s11, 16  ;;  %s248_s0 = scalar_lea.vmem %s42_s11, 32 }
  0x2b   :  { %p245_p5 = scmp.ne.s32.totalorder %s42_s11, %s244_s20  ;;  %p249_p6 = scmp.lt.s32.totalorder %s42_s11, %s42_s11 }
  0x2c   :  { %p250_p7 = scmp.lt.s32.totalorder %s248_s0, %s244_s20 }
  0x2e   :  { %p251_p8 = por %p250_p7, %p249_p6 }
  0x30   :  { %p252_p9 = pnand %p251_p8, %p245_p5 }
  0x32   :  { %255 = shalt.err (!%p252_p9)
}
  0x33   :  { %44 = dma.hbm_to_vmem [thread:$0]  %s378_s2, 16, %s42_s11, [#allocation6]  }
  0x34   :  { %278 = dma.done.wait [#allocation3], 128  }
  0x35   :  { %279 = vsyncadd [#allocation3], 4294967168 }
  0x36   :  { %280 = dma.done.wait [#allocation6], 272  }
  0x37   :  { %281 = vsyncadd [#allocation6], 4294967024  ;;  %v289_v0 = vmov 0.0   ;;  %vm290_vm0 = vmmov 0   ;;  %v187_v1 = vld [vmem:[#allocation5] sm:$0xff]   ;;  %v188_v2 = vld [vmem:[#allocation5 + $0x8] sm:$0xff]  }
  0x38   :  { %171 = vmatprep.subr.bf16.mxu0 %v289_v0  ;;  %175 = vmatprep.mubr.msk.bf16.mxu0 %vm290_vm0, %v289_v0  ;;  %v189_v3 = vld [vmem:[#allocation2] sm:$0xff]   ;;  %vm85_vm1 = vcmask 261120   ;;  %v159_v4 = vld [vmem:[#allocation7] ss:$0 sm:$0xff]  ;;  %vm138_vm2 = vcmask 781312   ;;  %s291_s2 = smov [#allocation8]  }
  0x39   :  { %172 = vmatpush3.bf16.msra.mxu0 %v187_v1  ;;  %s146_s22 = sshll.u32 %s291_s2, 4  ;;  %s147_s22 = int_to_ptr.vmem [resolvable:$true] %s146_s22 }
  0x3a   :  { %173 = vmatprep.subr.bf16.mxu0 %v289_v0  ;;  %s256_s23 = scalar_lea.vmem %s147_s22, 128  ;;  %p261_p11 = scmp.lt.s32.totalorder %s147_s22, %s147_s22 }
  0x3b   :  { %p257_p10 = scmp.ne.s32.totalorder %s147_s22, %s256_s23  ;;  %p262_p12 = scmp.lt.s32.totalorder %s256_s23, %s256_s23 }
  0x3d   :  { %174 = vmatpush3.bf16.msra.mxu0 %v188_v2  ;;  %p263_p13 = por %p262_p12, %p261_p11 }
  0x3f   :  { %p264_p0 = pnand %p263_p13, %p257_p10 }
  0x40   :  { %176 = vmatmul.mubr.msk.bf16.vlgmr.msra.gmra.mrb[0].mxu0 %vm85_vm1, %v189_v3 }
 0x113   :  { %v123_v5 = vpop.f32.mrb[0].mxu0 }
 0x114   :  { %v124_v6 = vadd.f32 %v159_v4, %v123_v5  ;;  %v177_v7 = vpop.f32.mrb[1].mxu0 }
 0x115   :  { %v126_v8 = vpop.f32.mrb[2].mxu0 }
 0x116   :  { %v166_v9 = vpack.c.bf16 %v124_v6, %v124_v6  ;;  %v127_v10 = vadd.f32 %v159_v4, %v126_v8  ;;  %v178_v11 = vpop.f32.mrb[3].mxu0 }
 0x118   :  { %v167_v12 = vpack.c.bf16 %v127_v10, %v127_v10  ;;  %139 = vst.msk [vmem:[#allocation8] sm:$0xf] %vm138_vm2, %v166_v9 }
 0x11a   :  { %140 = vst.msk [vmem:[#allocation8 + $0x4] sm:$0xf] %vm138_vm2, %v167_v12 }
 0x11b   :  { %267 = shalt.err (!%p264_p0)
}
 0x11c   :  { %s268_s28 = scalar_lea.hbm %s379_s3, 128 }
 0x11d   :  { %p269_p1 = scmp.ne.s32.totalorder %s379_s3, %s268_s28  ;;  %p272_p2 = scmp.lt.u32.totalorder %s268_s28, %s379_s3 }
 0x11f   :  { %p274_p3 = pnand %p272_p2, %p269_p1 }
 0x121   :  { %277 = shalt.err (!%p274_p3)
}
 0x122   :  { %152 = dma.vmem_to_hbm [thread:$0]  %s147_s22, 128, %s379_s3, [#allocation4], %s286_s24, %s286_s24, %s287_s25  }
 0x123   :  { %282 = dma.done.wait [#allocation4], 128  }
 0x124   :  { %283 = vsyncadd [#allocation4], 4294967168 }
 0x125   :  { %156 = vsyncpa [#allocation3], 1 }
 0x126   :  { %157 = vsyncpa [#allocation6], 1 }
 0x127   :  { %158 = vsyncpa [#allocation4], 1 }

// kernel: model_forward_code.14
= control target key start
LH: loop header
LB: loop body
LE: loop exit
PB: predicated region body
PF: predicated region fallthrough
CT: control target
= control target key end

     0   :  { %11 = vsyncpa [#allocation3], 0  ;;  %s620_s0 = inlined_call_operand.hbm [shape: bf16[16,32], index: 0, kind: input, shape index: {}]   ;;  %s621_s1 = inlined_call_operand.hbm [shape: bf16[32,32], index: 1, kind: input, shape index: {}]   ;;  %s622_s2 = inlined_call_operand.hbm [shape: f32[1,32], index: 2, kind: input, shape index: {}]   ;;  %s623_s3 = inlined_call_operand.hbm [shape: bf16[16,32], index: 3, kind: input, shape index: {}]   ;;  %s624_s4 = inlined_call_operand.hbm [shape: f32[1,32], index: 4, kind: input, shape index: {}]   ;;  %s625_s5 = inlined_call_operand.hbm [shape: f32[1,32], index: 5, kind: input, shape index: {}]   ;;  %s626_s6 = inlined_call_operand.hbm [shape: bf16[16,32], index: 6, kind: output, shape index: {}]  }
   0x1   :  { %12 = vsyncpa [#allocation6], 0 }
   0x2   :  { %13 = vsyncpa [#allocation9], 0 }
   0x3   :  { %14 = vsyncpa [#allocation12], 0 }
   0x4   :  { %15 = vsyncpa [#allocation4], 0  ;;  %s466_s21 = smov [#allocation5]   ;;  %s467_s23 = smov [#allocation8]  }
   0x5   :  { %s33_s22 = sshll.u32 %s466_s21, 4  ;;  %s55_s24 = sshll.u32 %s467_s23, 4  ;;  %s34_s22 = int_to_ptr.vmem [resolvable:$true] %s33_s22  ;;  %s512_s24 = int_to_ptr.vmem [resolvable:$true] %s55_s24 }
   0x6   :  { %s302_s27 = scalar_lea.hbm %s621_s1, 256 }
   0x7   :  { %p303_p0 = scmp.ne.s32.totalorder %s621_s1, %s302_s27  ;;  %p306_p1 = scmp.lt.u32.totalorder %s302_s27, %s621_s1 }
   0x9   :  { %p308_p2 = pnand %p306_p1, %p303_p0 }
   0xb   :  { %311 = shalt.err (!%p308_p2)
}
   0xc   :  { %s312_s8 = scalar_lea.vmem %s34_s22, 256  ;;  %p317_p4 = scmp.lt.s32.totalorder %s34_s22, %s34_s22 }
   0xd   :  { %p313_p3 = scmp.ne.s32.totalorder %s34_s22, %s312_s8  ;;  %p318_p5 = scmp.lt.s32.totalorder %s312_s8, %s312_s8 }
   0xf   :  { %p319_p6 = por %p318_p5, %p317_p4 }
  0x11   :  { %p320_p7 = pnand %p319_p6, %p313_p3 }
  0x13   :  { %323 = shalt.err (!%p320_p7)
}
  0x14   :  { %s468_s9 = smov 64   ;;  %s469_s10 = smov 4  }
  0x15   :  { %39 = dma.hbm_to_vmem [thread:$0]  %s621_s1, 256, %s34_s22, [#allocation6], %s468_s9, %s468_s9, %s469_s10  }
  0x16   :  { %s324_s15 = scalar_lea.hbm %s623_s3, 128 }
  0x17   :  { %p325_p8 = scmp.ne.s32.totalorder %s623_s3, %s324_s15  ;;  %p328_p9 = scmp.lt.u32.totalorder %s324_s15, %s623_s3 }
  0x19   :  { %p330_p10 = pnand %p328_p9, %p325_p8 }
  0x1b   :  { %333 = shalt.err (!%p330_p10)
}
  0x1c   :  { %s334_s20 = scalar_lea.vmem %s512_s24, 128  ;;  %p339_p12 = scmp.lt.s32.totalorder %s512_s24, %s512_s24 }
  0x1d   :  { %p335_p11 = scmp.ne.s32.totalorder %s512_s24, %s334_s20  ;;  %p340_p13 = scmp.lt.s32.totalorder %s334_s20, %s334_s20 }
  0x1f   :  { %p341_p0 = por %p340_p13, %p339_p12 }
  0x21   :  { %p342_p1 = pnand %p341_p0, %p335_p11 }
  0x23   :  { %345 = shalt.err (!%p342_p1)
}
  0x24   :  { %61 = dma.hbm_to_vmem [thread:$0]  %s623_s3, 128, %s512_s24, [#allocation9], %s468_s9, %s468_s9, %s469_s10  }
  0x25   :  { %s470_s22 = smov [#allocation2]   ;;  %s471_s25 = smov [#allocation7]  }
  0x26   :  { %s21_s23 = sshll.u32 %s470_s22, 4  ;;  %s46_s26 = sshll.u32 %s471_s25, 4  ;;  %s22_s23 = int_to_ptr.vmem [resolvable:$true] %s21_s23  ;;  %s47_s26 = int_to_ptr.vmem [resolvable:$true] %s46_s26 }
  0x27   :  { %s346_s29 = scalar_lea.hbm %s620_s0, 128 }
  0x28   :  { %p347_p2 = scmp.ne.s32.totalorder %s620_s0, %s346_s29  ;;  %p350_p3 = scmp.lt.u32.totalorder %s346_s29, %s620_s0 }
  0x2a   :  { %p352_p4 = pnand %p350_p3, %p347_p2 }
  0x2c   :  { %355 = shalt.err (!%p352_p4)
}
  0x2d   :  { %s356_s3 = scalar_lea.vmem %s22_s23, 128  ;;  %p361_p6 = scmp.lt.s32.totalorder %s22_s23, %s22_s23 }
  0x2e   :  { %p357_p5 = scmp.ne.s32.totalorder %s22_s23, %s356_s3  ;;  %p362_p7 = scmp.lt.s32.totalorder %s356_s3, %s356_s3 }
  0x30   :  { %p363_p8 = por %p362_p7, %p361_p6 }
  0x32   :  { %p364_p9 = pnand %p363_p8, %p357_p5 }
  0x34   :  { %367 = shalt.err (!%p364_p9)
}
  0x35   :  { %27 = dma.hbm_to_vmem [thread:$0]  %s620_s0, 128, %s22_s23, [#allocation3], %s468_s9, %s468_s9, %s469_s10  }
  0x36   :  { %s368_s15 = scalar_lea.hbm %s622_s2, 16 }
  0x37   :  { %p369_p10 = scmp.ne.s32.totalorder %s622_s2, %s368_s15  ;;  %p372_p11 = scmp.lt.u32.totalorder %s368_s15, %s622_s2 }
  0x39   :  { %p374_p12 = pnand %p372_p11, %p369_p10 }
  0x3b   :  { %377 = shalt.err (!%p374_p12)
}
  0x3c   :  { %s378_s20 = scalar_lea.vmem %s47_s26, 16  ;;  %s382_s1 = scalar_lea.vmem %s47_s26, 32 }
  0x3d   :  { %p379_p13 = scmp.ne.s32.totalorder %s47_s26, %s378_s20  ;;  %p383_p0 = scmp.lt.s32.totalorder %s47_s26, %s47_s26 }
  0x3e   :  { %p384_p1 = scmp.lt.s32.totalorder %s382_s1, %s378_s20 }
  0x40   :  { %p385_p2 = por %p384_p1, %p383_p0 }
  0x42   :  { %p386_p3 = pnand %p385_p2, %p379_p13 }
  0x44   :  { %389 = shalt.err (!%p386_p3)
}
  0x45   :  { %49 = dma.hbm_to_vmem [thread:$0]  %s622_s2, 16, %s47_s26, [#allocation6]  }
  0x46   :  { %s472_s22 = smov [#allocation10]   ;;  %s473_s25 = smov [#allocation11]  }
  0x47   :  { %s68_s23 = sshll.u32 %s472_s22, 4  ;;  %s78_s27 = sshll.u32 %s473_s25, 4  ;;  %s69_s23 = int_to_ptr.vmem [resolvable:$true] %s68_s23  ;;  %s79_s27 = int_to_ptr.vmem [resolvable:$true] %s78_s27 }
  0x48   :  { %s390_s30 = scalar_lea.hbm %s624_s4, 16 }
  0x49   :  { %p391_p4 = scmp.ne.s32.totalorder %s624_s4, %s390_s30  ;;  %p394_p5 = scmp.lt.u32.totalorder %s390_s30, %s624_s4 }
  0x4b   :  { %p396_p6 = pnand %p394_p5, %p391_p4 }
  0x4d   :  { %399 = shalt.err (!%p396_p6)
}
  0x4e   :  { %s400_s2 = scalar_lea.vmem %s69_s23, 16  ;;  %s404_s26 = scalar_lea.vmem %s69_s23, 32 }
  0x4f   :  { %p401_p7 = scmp.ne.s32.totalorder %s69_s23, %s400_s2  ;;  %p405_p8 = scmp.lt.s32.totalorder %s69_s23, %s69_s23 }
  0x50   :  { %p406_p9 = scmp.lt.s32.totalorder %s404_s26, %s400_s2 }
  0x52   :  { %p407_p10 = por %p406_p9, %p405_p8 }
  0x54   :  { %p408_p11 = pnand %p407_p10, %p401_p7 }
  0x56   :  { %411 = shalt.err (!%p408_p11)
}
  0x57   :  { %71 = dma.hbm_to_vmem [thread:$0]  %s624_s4, 16, %s69_s23, [#allocation9]  }
  0x58   :  { %s412_s15 = scalar_lea.hbm %s625_s5, 16 }
  0x59   :  { %p413_p12 = scmp.ne.s32.totalorder %s625_s5, %s412_s15  ;;  %p416_p13 = scmp.lt.u32.totalorder %s412_s15, %s625_s5 }
  0x5b   :  { %p418_p0 = pnand %p416_p13, %p413_p12 }
  0x5d   :  { %421 = shalt.err (!%p418_p0)
}
  0x5e   :  { %s422_s20 = scalar_lea.vmem %s79_s27, 16  ;;  %s426_s1 = scalar_lea.vmem %s79_s27, 32 }
  0x5f   :  { %p423_p1 = scmp.ne.s32.totalorder %s79_s27, %s422_s20  ;;  %p427_p2 = scmp.lt.s32.totalorder %s79_s27, %s79_s27 }
  0x60   :  { %p428_p3 = scmp.lt.s32.totalorder %s426_s1, %s422_s20 }
  0x62   :  { %p429_p4 = por %p428_p3, %p427_p2 }
  0x64   :  { %p430_p5 = pnand %p429_p4, %p423_p1 }
  0x66   :  { %433 = shalt.err (!%p430_p5)
}
  0x67   :  { %81 = dma.hbm_to_vmem [thread:$0]  %s625_s5, 16, %s79_s27, [#allocation12]  }
  0x68   :  { %456 = dma.done.wait [#allocation3], 128  }
  0x69   :  { %457 = vsyncadd [#allocation3], 4294967168 }
  0x6a   :  { %458 = dma.done.wait [#allocation6], 272  }
  0x6b   :  { %459 = vsyncadd [#allocation6], 4294967024 }
  0x6c   :  { %460 = dma.done.wait [#allocation9], 144  }
  0x6d   :  { %461 = vsyncadd [#allocation9], 4294967152 }
  0x6e   :  { %462 = dma.done.wait [#allocation12], 16  }
  0x6f   :  { %463 = vsyncadd [#allocation12], 4294967280  ;;  %v474_v0 = vmov 0.0   ;;  %vm475_vm0 = vmmov 0   ;;  %v295_v1 = vld [vmem:[#allocation5] sm:$0xff]   ;;  %v296_v2 = vld [vmem:[#allocation5 + $0x8] sm:$0xff]  }
  0x70   :  { %276 = vmatprep.subr.bf16.mxu0 %v474_v0  ;;  %280 = vmatprep.mubr.msk.bf16.mxu0 %vm475_vm0, %v474_v0  ;;  %v297_v3 = vld [vmem:[#allocation2] sm:$0xff]   ;;  %vm131_vm1 = vcmask 261120   ;;  %v258_v5 = vld [vmem:[#allocation7] ss:$0 sm:$0xff]  ;;  %vm235_vm2 = vcmask 257024   ;;  %s476_s5 = smov [#allocation13]  }
  0x71   :  { %277 = vmatpush3.bf16.msra.mxu0 %v295_v1  ;;  %v270_v4 = vld [vmem:[#allocation8] sm:$0xff]   ;;  %v263_v35 = vld [vmem:[#allocation10] ss:$0 sm:$0xff]  ;;  %v264_v37 = vld [vmem:[#allocation11] ss:$0 sm:$0xff]  ;;  %s243_s21 = sshll.u32 %s476_s5, 4  ;;  %s244_s21 = int_to_ptr.vmem [resolvable:$true] %s243_s21 }
  0x72   :  { %278 = vmatprep.subr.bf16.mxu0 %v474_v0  ;;  %v271_v6 = vunpack.c.l.bf16 %v270_v4  ;;  %v272_v10 = vunpack.c.h.bf16 %v270_v4  ;;  %s434_s22 = scalar_lea.vmem %s244_s21, 128  ;;  %p439_p7 = scmp.lt.s32.totalorder %s244_s21, %s244_s21 }
  0x73   :  { %p435_p6 = scmp.ne.s32.totalorder %s244_s21, %s434_s22  ;;  %p440_p8 = scmp.lt.s32.totalorder %s434_s22, %s434_s22 }
  0x75   :  { %279 = vmatpush3.bf16.msra.mxu0 %v296_v2  ;;  %p441_p9 = por %p440_p8, %p439_p7 }
  0x77   :  { %p442_p10 = pnand %p441_p9, %p435_p6 }
  0x78   :  { %281 = vmatmul.mubr.msk.bf16.vlgmr.msra.gmra.mrb[0].mxu0 %vm131_vm1, %v297_v3 }
 0x14b   :  { %v169_v7 = vpop.f32.mrb[0].mxu0 }
 0x14c   :  { %v170_v8 = vadd.f32 %v258_v5, %v169_v7  ;;  %v282_v9 = vpop.f32.mrb[1].mxu0 }
 0x14d   :  { %v172_v11 = vpop.f32.mrb[2].mxu0 }
 0x14e   :  { %v173_v12 = vadd.f32 %v258_v5, %v172_v11  ;;  %v283_v13 = vpop.f32.mrb[3].mxu0  ;;  %v180_v14 = vadd.f32 %v271_v6, %v170_v8 }
 0x150   :  { %v182_v15 = vsel %vm131_vm1, %v180_v14, 0.0  ;;  %v181_v16 = vadd.f32 %v272_v10, %v173_v12 }
 0x151   :  { %183 = vadd.xlane.f32.xlu0 %v182_v15 }
 0x152   :  { %v185_v17 = vsel %vm131_vm1, %v181_v16, 0.0 }
 0x155   :  { %186 = vadd.xlane.f32.xlu0 %v185_v17 }
 0x1de   :  { %v184_v18 = vpop.xlane.xlu0 %183 }
 0x1df   :  { %v189_v19 = vmul.f32 0.03125, %v184_v18 }
 0x1e1   :  { %v191_v20 = vsub.f32 %v180_v14, %v189_v19 }
 0x1e2   :  { %v187_v21 = vpop.xlane.xlu0 %186 }
 0x1e3   :  { %v190_v22 = vmul.f32 0.03125, %v187_v21  ;;  %v193_v23 = vmul.f32 %v191_v20, %v191_v20 }
 0x1e5   :  { %v192_v24 = vsub.f32 %v181_v16, %v190_v22  ;;  %v195_v25 = vsel %vm131_vm1, %v193_v23, 0.0 }
 0x1e6   :  { %196 = vadd.xlane.f32.xlu1 %v195_v25 }
 0x1e7   :  { %v194_v26 = vmul.f32 %v192_v24, %v192_v24 }
 0x1e9   :  { %v198_v27 = vsel %vm131_vm1, %v194_v26, 0.0 }
 0x1ea   :  { %199 = vadd.xlane.f32.xlu1 %v198_v27 }
 0x273   :  { %v197_v28 = vpop.xlane.xlu1 %196 }
 0x274   :  { %v201_v29 = vmul.f32 0.03125, %v197_v28 }
 0x276   :  { %v203_v30 = vadd.f32 1e-05, %v201_v29 }
 0x277   :  { %v200_v31 = vpop.xlane.xlu1 %199 }
 0x278   :  { %298 = vrsqrt.f32 %v203_v30  ;;  %v202_v32 = vmul.f32 0.03125, %v200_v31 }
 0x27a   :  { %v204_v33 = vadd.f32 1e-05, %v202_v32 }
 0x27c   :  { %300 = vrsqrt.f32 %v204_v33 }
 0x282   :  { %v299_v34 = vpop.eup %298 }
 0x283   :  { %v207_v36 = vmul.f32 %v299_v34, %v191_v20 }
 0x285   :  { %v216_v38 = vmul.f32 %v263_v35, %v207_v36 }
 0x286   :  { %v301_v39 = vpop.eup %300 }
 0x287   :  { %v208_v40 = vmul.f32 %v301_v39, %v192_v24  ;;  %v225_v41 = vadd.f32 %v264_v37, %v216_v38 }
 0x289   :  { %v217_v42 = vmul.f32 %v263_v35, %v208_v40  ;;  %v267_v43 = vpack.c.bf16 %v225_v41, %v225_v41 }
 0x28b   :  { %v226_v44 = vadd.f32 %v264_v37, %v217_v42  ;;  %236 = vst.msk [vmem:[#allocation13] sm:$0xf] %vm235_vm2, %v267_v43 }
 0x28d   :  { %v268_v45 = vpack.c.bf16 %v226_v44, %v226_v44 }
 0x28f   :  { %237 = vst.msk [vmem:[#allocation13 + $0x4] sm:$0xf] %vm235_vm2, %v268_v45 }
 0x290   :  { %445 = shalt.err (!%p442_p10)
}
 0x291   :  { %s446_s27 = scalar_lea.hbm %s626_s6, 128 }
 0x292   :  { %p447_p11 = scmp.ne.s32.totalorder %s626_s6, %s446_s27  ;;  %p450_p12 = scmp.lt.u32.totalorder %s446_s27, %s626_s6 }
 0x294   :  { %p452_p13 = pnand %p450_p12, %p447_p11 }
 0x296   :  { %455 = shalt.err (!%p452_p13)
}
 0x297   :  { %249 = dma.vmem_to_hbm [thread:$0]  %s244_s21, 128, %s626_s6, [#allocation4], %s468_s9, %s468_s9, %s469_s10  }
 0x298   :  { %464 = dma.done.wait [#allocation4], 128  }
 0x299   :  { %465 = vsyncadd [#allocation4], 4294967168 }
 0x29a   :  { %253 = vsyncpa [#allocation3], 1 }
 0x29b   :  { %254 = vsyncpa [#allocation6], 1 }
 0x29c   :  { %255 = vsyncpa [#allocation9], 1 }
 0x29d   :  { %256 = vsyncpa [#allocation12], 1 }
 0x29e   :  { %257 = vsyncpa [#allocation4], 1 }

// kernel: model_forward_code.13
= control target key start
LH: loop header
LB: loop body
LE: loop exit
PB: predicated region body
PF: predicated region fallthrough
CT: control target
= control target key end

     0   :  { %8 = vsyncpa [#allocation3], 0  ;;  %s1286_s0 = inlined_call_operand.vmem [shape: bf16[2,8,96], index: 0, kind: input, shape index: {}, may-alias: {0,1}]   ;;  %s1287_s1 = inlined_call_operand.vmem [shape: bf16[2,8,96], index: 1, kind: input, shape index: {}, may-alias: {0,1}]   ;;  %s1288_s2 = inlined_call_operand.vmem [shape: f32[2,1,8], index: 2, kind: input, shape index: {}]   ;;  %s1289_s3 = inlined_call_operand.hbm [shape: bf16[2,8,32], index: 3, kind: output, shape index: {}]  }
   0x1   :  { %10 = vsyncpa [#allocation3 + $0x1], 0  ;;  %s1099_s12 = smov 0   ;;  %s1101_s13 = smov 0  }
   0x2   :  { %s1103_s14 = smov 0   ;;  %s1105_s15 = smov 0  }
   0x3   :  { %s1107_s16 = smov 0   ;;  %s1109_s17 = smov 0  }
   0x4 LB: > { %s808_s18 = sadd.s32 4294967295, %s1061_s17   ;;  %s809_s19 = sadd.s32 4294967294, %s1061_s17   ;;  %s1061_s17 = sphi %s1109_s17, %s16_s17   ;;  %s1057_s16 = sphi %s1107_s16, %s1296_s16   ;;  %s1053_s15 = sphi %s1105_s15, %s1295_s15   ;;  %s1049_s14 = sphi %s1103_s14, %s1294_s14   ;;  %s1045_s13 = sphi %s1101_s13, %s1293_s13   ;;  %s1041_s12 = sphi %s1099_s12, %s1292_s12  }
   0x5   : > { %s28_s20 = sadd.s32 1, %s1057_s16  ;;  %s117_s21 = sadd.s32 1, %s1049_s14 }
   0x6   : > { %p30_p0 = scmp.ge.s32.totalorder %s28_s20, 2  ;;  %p127_p1 = scmp.ne.s32.totalorder %s1049_s14, %s1045_s13 }
   0x7   : > { %p128_p2 = scmp.eq.s32.totalorder %s808_s18, 1  ;;  %p133_p3 = scmp.ne.s32.totalorder %s1045_s13, %s1041_s12 }
   0x8   : > { %s1298_s20 = smov (%p30_p0, %s28_s20), 0  ;;  %p134_p5 = scmp.eq.s32.totalorder %s809_s19, 1 }
   0x9   : > { %p1139_p4 = por %p128_p2, %p127_p1  ;;  %s112_s23 = ssub.s32 %s1057_s16, %s1298_s20 }
   0xa   : > { %p812_p6 = scmp.ge.s32.totalorder %s1061_s17, 1  ;;  %p115_p7 = scmp.eq.s32.totalorder %s112_s23, 0 }
   0xb   : > { %p1146_p8 = por %p134_p5, %p133_p3  ;;  %p175_p9 = scmp.lt.s32.totalorder %s1061_s17, 3 }
   0xc   : > { %s1152_s25 = scalar_select %p115_p7, %s1049_s14, %s117_s21  }
   0xd   : > { %p176_p10 = pnand %p812_p6, %p175_p9 }
   0xe   : > { %p208_p11 = scmp.lt.s32.totalorder (!%p176_p10), %s1053_s15, 1  ;;  %v1063_v0 = vmov (!%p176_p10), 0.0   ;;  %vm1064_vm0 = vmmov (!%p176_p10), 0   ;;  %s1065_s4 = smov (!%p176_p10), 96   ;;  %vm240_vm1 = vcmask (!%p176_p10), 64512   ;;  %vm304_vm2 = vcmask (!%p176_p10), 1043456  }
   0xf   : > { %179 = sbr.rel (%p176_p10) target bundleno = 1738 (0x6ca), region = 32  ;;  %848 = vmatprep.subr.bf16.mxu0 (!%p176_p10), %v1063_v0  ;;  %850 = vmatprep.mubr.msk.bf16.mxu0 (!%p176_p10), %vm1064_vm0, %v1063_v0  ;;  %s1066_s8 = smov (!%p176_p10), 64   ;;  %vm465_vm3 = vcmask (!%p176_p10), 125952   ;;  %vm699_vm4 = vcmask (!%p176_p10), 257152  }
  0x10   : > { %854 = vmatprep.subr.bf16.mxu1 (!%p176_p10), %v1063_v0  ;;  %856 = vmatprep.mubr.msk.bf16.mxu1 (!%p176_p10), %vm1064_vm0, %v1063_v0  ;;  %s1067_s9 = smov (!%p176_p10), 88   ;;  %s1068_s19 = smov (!%p176_p10), 72  }
  0x11   : > { %s1069_s21 = smov (!%p176_p10), 120   ;;  %s1070_s23 = smov (!%p176_p10), 80  }
  0x12   : > { %s1073_s28 = smov (!%p176_p10), 56   ;;  %s1074_s29 = smov (!%p176_p10), 48  }
  0x13   : > { %s205_s5 = sand.u32 (!%p176_p10), 1, %s1045_s13  }
  0x14   : > { %s813_s6 = sshll.u32 (!%p176_p10), %s205_s5, 2 }
  0x16   : > { %s209_s26 = scalar_select %p208_p11, %s1053_s15, 1 }
  0x18   : > { %s814_s27 = sshll.u32 %s209_s26, 2  ;;  %s221_s18 = scalar_lea.vmem %s1288_s2, %s209_s26 }
  0x19   : > { %s218_s30 = scalar_lea.vmem %s1287_s1, %s814_s27  ;;  %s214_s7 = scalar_lea.vmem %s1286_s0, %s814_s27  ;;  %v1181_v8 = vld [vmem:[%s221_s18] ss:$0 sm:$0xff] }
  0x1a   : > { %v1165_v1 = vld [vmem:[%s218_s30] ss:$0 sps:$4 sm:$0xff]   ;;  %s1071_s26 = smov 112   ;;  %s1072_s27 = smov 104  }
  0x1b   : > { %238 = vrot.lane.b32.xlu0 %v1165_v1, %s1065_s4  ;;  %v223_v2 = vld [vmem:[%s214_s7] sm:$0xf]  ;;  %299 = vrot.lane.b32.xlu1 %v1165_v1, %s1066_s8  ;;  %s1075_s30 = smov 40   ;;  %s1076_s4 = smov 8  }
  0x1c   : > { %v226_v3 = vunpack.c.l.bf16 %v223_v2  ;;  %s207_s7 = scalar_lea.vmem [#allocation2], %s813_s6  ;;  %s1077_s8 = smov 16  }
  0x1d   : > { %s716_s10 = sshll.u32 %s207_s7, 4  ;;  %s1241_s10 = int_to_ptr.vmem [resolvable:$true] %s716_s10 }
  0x1e   : > { %v227_v6 = vmul.f32 0.35355338, %v226_v3 }
  0x1f   : > { %351 = vrot.lane.b32.xlu1 %v1165_v1, %s1067_s9  ;;  %s828_s9 = sshll.u32 %s1053_s15, 6  ;;  %s1078_s15 = smov [#allocation2]  }
  0x20   : > { %v228_v7 = vpack.c.bf16 %v227_v6, %v227_v6 }
  0x8d   : > { %v239_v4 = vpop.permute.xlu0 %238  ;;  %v300_v15 = vpop.permute.xlu1 %299 }
  0x8e   : > { %v245_v5 = vsel %vm240_vm1, %v239_v4, 0  ;;  %v306_v16 = vsel %vm304_vm2, %v300_v15, 0 }
  0x8f   : > { %849 = vmatpush3.bf16.xpose.msra.mxu0 %v245_v5  ;;  %855 = vmatpush3.bf16.msra.mxu1 %v306_v16 }
  0x90   : > { %866 = vmatprep.subr.bf16.mxu0 %v1063_v0  ;;  %860 = vmatprep.subr.bf16.mxu1 %v1063_v0 }
  0x91   : > { %v352_v22 = vpop.permute.xlu1 %351 }
  0x92   : > { %v357_v28 = vsel %vm240_vm1, %v352_v22, 0 }
  0x96   : > { %851 = vmatmul.mubr.msk.bf16.vlgmr.msra.gmra.mrb[0].mxu0 %vm240_vm1, %v228_v7 }
  0x97   : > { %868 = vmatprep.mubr.msk.bf16.mxu0 %vm1064_vm0, %v1063_v0 }
 0x169   : > { %v281_v9 = vpop.f32.mrb[0].mxu0 }
 0x16a   : > { %v282_v10 = vadd.f32 %v1181_v8, %v281_v9  ;;  %v852_v11 = vpop.f32.mrb[1].mxu0 }
 0x16b   : > { %v284_v12 = vpop.f32.mrb[2].mxu0 }
 0x16c   : > { %v853_v13 = vpop.f32.mrb[3].mxu0  ;;  %v287_v14 = vsel %vm240_vm1, %v282_v10, -inf }
 0x16d   : > { %288 = vmax.xlane.f32.xlu0 %v287_v14 }
 0x183   : > { %579 = vrot.lane.b32.xlu0 %v1165_v1, %s1068_s19  ;;  %s1239_s19 = scalar_lea.hbm %s1289_s3, %s828_s9 }
 0x1fa   : > { %v289_v17 = vpop.xlane.xlu0 %288 }
 0x1fb   : > { %v290_v18 = vsub.f32 %v282_v10, %v289_v17 }
 0x1fd   : > { %v291_v19 = vmul.f32 1.442695, %v290_v18 }
 0x1fe   : > { %v580_v31 = vpop.permute.xlu0 %579 }
 0x1ff   : > { %967 = vpow2.f32 %v291_v19  ;;  %v585_v33 = vsel %vm240_vm1, %v580_v31, 0 }
 0x209   : > { %v968_v20 = vpop.eup %967 }
 0x20a   : > { %v293_v21 = vsel %vm240_vm1, %v968_v20, 0.0 }
 0x20b   : > { %294 = vadd.xlane.f32.xlu1 %v293_v21 }
 0x21c   : > { %349 = vrot.lane.b32.xlu1 %v228_v7, %s1069_s21  ;;  %s702_s21 = scalar_lea.sflag [#allocation3], %s205_s5 }
 0x220   : > { %469 = vrot.lane.b32.xlu1 %v1165_v1, %s1070_s23  ;;  %s983_s23 = scalar_lea.vmem %s1241_s10, 64 }
 0x221   : > { %p984_p12 = scmp.ne.s32.totalorder %s1241_s10, %s983_s23 }
 0x223   : > { %p985_p13 = pnand %p984_p12, %p1139_p4 }
 0x224   : > { %467 = vrot.lane.b32.xlu1 %v228_v7, %s1071_s26  ;;  %s987_s26 = sshll.u32 %s1078_s15, 4  ;;  %s988_s26 = int_to_ptr.vmem [resolvable:$false] %s987_s26 }
 0x225   : > { %p986_p0 = pneg %p985_p13  ;;  %p990_p1 = scmp.lt.s32.totalorder %s1241_s10, %s988_s26 }
 0x228   : > { %577 = vrot.lane.b32.xlu1 %v228_v7, %s1072_s27  ;;  %s989_s27 = scalar_lea.vmem %s988_s26, 128 }
 0x229   : > { %p991_p2 = scmp.lt.s32.totalorder %s989_s27, %s983_s23 }
 0x22b   : > { %p992_p3 = por %p991_p2, %p990_p1 }
 0x22d   : > { %p993_p5 = pnand %p992_p3, %p986_p0 }
 0x298   : > { %v295_v23 = vpop.xlane.xlu1 %294 }
 0x299   : > { %969 = vrcp.f32 %v295_v23 }
 0x29c   : > { %v350_v26 = vpop.permute.xlu1 %349 }
 0x2a0   : > { %v470_v29 = vpop.permute.xlu1 %469 }
 0x2a1   : > { %v475_v30 = vsel %vm240_vm1, %v470_v29, 0 }
 0x2a3   : > { %v970_v24 = vpop.eup %969 }
 0x2a4   : > { %v297_v25 = vmul.f32 %v970_v24, %v968_v20  ;;  %v468_v32 = vpop.permute.xlu1 %467 }
 0x2a6   : > { %v298_v27 = vpack.c.bf16 %v297_v25, %v297_v25 }
 0x2a8   : > { %857 = vmatmul.mubr.msk.bf16.vlgmr.msra.gmra.mrb[0].mxu1 %vm240_vm1, %v298_v27  ;;  %v578_v34 = vpop.permute.xlu1 %577 }
 0x2a9   : > { %861 = vmatpush3.bf16.xpose.msra.mxu1 %v357_v28  ;;  %862 = vmatprep.mubr.msk.bf16.mxu1 %vm1064_vm0, %v1063_v0 }
 0x2aa   : > { %872 = vmatprep.subr.bf16.mxu1 %v1063_v0 }
 0x2b0   : > { %863 = vmatmul.mubr.msk.bf16.vlgmr.msra.gmra.mrb[4].mxu1 %vm240_vm1, %v350_v26 }
 0x2b1   : > { %873 = vmatpush3.bf16.xpose.msra.mxu1 %v475_v30  ;;  %874 = vmatprep.mubr.msk.bf16.mxu1 %vm1064_vm0, %v1063_v0 }
 0x2b2   : > { %884 = vmatprep.subr.bf16.mxu1 %v1063_v0 }
 0x2b8   : > { %875 = vmatmul.mubr.msk.bf16.vlgmr.msra.gmra.mrb[8].mxu1 %vm240_vm1, %v468_v32 }
 0x2b9   : > { %885 = vmatpush3.bf16.xpose.msra.mxu1 %v585_v33  ;;  %886 = vmatprep.mubr.msk.bf16.mxu1 %vm1064_vm0, %v1063_v0 }
 0x2c0   : > { %887 = vmatmul.mubr.msk.bf16.vlgmr.msra.gmra.mrb[12].mxu1 %vm240_vm1, %v578_v34 }
 0x37b   : > { %v1205_v35 = vpop.f32.mrb[0].mxu1 }
 0x37c   : > { %v858_v36 = vpop.f32.mrb[1].mxu1 }
 0x37d   : > { %v345_v37 = vpop.f32.mrb[2].mxu1 }
 0x37e   : > { %v859_v38 = vpop.f32.mrb[3].mxu1 }
 0x383   : > { %v393_v39 = vpop.f32.mrb[4].mxu1 }
 0x384   : > { %v394_v40 = vadd.f32 %v1181_v8, %v393_v39  ;;  %v864_v41 = vpop.f32.mrb[5].mxu1 }
 0x385   : > { %v396_v42 = vpop.f32.mrb[6].mxu1 }
 0x386   : > { %v865_v43 = vpop.f32.mrb[7].mxu1  ;;  %v399_v44 = vsel %vm240_vm1, %v394_v40, -inf }
 0x387   : > { %400 = vmax.xlane.f32.xlu1 %v399_v44 }
 0x38b   : > { %v511_v45 = vpop.f32.mrb[8].mxu1 }
 0x38c   : > { %v512_v46 = vadd.f32 %v1181_v8, %v511_v45  ;;  %v876_v47 = vpop.f32.mrb[9].mxu1 }
 0x38d   : > { %v514_v48 = vpop.f32.mrb[10].mxu1 }
 0x38e   : > { %v517_v49 = vsel %vm240_vm1, %v512_v46, -inf  ;;  %v877_v50 = vpop.f32.mrb[11].mxu1 }
 0x38f   : > { %518 = vmax.xlane.f32.xlu0 %v517_v49 }
 0x393   : > { %v621_v51 = vpop.f32.mrb[12].mxu1 }
 0x394   : > { %v622_v52 = vadd.f32 %v1181_v8, %v621_v51  ;;  %v888_v53 = vpop.f32.mrb[13].mxu1 }
 0x395   : > { %v624_v54 = vpop.f32.mrb[14].mxu1 }
 0x396   : > { %v627_v55 = vsel %vm240_vm1, %v622_v52, -inf  ;;  %v889_v56 = vpop.f32.mrb[15].mxu1 }
 0x397   : > { %628 = vmax.xlane.f32.xlu1 %v627_v55 }
 0x414   : > { %v401_v57 = vpop.xlane.xlu1 %400 }
 0x415   : > { %v402_v58 = vsub.f32 %v394_v40, %v401_v57 }
 0x417   : > { %v403_v59 = vmul.f32 1.442695, %v402_v58 }
 0x419   : > { %971 = vpow2.f32 %v403_v59 }
 0x41c   : > { %v519_v5 = vpop.xlane.xlu0 %518 }
 0x41d   : > { %v520_v6 = vsub.f32 %v512_v46, %v519_v5 }
 0x41f   : > { %v521_v7 = vmul.f32 1.442695, %v520_v6 }
 0x423   : > { %v972_v60 = vpop.eup %971 }
 0x424   : > { %v629_v61 = vpop.xlane.xlu1 %628  ;;  %v405_v62 = vsel %vm240_vm1, %v972_v60, 0.0 }
 0x425   : > { %v630_v63 = vsub.f32 %v622_v52, %v629_v61  ;;  %406 = vadd.xlane.f32.xlu1 %v405_v62 }
 0x427   : > { %v631_v2 = vmul.f32 1.442695, %v630_v63 }
 0x429   : > { %973 = vpow2.f32 %v631_v2 }
 0x42a   : > { %975 = vpow2.f32 %v521_v7 }
 0x433   : > { %v974_v3 = vpop.eup %973 }
 0x434   : > { %v633_v4 = vsel %vm240_vm1, %v974_v3, 0.0  ;;  %v976_v8 = vpop.eup %975 }
 0x435   : > { %634 = vadd.xlane.f32.xlu0 %v633_v4  ;;  %v523_v9 = vsel %vm240_vm1, %v976_v8, 0.0 }
 0x436   : > { %411 = vrot.lane.b32.xlu1 %v1165_v1, %s1073_s28 }
 0x44b   : > { %529 = vrot.lane.b32.xlu0 %v1165_v1, %s1074_s29 }
 0x45a   : > { %524 = vadd.xlane.f32.xlu1 %v523_v9 }
 0x46b   : > { %639 = vrot.lane.b32.xlu1 %v1165_v1, %s1075_s30 }
 0x4b2   : > { %v407_v10 = vpop.xlane.xlu1 %406 }
 0x4b3   : > { %977 = vrcp.f32 %v407_v10 }
 0x4b6   : > { %v412_v11 = vpop.permute.xlu1 %411 }
 0x4b7   : > { %v417_v12 = vsel %vm304_vm2, %v412_v11, 0 }
 0x4b8   : > { %867 = vmatpush3.bf16.msra.mxu0 %v417_v12 }
 0x4b9   : > { %878 = vmatprep.subr.bf16.mxu0 %v1063_v0 }
 0x4bd   : > { %v978_v13 = vpop.eup %977 }
 0x4be   : > { %v409_v14 = vmul.f32 %v978_v13, %v972_v60 }
 0x4c0   : > { %v410_v15 = vpack.c.bf16 %v409_v14, %v409_v14 }
 0x4c2   : > { %869 = vmatmul.mubr.msk.bf16.vlgmr.msra.gmra.mrb[4].mxu0 %vm240_vm1, %v410_v15  ;;  %v635_v16 = vpop.xlane.xlu0 %634 }
 0x4c3   : > { %880 = vmatprep.mubr.msk.bf16.mxu0 %vm1064_vm0, %v1063_v0 }
 0x4c6   : > { %v530_v17 = vpop.permute.xlu0 %529 }
 0x4c7   : > { %v535_v1 = vsel %vm304_vm2, %v530_v17, 0 }
 0x4c8   : > { %879 = vmatpush3.bf16.msra.mxu0 %v535_v1 }
 0x4c9   : > { %890 = vmatprep.subr.bf16.mxu0 %v1063_v0 }
 0x4e7   : > { %v525_v18 = vpop.xlane.xlu1 %524 }
 0x4e8   : > { %979 = vrcp.f32 %v525_v18 }
 0x4e9   : > { %981 = vrcp.f32 %v635_v16 }
 0x4eb   : > { %v640_v20 = vpop.permute.xlu1 %639 }
 0x4ec   : > { %v645_v22 = vsel %vm304_vm2, %v640_v20, 0 }
 0x4f2   : > { %v980_v19 = vpop.eup %979 }
 0x4f3   : > { %v527_v21 = vmul.f32 %v980_v19, %v976_v8  ;;  %v982_v24 = vpop.eup %981 }
 0x4f4   : > { %v637_v25 = vmul.f32 %v982_v24, %v974_v3 }
 0x4f5   : > { %v528_v23 = vpack.c.bf16 %v527_v21, %v527_v21 }
 0x4f6   : > { %v638_v26 = vpack.c.bf16 %v637_v25, %v637_v25 }
 0x4f7   : > { %881 = vmatmul.mubr.msk.bf16.vlgmr.msra.gmra.mrb[8].mxu0 %vm240_vm1, %v528_v23 }
 0x4f8   : > { %891 = vmatpush3.bf16.msra.mxu0 %v645_v22  ;;  %892 = vmatprep.mubr.msk.bf16.mxu0 %vm1064_vm0, %v1063_v0 }
 0x4ff   : > { %893 = vmatmul.mubr.msk.bf16.vlgmr.msra.gmra.mrb[12].mxu0 %vm240_vm1, %v638_v26 }
 0x595   : > { %v453_v27 = vpop.f32.mrb[4].mxu0 }
 0x596   : > { %460 = vrot.lane.b32.xlu0 %v453_v27, %s1076_s4  ;;  %v870_v28 = vpop.f32.mrb[5].mxu0 }
 0x597   : > { %v456_v29 = vpop.f32.mrb[6].mxu0 }
 0x598   : > { %v871_v30 = vpop.f32.mrb[7].mxu0 }
 0x5ca   : > { %v571_v31 = vpop.f32.mrb[8].mxu0 }
 0x5cb   : > { %v882_v32 = vpop.f32.mrb[9].mxu0 }
 0x5cc   : > { %v574_v33 = vpop.f32.mrb[10].mxu0 }
 0x5cd   : > { %v883_v34 = vpop.f32.mrb[11].mxu0 }
 0x5d2   : > { %v681_v36 = vpop.f32.mrb[12].mxu0 }
 0x5d3   : > { %688 = vrot.lane.b32.xlu1 %v681_v36, %s1076_s4  ;;  %v894_v37 = vpop.f32.mrb[13].mxu0 }
 0x5d4   : > { %v684_v0 = vpop.f32.mrb[14].mxu0 }
 0x5d5   : > { %v895_v38 = vpop.f32.mrb[15].mxu0 }
 0x608   : > { %v461_v39 = vpop.permute.xlu0 %460 }
 0x609   : > { %v463_v40 = vsel %vm240_vm1, %v1205_v35, %v461_v39 }
 0x60a   : > { %v464_v41 = vpack.c.bf16 %v463_v40, %v463_v40 }
 0x60c   : > { %466 = vst.msk [vmem:[%s207_s7] sm:$0xf] %vm465_vm3, %v464_v41 }
 0x645   : > { %v689_v42 = vpop.permute.xlu1 %688 }
 0x646   : > { %v691_v43 = vsel %vm240_vm1, %v571_v31, %v689_v42 }
 0x647   : > { %v831_v44 = vpack.c.bf16 %v691_v43, %v691_v43 }
 0x649   : > { %696 = vrot.lane.b32.xlu1 %v831_v44, %s1077_s8 }
 0x6bb   : > { %v697_v35 = vpop.permute.xlu1 %696 }
 0x6bc   : > { %700 = vst.msk [vmem:[%s207_s7] sm:$0xf] %vm699_vm4, %v697_v35 }
 0x6bd   : > { %996 = shalt.err (!%p993_p5)
}
 0x6be   : > { %s997_s28 = scalar_lea.hbm %s1239_s19, 64  ;;  %s1001_s4 = scalar_lea.hbm %s1289_s3, 128 }
 0x6bf   : > { %p998_p6 = scmp.ne.s32.totalorder %s1239_s19, %s997_s28  ;;  %p1002_p10 = scmp.lt.u32.totalorder %s1239_s19, %s1289_s3 }
 0x6c0   : > { %p1003_p11 = scmp.lt.u32.totalorder %s1001_s4, %s997_s28  ;;  %p1005_p13 = scmp.lt.u32.totalorder %s997_s28, %s1239_s19 }
 0x6c1   : > { %p999_p7 = pnand %p998_p6, %p1139_p4 }
 0x6c2   : > { %p1004_p12 = por %p1003_p11, %p1002_p10 }
 0x6c3   : > { %p1000_p9 = pneg %p999_p7 }
 0x6c4   : > { %p1006_p0 = por %p1005_p13, %p1004_p12 }
 0x6c6   : > { %p1007_p1 = pnand %p1006_p0, %p1000_p9 }
 0x6c8   : > { %1010 = shalt.err (!%p1007_p1)
}
 0x6c9   : > { %896 = dma.vmem_to_hbm [thread:$0]  (%p1139_p4), %s1241_s10, 64, %s1239_s19, %s702_s21  }
 0x6ca PF: > { %p902_p2 = scmp.ge.s32.totalorder %s1061_s17, 2  ;;  %s728_s7 = sand.u32 1, %s1041_s12  }
 0x6cb   : > { %s729_s8 = scalar_lea.sflag [#allocation3], %s728_s7 }
 0x6cc   : > { %p899_p3 = pnand %p902_p2, %p1146_p8 }
 0x6ce   : > { %1036 = dma.done.wait (!%p899_p3), %s729_s8, 64  }
 0x6cf   : > { %1038 = vsyncadd (!%p899_p3), %s729_s8, 4294967232  ;;  %s16_s17 = sadd.s32 1, %s1061_s17   ;;  %s1292_s12 = smov %s1045_s13 }
 0x6d0   : > { %p13_p5 = scmp.ge.s32.totalorder %s16_s17, 4   ;;  %s1293_s13 = smov %s1049_s14 }
 0x6d1   : > { %s1294_s14 = smov %s1152_s25  ;;  %s1295_s15 = smov %s1057_s16 }
 0x6d2   : > { %s1296_s16 = smov %s1298_s20  ;;  %15 = sbr.rel (!%p13_p5) target bundleno = 4 (0x4), region = 73 }
 0x6d9   :  { %734 = vsyncpa [#allocation3], 1 }
 0x6da   :  { %736 = vsyncpa [#allocation3 + $0x1], 1 }

// kernel: model_forward_code.11
= control target key start
LH: loop header
LB: loop body
LE: loop exit
PB: predicated region body
PF: predicated region fallthrough
CT: control target
= control target key end

     0   :  { %13 = vsyncpa [#allocation3], 0  ;;  %s929_s0 = inlined_call_operand.vmem [shape: s32[2,1,8], index: 0, kind: input, shape index: {}]   ;;  %s930_s1 = inlined_call_operand.vmem [shape: s32[2,8,1], index: 1, kind: input, shape index: {}]   ;;  %s931_s2 = inlined_call_operand.vmem [shape: f32[2,1,8], index: 2, kind: input, shape index: {}]   ;;  %s932_s3 = inlined_call_operand.vmem [shape: f32[2,8,32], index: 3, kind: input, shape index: {}]   ;;  %s933_s4 = inlined_call_operand.vmem [shape: f32[2,8,32], index: 4, kind: input, shape index: {}]   ;;  %s934_s5 = inlined_call_operand.vmem [shape: f32[1,32], index: 5, kind: input, shape index: {}]   ;;  %s935_s6 = inlined_call_operand.vmem [shape: f32[1,32], index: 6, kind: input, shape index: {}]   ;;  %s936_s7 = inlined_call_operand.vmem [shape: f32[1,32], index: 7, kind: input, shape index: {}]   ;;  %s937_s8 = inlined_call_operand.hbm [shape: bf16[2,8,32], index: 8, kind: output, shape index: {}]  }
   0x1   :  { %15 = vsyncpa [#allocation3 + $0x1], 0  ;;  %s803_s27 = smov 0   ;;  %s805_s28 = smov 0  }
   0x2   :  { %s807_s29 = smov 0   ;;  %s809_s30 = smov 0  }
   0x3 LB: > { %s824_s9 = sadd.s32 4294967295, %s752_s30   ;;  %s616_s10 = sadd.s32 4294967294, %s752_s30   ;;  %s752_s30 = sphi %s809_s30, %s945_s30   ;;  %s748_s29 = sphi %s807_s29, %s944_s29   ;;  %s744_s28 = sphi %s805_s28, %s943_s28   ;;  %s740_s27 = sphi %s803_s27, %s942_s27  }
   0x4   : > { %s828_s11 = sadd.s32 1, %s752_s30   ;;  %s221_s12 = sadd.s32 1, %s748_s29 }
   0x5   : > { %s218_s13 = ssub.s32 %s752_s30, %s828_s11  ;;  %p231_p0 = scmp.ne.s32.totalorder %s748_s29, %s744_s28 }
   0x6   : > { %p219_p1 = scmp.eq.s32.totalorder %s218_s13, 0  ;;  %p232_p2 = scmp.eq.s32.totalorder %s824_s9, 1 }
   0x7   : > { %p237_p3 = scmp.ne.s32.totalorder %s744_s28, %s740_s27  ;;  %p238_p4 = scmp.eq.s32.totalorder %s616_s10, 1 }
   0x8   : > { %s839_s14 = scalar_select %p219_p1, %s748_s29, %s221_s12  }
   0x9   : > { %p841_p5 = por %p232_p2, %p231_p0  ;;  %p845_p6 = por %p238_p4, %p237_p3 }
   0xa   : > { %938 = sst [smem:[#allocation5_spill]] %s839_s14  ;;  %p619_p7 = scmp.ge.s32.totalorder %s752_s30, 1 }
   0xb   : > { %p298_p8 = scmp.lt.s32.totalorder %s752_s30, 3 }
   0xd   : > { %p299_p9 = pnand %p619_p7, %p298_p8 }
   0xe   : > { %p345_p10 = scmp.lt.s32.totalorder (!%p299_p9), %s824_s9, 1  ;;  %v754_v0 = vmov (!%p299_p9), 0   ;;  %vm396_vm4 = vcmask (!%p299_p9), 1043456   ;;  %v755_v8 = vmov (!%p299_p9), 0.0   ;;  %vm756_vm5 = vmmov (!%p299_p9), 0  }
   0xf   : > { %302 = sbr.rel (%p299_p9) target bundleno = 713 (0x2c9), region = 52  ;;  %684 = vset.pattern.permute.xlu0 (!%p299_p9), %v754_v0  ;;  %685 = vset.pattern.permute.xlu1 (!%p299_p9), %v754_v0  ;;  %v378_v12 = vlaneseq (!%p299_p9)  ;;  %vm386_vm8 = vcmask (!%p299_p9), 64512   ;;  %v627_v34 = vld [vmem:[%s934_s5] ss:$0 sm:$0xff] (!%p299_p9)  ;;  %vm467_vm10 = vcmask (!%p299_p9), 261120   ;;  %vm499_vm11 = vcmask (!%p299_p9), 257024  }
  0x10   : > { %636 = vmatprep.subr.bf16.mxu0 (!%p299_p9), %v755_v8  ;;  %638 = vmatprep.mubr.msk.bf16.mxu0 (!%p299_p9), %vm756_vm5, %v755_v8  ;;  %v628_v47 = vld [vmem:[%s935_s6] ss:$0 sm:$0xff] (!%p299_p9) }
  0x11   : > { %v379_v13 = vshrl.u32 (!%p299_p9), %v378_v12, 7  ;;  %v629_v49 = vld [vmem:[%s936_s7] ss:$0 sm:$0xff] (!%p299_p9) }
  0x13   : > { %v380_v14 = vsub.s32 (!%p299_p9), 0, %v379_v13 }
  0x16   : > { %s346_s17 = scalar_select %p345_p10, %s824_s9, 1 }
  0x18   : > { %s853_s18 = sshll.u32 %s346_s17, 3  ;;  %s354_s21 = scalar_lea.vmem %s931_s2, %s346_s17 }
  0x19   : > { %s351_s24 = scalar_lea.vmem %s930_s1, %s853_s18  ;;  %v366_v1 = vld [vmem:[%s354_s21] sm:$0x1]  ;;  %s347_s10 = scalar_lea.vmem %s929_s0, %s346_s17 }
  0x1a   : > { %v365_v2 = vld [vmem:[%s351_s24] sm:$0xff]  ;;  %vm370_vm0 = vcmp.ne.f32.partialorder %v366_v1, 0.0  ;;  %s358_s14 = scalar_lea.vmem %s932_s3, %s853_s18  ;;  %s362_s19 = scalar_lea.vmem %s933_s4, %s853_s18 }
  0x1b   : > { %v364_v3 = vld [vmem:[%s347_s10] sm:$0x1]  ;;  %vm368_vm1 = vcmp.eq.s32.totalorder %v365_v2, 0  ;;  %s342_s18 = sand.u32 1, %s744_s28   ;;  %s631_s10 = sshll.u32 %s824_s9, 6 }
  0x1c   : > { %vm369_vm2 = vcmp.ge.s32.totalorder %v364_v3, 2  ;;  %v367_v4 = vld [vmem:[%s358_s14] sm:$0xff]  ;;  %v372_v5 = vsel %vm368_vm1, 1, %v754_v0  ;;  %v626_v10 = vsel %vm368_vm1, 1.0, %v755_v8  ;;  %s620_s22 = sshll.u32 %s342_s18, 2  ;;  %s502_s20 = scalar_lea.sflag [#allocation3], %s342_s18 }
  0x1d   : > { %vm371_vm3 = vmand %vm369_vm2, %vm370_vm0  ;;  %v392_v6 = vpack.c.bf16 %v367_v4, %v367_v4  ;;  %374 = vperm.xlu0 %684, %v372_v5   ;;  %v443_v11 = vsub.f32 1.0, %v626_v10  ;;  %v457_v32 = vld [vmem:[%s362_s19] sm:$0xff]  ;;  %s344_s12 = scalar_lea.vmem [#allocation2], %s620_s22  ;;  %s887_s19 = scalar_lea.hbm %s937_s8, %s631_s10 }
  0x1e   : > { %v377_v7 = vsel %vm371_vm3, 1, %v754_v0  ;;  %s515_s13 = sshll.u32 %s344_s12, 4  ;;  %s757_s9 = smov [#allocation2]   ;;  %s889_s13 = int_to_ptr.vmem [resolvable:$true] %s515_s13 }
  0x1f   : > { %v398_v9 = vsel %vm396_vm4, %v392_v6, 0  ;;  %446 = vperm.xlu1 %685, %v443_v11   ;;  %v381_v15 = vrot.slane %v377_v7, %v380_v14  ;;  %s690_s21 = scalar_lea.vmem %s889_s13, 64  ;;  %s694_s22 = sshll.u32 %s757_s9, 4  ;;  %s695_s22 = int_to_ptr.vmem [resolvable:$false] %s694_s22 }
  0x20   : > { %637 = vmatpush3.bf16.msra.mxu0 %v398_v9  ;;  %p691_p11 = scmp.ne.s32.totalorder %s889_s13, %s690_s21  ;;  %s696_s23 = scalar_lea.vmem %s695_s22, 128 }
  0x21   : > { %vm382_vm6 = vcmp.eq.s32.totalorder %v381_v15, 1  ;;  %p697_p0 = scmp.lt.s32.totalorder %s889_s13, %s695_s22  ;;  %p698_p1 = scmp.lt.s32.totalorder %s696_s23, %s690_s21 }
  0x22   : > { %p692_p12 = pnand %p691_p11, %p841_p5 }
  0x23   : > { %452 = vperm.xlu1 %685, %v626_v10   ;;  %p699_p2 = por %p698_p1, %p697_p0 }
  0x24   : > { %p693_p13 = pneg %p692_p12 }
  0x26   : > { %p700_p3 = pnand %p699_p2, %p693_p13 }
  0x9c   : > { %v375_v16 = vpop.permute.xlu0 %374 }
  0x9d   : > { %vm376_vm7 = vcmp.eq.s32.totalorder %v375_v16, 1 }
  0x9e   : > { %vm383_vm9 = vmand %vm376_vm7, %vm382_vm6  ;;  %v447_v22 = vpop.permute.xlu1 %446 }
  0x9f   : > { %v624_v17 = vsel %vm383_vm9, 1.0, %v755_v8  ;;  %v449_v29 = vmul.f32 %v447_v22, %v367_v4 }
  0xa0   : > { %v387_v18 = vsel %vm386_vm8, %v624_v17, 0.0  ;;  %v391_v19 = vpack.c.bf16 %v624_v17, %v624_v17 }
  0xa1   : > { %388 = vadd.xlane.f32.xlu0 %v387_v18 }
  0xa2   : > { %639 = vmatmul.mubr.msk.bf16.vlgmr.msra.gmra.mrb[0].mxu0 %vm386_vm8, %v391_v19  ;;  %v453_v27 = vpop.permute.xlu1 %452 }
 0x12e   : > { %v389_v20 = vpop.xlane.xlu0 %388 }
 0x12f   : > { %v390_v21 = vadd.f32 1e-10, %v389_v20 }
 0x131   : > { %686 = vrcp.f32 %v390_v21 }
 0x13b   : > { %v687_v23 = vpop.eup %686 }
 0x175   : > { %v434_v24 = vpop.f32.mrb[0].mxu0 }
 0x176   : > { %v441_v25 = vmul.f32 %v687_v23, %v434_v24  ;;  %v640_v26 = vpop.f32.mrb[1].mxu0 }
 0x177   : > { %v437_v28 = vpop.f32.mrb[2].mxu0 }
 0x178   : > { %v455_v30 = vmul.f32 %v453_v27, %v441_v25  ;;  %v641_v31 = vpop.f32.mrb[3].mxu0 }
 0x17a   : > { %v456_v33 = vadd.f32 %v455_v30, %v449_v29 }
 0x17c   : > { %v458_v35 = vadd.f32 %v457_v32, %v456_v33 }
 0x17e   : > { %v466_v36 = vadd.f32 %v627_v34, %v458_v35 }
 0x180   : > { %v468_v37 = vsel %vm467_vm10, %v466_v36, 0.0 }
 0x181   : > { %469 = vadd.xlane.f32.xlu1 %v468_v37 }
 0x20e   : > { %v470_v38 = vpop.xlane.xlu1 %469 }
 0x20f   : > { %v472_v39 = vmul.f32 0.03125, %v470_v38 }
 0x211   : > { %v473_v40 = vsub.f32 %v466_v36, %v472_v39 }
 0x213   : > { %v474_v41 = vmul.f32 %v473_v40, %v473_v40 }
 0x215   : > { %v475_v42 = vsel %vm467_vm10, %v474_v41, 0.0 }
 0x216   : > { %476 = vadd.xlane.f32.xlu0 %v475_v42 }
 0x2a3   : > { %v477_v43 = vpop.xlane.xlu0 %476 }
 0x2a4   : > { %v478_v44 = vmul.f32 0.03125, %v477_v43 }
 0x2a6   : > { %v479_v45 = vadd.f32 1e-05, %v478_v44 }
 0x2a8   : > { %688 = vrsqrt.f32 %v479_v45 }
 0x2b2   : > { %v689_v46 = vpop.eup %688 }
 0x2b3   : > { %v481_v48 = vmul.f32 %v689_v46, %v473_v40 }
 0x2b5   : > { %v489_v50 = vmul.f32 %v628_v47, %v481_v48 }
 0x2b7   : > { %v497_v51 = vadd.f32 %v629_v49, %v489_v50 }
 0x2b9   : > { %v498_v52 = vpack.c.bf16 %v497_v51, %v497_v51 }
 0x2bb   : > { %500 = vst.msk [vmem:[%s344_s12] sm:$0xf] %vm499_vm11, %v498_v52 }
 0x2bc   : > { %703 = shalt.err (!%p700_p3)
}
 0x2bd   : > { %s704_s18 = scalar_lea.hbm %s887_s19, 64  ;;  %s708_s26 = scalar_lea.hbm %s937_s8, 128 }
 0x2be   : > { %p705_p4 = scmp.ne.s32.totalorder %s887_s19, %s704_s18  ;;  %p709_p9 = scmp.lt.u32.totalorder %s887_s19, %s937_s8 }
 0x2bf   : > { %p710_p10 = scmp.lt.u32.totalorder %s708_s26, %s704_s18  ;;  %p712_p12 = scmp.lt.u32.totalorder %s704_s18, %s887_s19 }
 0x2c0   : > { %p706_p7 = pnand %p705_p4, %p841_p5 }
 0x2c1   : > { %p711_p11 = por %p710_p10, %p709_p9 }
 0x2c2   : > { %p707_p8 = pneg %p706_p7 }
 0x2c3   : > { %p713_p13 = por %p712_p12, %p711_p11 }
 0x2c5   : > { %p714_p0 = pnand %p713_p13, %p707_p8 }
 0x2c7   : > { %717 = shalt.err (!%p714_p0)
}
 0x2c8   : > { %642 = dma.vmem_to_hbm [thread:$0]  (%p841_p5), %s889_s13, 64, %s887_s19, %s502_s20  }
 0x2c9 PF: > { %p648_p1 = scmp.ge.s32.totalorder %s752_s30, 2  ;;  %s527_s14 = sand.u32 1, %s740_s27  }
 0x2ca   : > { %s528_s17 = scalar_lea.sflag [#allocation3], %s527_s14 }
 0x2cb   : > { %p645_p2 = pnand %p648_p1, %p845_p6 }
 0x2cd   : > { %735 = dma.done.wait (!%p645_p2), %s528_s17, 64  }
 0x2ce   : > { %737 = vsyncadd (!%p645_p2), %s528_s17, 4294967232  ;;  %s941_s21 = sld [smem:[#allocation5_spill]]  ;;  %p18_p3 = scmp.ge.s32.totalorder %s828_s11, 4  }
 0x2cf   : > { %s942_s27 = smov %s744_s28  ;;  %s943_s28 = smov %s748_s29 }
 0x2d0   : > { %s945_s30 = smov %s828_s11  ;;  %20 = sbr.rel (!%p18_p3) target bundleno = 3 (0x3), region = 99 }
 0x2d4   : > { %s944_s29 = smov %s941_s21 }
 0x2d7   :  { %533 = vsyncpa [#allocation3], 1 }
 0x2d8   :  { %535 = vsyncpa [#allocation3 + $0x1], 1 }

// kernel: model_forward_code.15
= control target key start
LH: loop header
LB: loop body
LE: loop exit
PB: predicated region body
PF: predicated region fallthrough
CT: control target
= control target key end

     0   :  { %8 = vsyncpa [#allocation3], 0  ;;  %s398_s0 = inlined_call_operand.hbm [shape: bf16[16,32], index: 0, kind: input, shape index: {}]   ;;  %s399_s1 = inlined_call_operand.hbm [shape: bf16[32,64], index: 1, kind: input, shape index: {}]   ;;  %s400_s2 = inlined_call_operand.hbm [shape: f32[1,64], index: 2, kind: input, shape index: {}]   ;;  %s401_s3 = inlined_call_operand.hbm [shape: bf16[16,64], index: 3, kind: output, shape index: {}]  }
   0x1   :  { %9 = vsyncpa [#allocation6], 0 }
   0x2   :  { %10 = vsyncpa [#allocation4], 0  ;;  %s306_s12 = smov [#allocation5]   ;;  %s307_s14 = smov [#allocation2]  }
   0x3   :  { %s28_s13 = sshll.u32 %s306_s12, 4  ;;  %s16_s15 = sshll.u32 %s307_s14, 4  ;;  %s29_s13 = int_to_ptr.vmem [resolvable:$true] %s28_s13  ;;  %s334_s15 = int_to_ptr.vmem [resolvable:$true] %s16_s15 }
   0x4   :  { %s212_s18 = scalar_lea.hbm %s399_s1, 256 }
   0x5   :  { %p213_p0 = scmp.ne.s32.totalorder %s399_s1, %s212_s18  ;;  %p216_p1 = scmp.lt.u32.totalorder %s212_s18, %s399_s1 }
   0x7   :  { %p218_p2 = pnand %p216_p1, %p213_p0 }
   0x9   :  { %221 = shalt.err (!%p218_p2)
}
   0xa   :  { %s222_s23 = scalar_lea.vmem %s29_s13, 256  ;;  %p227_p4 = scmp.lt.s32.totalorder %s29_s13, %s29_s13 }
   0xb   :  { %p223_p3 = scmp.ne.s32.totalorder %s29_s13, %s222_s23  ;;  %p228_p5 = scmp.lt.s32.totalorder %s222_s23, %s222_s23 }
   0xd   :  { %p229_p6 = por %p228_p5, %p227_p4 }
   0xf   :  { %p230_p7 = pnand %p229_p6, %p223_p3 }
  0x11   :  { %233 = shalt.err (!%p230_p7)
}
  0x12   :  { %s308_s24 = smov 64   ;;  %s309_s25 = smov 4  }
  0x13   :  { %34 = dma.hbm_to_vmem [thread:$0]  %s399_s1, 256, %s29_s13, [#allocation6], %s308_s24, %s308_s24, %s309_s25  }
  0x14   :  { %s234_s30 = scalar_lea.hbm %s398_s0, 128 }
  0x15   :  { %p235_p8 = scmp.ne.s32.totalorder %s398_s0, %s234_s30  ;;  %p238_p9 = scmp.lt.u32.totalorder %s234_s30, %s398_s0 }
  0x17   :  { %p240_p10 = pnand %p238_p9, %p235_p8 }
  0x19   :  { %243 = shalt.err (!%p240_p10)
}
  0x1a   :  { %s244_s8 = scalar_lea.vmem %s334_s15, 128  ;;  %p249_p12 = scmp.lt.s32.totalorder %s334_s15, %s334_s15 }
  0x1b   :  { %p245_p11 = scmp.ne.s32.totalorder %s334_s15, %s244_s8  ;;  %p250_p13 = scmp.lt.s32.totalorder %s244_s8, %s244_s8 }
  0x1d   :  { %p251_p0 = por %p250_p13, %p249_p12 }
  0x1f   :  { %p252_p1 = pnand %p251_p0, %p245_p11 }
  0x21   :  { %255 = shalt.err (!%p252_p1)
}
  0x22   :  { %22 = dma.hbm_to_vmem [thread:$0]  %s398_s0, 128, %s334_s15, [#allocation3], %s308_s24, %s308_s24, %s309_s25  }
  0x23   :  { %s310_s10 = smov [#allocation7]   ;;  %s256_s14 = scalar_lea.hbm %s400_s2, 16 }
  0x24   :  { %s41_s11 = sshll.u32 %s310_s10, 4  ;;  %p257_p2 = scmp.ne.s32.totalorder %s400_s2, %s256_s14  ;;  %s42_s11 = int_to_ptr.vmem [resolvable:$true] %s41_s11 }
  0x25   :  { %p260_p3 = scmp.lt.u32.totalorder %s256_s14, %s400_s2 }
  0x27   :  { %p262_p4 = pnand %p260_p3, %p257_p2 }
  0x29   :  { %265 = shalt.err (!%p262_p4)
}
  0x2a   :  { %s266_s20 = scalar_lea.vmem %s42_s11, 16  ;;  %s270_s0 = scalar_lea.vmem %s42_s11, 32 }
  0x2b   :  { %p267_p5 = scmp.ne.s32.totalorder %s42_s11, %s266_s20  ;;  %p271_p6 = scmp.lt.s32.totalorder %s42_s11, %s42_s11 }
  0x2c   :  { %p272_p7 = scmp.lt.s32.totalorder %s270_s0, %s266_s20 }
  0x2e   :  { %p273_p8 = por %p272_p7, %p271_p6 }
  0x30   :  { %p274_p9 = pnand %p273_p8, %p267_p5 }
  0x32   :  { %277 = shalt.err (!%p274_p9)
}
  0x33   :  { %44 = dma.hbm_to_vmem [thread:$0]  %s400_s2, 16, %s42_s11, [#allocation6]  }
  0x34   :  { %300 = dma.done.wait [#allocation3], 128  }
  0x35   :  { %301 = vsyncadd [#allocation3], 4294967168 }
  0x36   :  { %302 = dma.done.wait [#allocation6], 272  }
  0x37   :  { %303 = vsyncadd [#allocation6], 4294967024  ;;  %v311_v0 = vmov 0.0   ;;  %vm312_vm0 = vmmov 0   ;;  %v205_v1 = vld [vmem:[#allocation5] sm:$0xff]   ;;  %v206_v2 = vld [vmem:[#allocation5 + $0x8] sm:$0xff]  }
  0x38   :  { %189 = vmatprep.subr.bf16.mxu0 %v311_v0  ;;  %193 = vmatprep.mubr.msk.bf16.mxu0 %vm312_vm0, %v311_v0  ;;  %v207_v3 = vld [vmem:[#allocation2] sm:$0xff]   ;;  %vm85_vm1 = vcmask 261120   ;;  %v177_v4 = vld [vmem:[#allocation7] ss:$0 sm:$0xff]  ;;  %vm156_vm2 = vcmask 519168   ;;  %s313_s2 = smov [#allocation8]  }
  0x39   :  { %190 = vmatpush3.bf16.msra.mxu0 %v205_v1  ;;  %s164_s22 = sshll.u32 %s313_s2, 4  ;;  %s165_s22 = int_to_ptr.vmem [resolvable:$true] %s164_s22 }
  0x3a   :  { %191 = vmatprep.subr.bf16.mxu0 %v311_v0  ;;  %s278_s23 = scalar_lea.vmem %s165_s22, 128  ;;  %p283_p11 = scmp.lt.s32.totalorder %s165_s22, %s165_s22 }
  0x3b   :  { %p279_p10 = scmp.ne.s32.totalorder %s165_s22, %s278_s23  ;;  %p284_p12 = scmp.lt.s32.totalorder %s278_s23, %s278_s23 }
  0x3d   :  { %192 = vmatpush3.bf16.msra.mxu0 %v206_v2  ;;  %p285_p13 = por %p284_p12, %p283_p11 }
  0x3f   :  { %p286_p0 = pnand %p285_p13, %p279_p10 }
  0x40   :  { %194 = vmatmul.mubr.msk.bf16.vlgmr.msra.gmra.mrb[0].mxu0 %vm85_vm1, %v207_v3 }
 0x113   :  { %v123_v5 = vpop.f32.mrb[0].mxu0 }
 0x114   :  { %v124_v6 = vadd.f32 %v177_v4, %v123_v5  ;;  %v195_v7 = vpop.f32.mrb[1].mxu0 }
 0x115   :  { %v126_v8 = vpop.f32.mrb[2].mxu0 }
 0x116   :  { %v130_v9 = vmul.f32 %v124_v6, %v124_v6  ;;  %v127_v10 = vadd.f32 %v177_v4, %v126_v8  ;;  %v196_v11 = vpop.f32.mrb[3].mxu0 }
 0x118   :  { %v132_v12 = vmul.f32 %v130_v9, %v124_v6  ;;  %v131_v13 = vmul.f32 %v127_v10, %v127_v10 }
 0x11a   :  { %v134_v14 = vmul.f32 0.044715, %v132_v12  ;;  %v133_v15 = vmul.f32 %v131_v13, %v127_v10 }
 0x11c   :  { %v136_v16 = vadd.f32 %v134_v14, %v124_v6  ;;  %v135_v17 = vmul.f32 0.044715, %v133_v15 }
 0x11e   :  { %v138_v18 = vmul.f32 0.7978846, %v136_v16  ;;  %v137_v19 = vadd.f32 %v135_v17, %v127_v10 }
 0x120   :  { %208 = vtanh.f32 %v138_v18  ;;  %v139_v20 = vmul.f32 0.7978846, %v137_v19 }
 0x122   :  { %210 = vtanh.f32 %v139_v20 }
 0x12a   :  { %v209_v21 = vpop.eup %208 }
 0x12b   :  { %v142_v22 = vadd.f32 1.0, %v209_v21 }
 0x12c   :  { %v211_v23 = vpop.eup %210 }
 0x12d   :  { %v143_v24 = vadd.f32 1.0, %v211_v23  ;;  %v144_v25 = vmul.f32 0.5, %v142_v22 }
 0x12f   :  { %v145_v26 = vmul.f32 0.5, %v143_v24  ;;  %v146_v27 = vmul.f32 %v144_v25, %v124_v6 }
 0x131   :  { %v147_v28 = vmul.f32 %v145_v26, %v127_v10  ;;  %v184_v29 = vpack.c.bf16 %v146_v27, %v146_v27 }
 0x133   :  { %v185_v30 = vpack.c.bf16 %v147_v28, %v147_v28  ;;  %157 = vst.msk [vmem:[#allocation8] sm:$0xf] %vm156_vm2, %v184_v29 }
 0x135   :  { %158 = vst.msk [vmem:[#allocation8 + $0x4] sm:$0xf] %vm156_vm2, %v185_v30 }
 0x136   :  { %289 = shalt.err (!%p286_p0)
}
 0x137   :  { %s290_s28 = scalar_lea.hbm %s401_s3, 128 }
 0x138   :  { %p291_p1 = scmp.ne.s32.totalorder %s401_s3, %s290_s28  ;;  %p294_p2 = scmp.lt.u32.totalorder %s290_s28, %s401_s3 }
 0x13a   :  { %p296_p3 = pnand %p294_p2, %p291_p1 }
 0x13c   :  { %299 = shalt.err (!%p296_p3)
}
 0x13d   :  { %170 = dma.vmem_to_hbm [thread:$0]  %s165_s22, 128, %s401_s3, [#allocation4], %s308_s24, %s308_s24, %s309_s25  }
 0x13e   :  { %304 = dma.done.wait [#allocation4], 128  }
 0x13f   :  { %305 = vsyncadd [#allocation4], 4294967168 }
 0x140   :  { %174 = vsyncpa [#allocation3], 1 }
 0x141   :  { %175 = vsyncpa [#allocation6], 1 }
 0x142   :  { %176 = vsyncpa [#allocation4], 1 }

// kernel: model_forward_code.16
= control target key start
LH: loop header
LB: loop body
LE: loop exit
PB: predicated region body
PF: predicated region fallthrough
CT: control target
= control target key end

     0   :  { %11 = vsyncpa [#allocation3], 0  ;;  %s646_s0 = inlined_call_operand.hbm [shape: bf16[16,64], index: 0, kind: input, shape index: {}]   ;;  %s647_s1 = inlined_call_operand.hbm [shape: bf16[64,32], index: 1, kind: input, shape index: {}]   ;;  %s648_s2 = inlined_call_operand.hbm [shape: f32[1,32], index: 2, kind: input, shape index: {}]   ;;  %s649_s3 = inlined_call_operand.hbm [shape: bf16[16,32], index: 3, kind: input, shape index: {}]   ;;  %s650_s4 = inlined_call_operand.hbm [shape: f32[1,32], index: 4, kind: input, shape index: {}]   ;;  %s651_s5 = inlined_call_operand.hbm [shape: f32[1,32], index: 5, kind: input, shape index: {}]   ;;  %s652_s6 = inlined_call_operand.hbm [shape: bf16[16,32], index: 6, kind: output, shape index: {}]  }
   0x1   :  { %12 = vsyncpa [#allocation6], 0 }
   0x2   :  { %13 = vsyncpa [#allocation9], 0 }
   0x3   :  { %14 = vsyncpa [#allocation12], 0 }
   0x4   :  { %15 = vsyncpa [#allocation4], 0  ;;  %s493_s21 = smov [#allocation5]   ;;  %s494_s23 = smov [#allocation8]  }
   0x5   :  { %s33_s22 = sshll.u32 %s493_s21, 4  ;;  %s55_s24 = sshll.u32 %s494_s23, 4  ;;  %s34_s22 = int_to_ptr.vmem [resolvable:$true] %s33_s22  ;;  %s539_s24 = int_to_ptr.vmem [resolvable:$true] %s55_s24 }
   0x6   :  { %s329_s27 = scalar_lea.hbm %s647_s1, 512 }
   0x7   :  { %p330_p0 = scmp.ne.s32.totalorder %s647_s1, %s329_s27  ;;  %p333_p1 = scmp.lt.u32.totalorder %s329_s27, %s647_s1 }
   0x9   :  { %p335_p2 = pnand %p333_p1, %p330_p0 }
   0xb   :  { %338 = shalt.err (!%p335_p2)
}
   0xc   :  { %s339_s8 = scalar_lea.vmem %s34_s22, 512  ;;  %p344_p4 = scmp.lt.s32.totalorder %s34_s22, %s34_s22 }
   0xd   :  { %p340_p3 = scmp.ne.s32.totalorder %s34_s22, %s339_s8  ;;  %p345_p5 = scmp.lt.s32.totalorder %s339_s8, %s339_s8 }
   0xf   :  { %p346_p6 = por %p345_p5, %p344_p4 }
  0x11   :  { %p347_p7 = pnand %p346_p6, %p340_p3 }
  0x13   :  { %350 = shalt.err (!%p347_p7)
}
  0x14   :  { %s495_s9 = smov 64   ;;  %s496_s10 = smov 4  }
  0x15   :  { %39 = dma.hbm_to_vmem [thread:$0]  %s647_s1, 512, %s34_s22, [#allocation6], %s495_s9, %s495_s9, %s496_s10  }
  0x16   :  { %s351_s15 = scalar_lea.hbm %s649_s3, 128 }
  0x17   :  { %p352_p8 = scmp.ne.s32.totalorder %s649_s3, %s351_s15  ;;  %p355_p9 = scmp.lt.u32.totalorder %s351_s15, %s649_s3 }
  0x19   :  { %p357_p10 = pnand %p355_p9, %p352_p8 }
  0x1b   :  { %360 = shalt.err (!%p357_p10)
}
  0x1c   :  { %s361_s20 = scalar_lea.vmem %s539_s24, 128  ;;  %p366_p12 = scmp.lt.s32.totalorder %s539_s24, %s539_s24 }
  0x1d   :  { %p362_p11 = scmp.ne.s32.totalorder %s539_s24, %s361_s20  ;;  %p367_p13 = scmp.lt.s32.totalorder %s361_s20, %s361_s20 }
  0x1f   :  { %p368_p0 = por %p367_p13, %p366_p12 }
  0x21   :  { %p369_p1 = pnand %p368_p0, %p362_p11 }
  0x23   :  { %372 = shalt.err (!%p369_p1)
}
  0x24   :  { %61 = dma.hbm_to_vmem [thread:$0]  %s649_s3, 128, %s539_s24, [#allocation9], %s495_s9, %s495_s9, %s496_s10  }
  0x25   :  { %s497_s22 = smov [#allocation2]   ;;  %s498_s25 = smov [#allocation7]  }
  0x26   :  { %s21_s23 = sshll.u32 %s497_s22, 4  ;;  %s46_s26 = sshll.u32 %s498_s25, 4  ;;  %s22_s23 = int_to_ptr.vmem [resolvable:$true] %s21_s23  ;;  %s47_s26 = int_to_ptr.vmem [resolvable:$true] %s46_s26 }
  0x27   :  { %s373_s29 = scalar_lea.hbm %s646_s0, 128 }
  0x28   :  { %p374_p2 = scmp.ne.s32.totalorder %s646_s0, %s373_s29  ;;  %p377_p3 = scmp.lt.u32.totalorder %s373_s29, %s646_s0 }
  0x2a   :  { %p379_p4 = pnand %p377_p3, %p374_p2 }
  0x2c   :  { %382 = shalt.err (!%p379_p4)
}
  0x2d   :  { %s383_s3 = scalar_lea.vmem %s22_s23, 128  ;;  %p388_p6 = scmp.lt.s32.totalorder %s22_s23, %s22_s23 }
  0x2e   :  { %p384_p5 = scmp.ne.s32.totalorder %s22_s23, %s383_s3  ;;  %p389_p7 = scmp.lt.s32.totalorder %s383_s3, %s383_s3 }
  0x30   :  { %p390_p8 = por %p389_p7, %p388_p6 }
  0x32   :  { %p391_p9 = pnand %p390_p8, %p384_p5 }
  0x34   :  { %394 = shalt.err (!%p391_p9)
}
  0x35   :  { %27 = dma.hbm_to_vmem [thread:$0]  %s646_s0, 128, %s22_s23, [#allocation3], %s495_s9, %s495_s9, %s496_s10  }
  0x36   :  { %s395_s15 = scalar_lea.hbm %s648_s2, 16 }
  0x37   :  { %p396_p10 = scmp.ne.s32.totalorder %s648_s2, %s395_s15  ;;  %p399_p11 = scmp.lt.u32.totalorder %s395_s15, %s648_s2 }
  0x39   :  { %p401_p12 = pnand %p399_p11, %p396_p10 }
  0x3b   :  { %404 = shalt.err (!%p401_p12)
}
  0x3c   :  { %s405_s20 = scalar_lea.vmem %s47_s26, 16  ;;  %s409_s1 = scalar_lea.vmem %s47_s26, 32 }
  0x3d   :  { %p406_p13 = scmp.ne.s32.totalorder %s47_s26, %s405_s20  ;;  %p410_p0 = scmp.lt.s32.totalorder %s47_s26, %s47_s26 }
  0x3e   :  { %p411_p1 = scmp.lt.s32.totalorder %s409_s1, %s405_s20 }
  0x40   :  { %p412_p2 = por %p411_p1, %p410_p0 }
  0x42   :  { %p413_p3 = pnand %p412_p2, %p406_p13 }
  0x44   :  { %416 = shalt.err (!%p413_p3)
}
  0x45   :  { %49 = dma.hbm_to_vmem [thread:$0]  %s648_s2, 16, %s47_s26, [#allocation6]  }
  0x46   :  { %s499_s22 = smov [#allocation10]   ;;  %s500_s25 = smov [#allocation11]  }
  0x47   :  { %s68_s23 = sshll.u32 %s499_s22, 4  ;;  %s78_s27 = sshll.u32 %s500_s25, 4  ;;  %s69_s23 = int_to_ptr.vmem [resolvable:$true] %s68_s23  ;;  %s79_s27 = int_to_ptr.vmem [resolvable:$true] %s78_s27 }
  0x48   :  { %s417_s30 = scalar_lea.hbm %s650_s4, 16 }
  0x49   :  { %p418_p4 = scmp.ne.s32.totalorder %s650_s4, %s417_s30  ;;  %p421_p5 = scmp.lt.u32.totalorder %s417_s30, %s650_s4 }
  0x4b   :  { %p423_p6 = pnand %p421_p5, %p418_p4 }
  0x4d   :  { %426 = shalt.err (!%p423_p6)
}
  0x4e   :  { %s427_s2 = scalar_lea.vmem %s69_s23, 16  ;;  %s431_s26 = scalar_lea.vmem %s69_s23, 32 }
  0x4f   :  { %p428_p7 = scmp.ne.s32.totalorder %s69_s23, %s427_s2  ;;  %p432_p8 = scmp.lt.s32.totalorder %s69_s23, %s69_s23 }
  0x50   :  { %p433_p9 = scmp.lt.s32.totalorder %s431_s26, %s427_s2 }
  0x52   :  { %p434_p10 = por %p433_p9, %p432_p8 }
  0x54   :  { %p435_p11 = pnand %p434_p10, %p428_p7 }
  0x56   :  { %438 = shalt.err (!%p435_p11)
}
  0x57   :  { %71 = dma.hbm_to_vmem [thread:$0]  %s650_s4, 16, %s69_s23, [#allocation9]  }
  0x58   :  { %s439_s15 = scalar_lea.hbm %s651_s5, 16 }
  0x59   :  { %p440_p12 = scmp.ne.s32.totalorder %s651_s5, %s439_s15  ;;  %p443_p13 = scmp.lt.u32.totalorder %s439_s15, %s651_s5 }
  0x5b   :  { %p445_p0 = pnand %p443_p13, %p440_p12 }
  0x5d   :  { %448 = shalt.err (!%p445_p0)
}
  0x5e   :  { %s449_s20 = scalar_lea.vmem %s79_s27, 16  ;;  %s453_s1 = scalar_lea.vmem %s79_s27, 32 }
  0x5f   :  { %p450_p1 = scmp.ne.s32.totalorder %s79_s27, %s449_s20  ;;  %p454_p2 = scmp.lt.s32.totalorder %s79_s27, %s79_s27 }
  0x60   :  { %p455_p3 = scmp.lt.s32.totalorder %s453_s1, %s449_s20 }
  0x62   :  { %p456_p4 = por %p455_p3, %p454_p2 }
  0x64   :  { %p457_p5 = pnand %p456_p4, %p450_p1 }
  0x66   :  { %460 = shalt.err (!%p457_p5)
}
  0x67   :  { %81 = dma.hbm_to_vmem [thread:$0]  %s651_s5, 16, %s79_s27, [#allocation12]  }
  0x68   :  { %483 = dma.done.wait [#allocation3], 128  }
  0x69   :  { %484 = vsyncadd [#allocation3], 4294967168 }
  0x6a   :  { %485 = dma.done.wait [#allocation6], 528  }
  0x6b   :  { %486 = vsyncadd [#allocation6], 4294966768 }
  0x6c   :  { %487 = dma.done.wait [#allocation9], 144  }
  0x6d   :  { %488 = vsyncadd [#allocation9], 4294967152 }
  0x6e   :  { %489 = dma.done.wait [#allocation12], 16  }
  0x6f   :  { %490 = vsyncadd [#allocation12], 4294967280  ;;  %v501_v0 = vmov 0.0   ;;  %vm502_vm0 = vmmov 0   ;;  %v320_v1 = vld [vmem:[#allocation5] sm:$0xff]   ;;  %v321_v2 = vld [vmem:[#allocation5 + $0x8] sm:$0xff]  }
  0x70   :  { %297 = vmatprep.subr.bf16.mxu0 %v501_v0  ;;  %305 = vmatprep.mubr.msk.bf16.mxu0 %vm502_vm0, %v501_v0  ;;  %v322_v3 = vld [vmem:[#allocation5 + $0x10] sm:$0xff]   ;;  %v323_v4 = vld [vmem:[#allocation5 + $0x18] sm:$0xff]   ;;  %vm147_vm1 = vcmask 523264   ;;  %v289_v6 = vld [vmem:[#allocation8] sm:$0xff]   ;;  %vm198_vm2 = vcmask 261120   ;;  %vm252_vm3 = vcmask 257024  }
  0x71   :  { %298 = vmatpush3.bf16.msra.mxu0 %v320_v1  ;;  %v324_v5 = vld [vmem:[#allocation2] sm:$0xff]   ;;  %v275_v7 = vld [vmem:[#allocation7] ss:$0 sm:$0xff]  ;;  %v290_v8 = vunpack.c.l.bf16 %v289_v6  ;;  %v291_v12 = vunpack.c.h.bf16 %v289_v6  ;;  %v282_v37 = vld [vmem:[#allocation10] ss:$0 sm:$0xff]  ;;  %s503_s5 = smov [#allocation13]  }
  0x72   :  { %299 = vmatprep.subr.bf16.mxu0 %v501_v0  ;;  %v283_v39 = vld [vmem:[#allocation11] ss:$0 sm:$0xff]  ;;  %s260_s21 = sshll.u32 %s503_s5, 4  ;;  %s261_s21 = int_to_ptr.vmem [resolvable:$true] %s260_s21 }
  0x73   :  { %s461_s22 = scalar_lea.vmem %s261_s21, 128  ;;  %p466_p7 = scmp.lt.s32.totalorder %s261_s21, %s261_s21 }
  0x74   :  { %p462_p6 = scmp.ne.s32.totalorder %s261_s21, %s461_s22  ;;  %p467_p8 = scmp.lt.s32.totalorder %s461_s22, %s461_s22 }
  0x75   :  { %300 = vmatpush3.bf16.msra.mxu0 %v321_v2 }
  0x76   :  { %301 = vmatprep.subr.bf16.mxu0 %v501_v0  ;;  %p468_p9 = por %p467_p8, %p466_p7 }
  0x78   :  { %p469_p10 = pnand %p468_p9, %p462_p6 }
  0x79   :  { %302 = vmatpush3.bf16.msra.mxu0 %v322_v3 }
  0x7a   :  { %303 = vmatprep.subr.bf16.mxu0 %v501_v0 }
  0x7d   :  { %304 = vmatpush3.bf16.msra.mxu0 %v323_v4 }
  0x80   :  { %306 = vmatmul.mubr.msk.bf16.vlgmr.msra.gmra.mrb[0].mxu0 %vm147_vm1, %v324_v5 }
 0x153   :  { %v185_v9 = vpop.f32.mrb[0].mxu0 }
 0x154   :  { %v186_v10 = vadd.f32 %v275_v7, %v185_v9  ;;  %v307_v11 = vpop.f32.mrb[1].mxu0 }
 0x155   :  { %v188_v13 = vpop.f32.mrb[2].mxu0 }
 0x156   :  { %v189_v14 = vadd.f32 %v275_v7, %v188_v13  ;;  %v308_v15 = vpop.f32.mrb[3].mxu0  ;;  %v196_v16 = vadd.f32 %v290_v8, %v186_v10 }
 0x158   :  { %v199_v17 = vsel %vm198_vm2, %v196_v16, 0.0  ;;  %v197_v18 = vadd.f32 %v291_v12, %v189_v14 }
 0x159   :  { %200 = vadd.xlane.f32.xlu0 %v199_v17 }
 0x15a   :  { %v202_v19 = vsel %vm198_vm2, %v197_v18, 0.0 }
 0x15d   :  { %203 = vadd.xlane.f32.xlu0 %v202_v19 }
 0x1e6   :  { %v201_v20 = vpop.xlane.xlu0 %200 }
 0x1e7   :  { %v206_v21 = vmul.f32 0.03125, %v201_v20 }
 0x1e9   :  { %v208_v22 = vsub.f32 %v196_v16, %v206_v21 }
 0x1ea   :  { %v204_v23 = vpop.xlane.xlu0 %203 }
 0x1eb   :  { %v207_v24 = vmul.f32 0.03125, %v204_v23  ;;  %v210_v25 = vmul.f32 %v208_v22, %v208_v22 }
 0x1ed   :  { %v209_v26 = vsub.f32 %v197_v18, %v207_v24  ;;  %v212_v27 = vsel %vm198_vm2, %v210_v25, 0.0 }
 0x1ee   :  { %213 = vadd.xlane.f32.xlu1 %v212_v27 }
 0x1ef   :  { %v211_v28 = vmul.f32 %v209_v26, %v209_v26 }
 0x1f1   :  { %v215_v29 = vsel %vm198_vm2, %v211_v28, 0.0 }
 0x1f2   :  { %216 = vadd.xlane.f32.xlu1 %v215_v29 }
 0x27b   :  { %v214_v30 = vpop.xlane.xlu1 %213 }
 0x27c   :  { %v218_v31 = vmul.f32 0.03125, %v214_v30 }
 0x27e   :  { %v220_v32 = vadd.f32 1e-05, %v218_v31 }
 0x27f   :  { %v217_v33 = vpop.xlane.xlu1 %216 }
 0x280   :  { %325 = vrsqrt.f32 %v220_v32  ;;  %v219_v34 = vmul.f32 0.03125, %v217_v33 }
 0x282   :  { %v221_v35 = vadd.f32 1e-05, %v219_v34 }
 0x284   :  { %327 = vrsqrt.f32 %v221_v35 }
 0x28a   :  { %v326_v36 = vpop.eup %325 }
 0x28b   :  { %v224_v38 = vmul.f32 %v326_v36, %v208_v22 }
 0x28d   :  { %v233_v40 = vmul.f32 %v282_v37, %v224_v38 }
 0x28e   :  { %v328_v41 = vpop.eup %327 }
 0x28f   :  { %v225_v42 = vmul.f32 %v328_v41, %v209_v26  ;;  %v242_v43 = vadd.f32 %v283_v39, %v233_v40 }
 0x291   :  { %v234_v44 = vmul.f32 %v282_v37, %v225_v42  ;;  %v286_v45 = vpack.c.bf16 %v242_v43, %v242_v43 }
 0x293   :  { %v243_v46 = vadd.f32 %v283_v39, %v234_v44  ;;  %253 = vst.msk [vmem:[#allocation13] sm:$0xf] %vm252_vm3, %v286_v45 }
 0x295   :  { %v287_v47 = vpack.c.bf16 %v243_v46, %v243_v46 }
 0x297   :  { %254 = vst.msk [vmem:[#allocation13 + $0x4] sm:$0xf] %vm252_vm3, %v287_v47 }
 0x298   :  { %472 = shalt.err (!%p469_p10)
}
 0x299   :  { %s473_s27 = scalar_lea.hbm %s652_s6, 128 }
 0x29a   :  { %p474_p11 = scmp.ne.s32.totalorder %s652_s6, %s473_s27  ;;  %p477_p12 = scmp.lt.u32.totalorder %s473_s27, %s652_s6 }
 0x29c   :  { %p479_p13 = pnand %p477_p12, %p474_p11 }
 0x29e   :  { %482 = shalt.err (!%p479_p13)
}
 0x29f   :  { %266 = dma.vmem_to_hbm [thread:$0]  %s261_s21, 128, %s652_s6, [#allocation4], %s495_s9, %s495_s9, %s496_s10  }
 0x2a0   :  { %491 = dma.done.wait [#allocation4], 128  }
 0x2a1   :  { %492 = vsyncadd [#allocation4], 4294967168 }
 0x2a2   :  { %270 = vsyncpa [#allocation3], 1 }
 0x2a3   :  { %271 = vsyncpa [#allocation6], 1 }
 0x2a4   :  { %272 = vsyncpa [#allocation9], 1 }
 0x2a5   :  { %273 = vsyncpa [#allocation12], 1 }
 0x2a6   :  { %274 = vsyncpa [#allocation4], 1 }

// kernel: model_forward_code.18
= control target key start
LH: loop header
LB: loop body
LE: loop exit
PB: predicated region body
PF: predicated region fallthrough
CT: control target
= control target key end

     0   :  { %s1634_s0 = inlined_call_operand.hbm [shape: bf16[2,8,96], index: 0, kind: input, shape index: {}, may-alias: {0,1}]   ;;  %s1635_s1 = inlined_call_operand.hbm [shape: bf16[2,8,96], index: 1, kind: input, shape index: {}, may-alias: {0,1}]   ;;  %s1636_s2 = inlined_call_operand.hbm [shape: f32[2,1,8], index: 2, kind: input, shape index: {}]   ;;  %s1637_s3 = inlined_call_operand.hbm [shape: bf16[2,8,32], index: 3, kind: output, shape index: {}]  }
   0x1   :  { %1642 = sst [smem:[#allocation13_spill]] %s1635_s1 }
   0x2   :  { %8 = vsyncpa [#allocation3], 0 }
   0x3   :  { %10 = vsyncpa [#allocation3 + $0x1], 0 }
   0x4   :  { %11 = vsyncpa [#allocation6], 0 }
   0x5   :  { %13 = vsyncpa [#allocation6 + $0x1], 0 }
   0x6   :  { %14 = vsyncpa [#allocation4], 0 }
   0x7   :  { %16 = vsyncpa [#allocation4 + $0x1], 0  ;;  %s1299_s12 = smov 0   ;;  %s1301_s13 = smov 0  }
   0x8   :  { %s1303_s14 = smov 0   ;;  %s1305_s15 = smov 0  }
   0x9   :  { %s1307_s16 = smov 0   ;;  %s1309_s17 = smov 0  }
   0xa LB: > { %s1330_s18 = sadd.s32 4294967295, %s1258_s17   ;;  %s886_s19 = sadd.s32 4294967294, %s1258_s17   ;;  %s1258_s17 = sphi %s1309_s17, %s22_s17   ;;  %s1254_s16 = sphi %s1307_s16, %s1665_s16   ;;  %s1250_s15 = sphi %s1305_s15, %s1664_s15   ;;  %s1246_s14 = sphi %s1303_s14, %s1663_s14   ;;  %s1242_s13 = sphi %s1301_s13, %s1662_s13   ;;  %s1238_s12 = sphi %s1299_s12, %s1661_s12  }
   0xb   : > { %s34_s20 = sadd.s32 1, %s1254_s16  ;;  %s43_s21 = sadd.s32 1, %s1246_s14 }
   0xc   : > { %p36_p0 = scmp.ge.s32.totalorder %s34_s20, 2  ;;  %p50_p1 = scmp.ne.s32.totalorder %s1246_s14, %s1242_s13 }
   0xd   : > { %p51_p2 = scmp.eq.s32.totalorder %s1258_s17, 0  ;;  %p56_p3 = scmp.ne.s32.totalorder %s1242_s13, %s1238_s12 }
   0xe   : > { %s1667_s20 = smov (%p36_p0, %s34_s20), 0  ;;  %p57_p5 = scmp.eq.s32.totalorder %s1330_s18, 0 }
   0xf   : > { %1643 = sst [smem:[#allocation12_spill]] %s1667_s20  ;;  %p1342_p4 = por %p51_p2, %p50_p1 }
  0x10   : > { %s38_s23 = ssub.s32 %s1254_s16, %s1667_s20  ;;  %p134_p6 = scmp.eq.s32.totalorder %s1330_s18, 1 }
  0x11   : > { %p41_p7 = scmp.eq.s32.totalorder %s38_s23, 0  ;;  %p1350_p8 = por %p57_p5, %p56_p3 }
  0x12   : > { %p1354_p9 = por %p134_p6, %p50_p1  ;;  %p140_p10 = scmp.eq.s32.totalorder %s886_s19, 1 }
  0x13   : > { %s1645_s24 = scalar_select %p1350_p8, 1, 0 }
  0x14   : > { %s1646_s25 = scalar_select %p1354_p9, 1, 0 }
  0x15   : > { %s1359_s26 = scalar_select %p41_p7, %s1246_s14, %s43_s21  }
  0x16   : > { %p1361_p11 = por %p140_p10, %p56_p3  ;;  %p1000_p13 = scmp.lt.s32.totalorder %s1258_s17, 2 }
  0x17   : > { %s1368_s28 = sand.u32 1, %s1246_s14   ;;  %s890_s30 = sshll.u32 %s1254_s16, 6 }
  0x18   : > { %s1647_s27 = scalar_select %p1361_p11, 1, 0 }
  0x19   : > { %s889_s29 = sshll.u32 %s1368_s28, 2  ;;  %p1374_p0 = pnand %p1000_p13, %p1342_p4 }
  0x1a   : > { %s179_s5 = sand.u32 1, %s1258_s17   ;;  %s1649_s1 = sld [smem:[#allocation13_spill]] }
  0x1b   : > { %s1648_s4 = scalar_select %p1374_p0, 1, 0 }
  0x1c   : > { %s183_s9 = scalar_lea.vmem [#allocation5], %s889_s29  ;;  %s1392_s11 = scalar_lea.sflag [#allocation6], %s179_s5 }
  0x1d   : > { %s190_s10 = sshll.u32 %s183_s9, 4  ;;  %p1398_p4 = pneg %p1374_p0  ;;  %s1389_s10 = int_to_ptr.vmem [resolvable:$true] %s190_s10 }
  0x20   : > { %s1384_s8 = scalar_lea.hbm %s1649_s1, %s890_s30  ;;  %s1087_s6 = scalar_lea.hbm %s1649_s1, 128 }
  0x21   : > { %s1082_s19 = scalar_lea.hbm %s1384_s8, 64  ;;  %p1088_p7 = scmp.lt.u32.totalorder %s1384_s8, %s1649_s1 }
  0x22   : > { %p1083_p3 = scmp.ne.s32.totalorder %s1384_s8, %s1082_s19  ;;  %p1089_p10 = scmp.lt.u32.totalorder %s1087_s6, %s1082_s19 }
  0x23   : > { %p1091_p12 = scmp.lt.u32.totalorder %s1082_s19, %s1384_s8 }
  0x24   : > { %p1085_p5 = pnand %p1398_p4, %p1083_p3  ;;  %p1090_p13 = por %p1089_p10, %p1088_p7 }
  0x26   : > { %p1086_p6 = pneg %p1085_p5  ;;  %p1092_p1 = por %p1091_p12, %p1090_p13 }
  0x28   : > { %p1093_p2 = pnand %p1092_p1, %p1086_p6 }
  0x2a   : > { %1096 = shalt.err (!%p1093_p2)
}
  0x2b   : > { %s1097_s5 = scalar_lea.vmem %s1389_s10, 64  ;;  %s1260_s22 = smov [#allocation5]  }
  0x2c   : > { %p1098_p3 = scmp.ne.s32.totalorder %s1389_s10, %s1097_s5  ;;  %s1102_s23 = sshll.u32 %s1260_s22, 4  ;;  %s1103_s23 = int_to_ptr.vmem [resolvable:$false] %s1102_s23 }
  0x2d   : > { %s1104_s7 = scalar_lea.vmem %s1103_s23, 128  ;;  %p1105_p9 = scmp.lt.s32.totalorder %s1389_s10, %s1103_s23 }
  0x2e   : > { %p1100_p5 = pnand %p1098_p3, %p1398_p4  ;;  %p1106_p8 = scmp.lt.s32.totalorder %s1104_s7, %s1097_s5 }
  0x30   : > { %p1101_p11 = pneg %p1100_p5  ;;  %p1107_p7 = por %p1106_p8, %p1105_p9 }
  0x32   : > { %p1108_p10 = pnand %p1107_p7, %p1101_p11 }
  0x34   : > { %1111 = shalt.err (!%p1108_p10)
}
  0x35   : > { %992 = dma.hbm_to_vmem [thread:$0]  (!%p1374_p0), %s1384_s8, 64, %s1389_s10, %s1392_s11  }
  0x36   : > { %p1651_p12 = scmp.lt.s32.totalorder %s1258_s17, 3  ;;  %p1652_p1 = scmp.ge.s32.totalorder %s1258_s17, 1 }
  0x37   : > { %s1435_s5 = scalar_lea.hbm %s1634_s0, %s890_s30  ;;  %s164_s22 = scalar_lea.vmem [#allocation2], %s889_s29 }
  0x38   : > { %p1426_p2 = pnand %p1652_p1, %p1651_p12  ;;  %s172_s23 = sshll.u32 %s164_s22, 4  ;;  %s1439_s23 = int_to_ptr.vmem [resolvable:$true] %s172_s23 }
  0x39   : > { %s893_s8 = sshll.u32 %s1254_s16, 4  ;;  %s161_s10 = scalar_lea.sflag [#allocation3], %s1368_s28 }
  0x3a   : > { %s1653_s19 = scalar_select %p1426_p2, 1, 0 }
  0x3b   : > { %s1112_s7 = scalar_lea.hbm %s1435_s5, 64  ;;  %s1117_s30 = scalar_lea.hbm %s1634_s0, 128 }
  0x3c   : > { %p1113_p8 = scmp.ne.s32.totalorder %s1435_s5, %s1112_s7  ;;  %p1118_p6 = scmp.lt.u32.totalorder %s1435_s5, %s1634_s0 }
  0x3d   : > { %p1119_p13 = scmp.lt.u32.totalorder %s1117_s30, %s1112_s7  ;;  %p1121_p5 = scmp.lt.u32.totalorder %s1112_s7, %s1435_s5 }
  0x3e   : > { %p1115_p9 = pnand %p1113_p8, %p1398_p4 }
  0x3f   : > { %p1120_p3 = por %p1119_p13, %p1118_p6 }
  0x40   : > { %p1116_p11 = pneg %p1115_p9 }
  0x41   : > { %p1122_p7 = por %p1121_p5, %p1120_p3 }
  0x43   : > { %p1123_p10 = pnand %p1122_p7, %p1116_p11 }
  0x45   : > { %1126 = shalt.err (!%p1123_p10)
}
  0x46   : > { %s1127_s29 = scalar_lea.vmem %s1439_s23, 64  ;;  %s1261_s1 = smov [#allocation2]  }
  0x47   : > { %p1128_p12 = scmp.ne.s32.totalorder %s1439_s23, %s1127_s29  ;;  %s1132_s22 = sshll.u32 %s1261_s1, 4  ;;  %s1133_s22 = int_to_ptr.vmem [resolvable:$false] %s1132_s22 }
  0x48   : > { %s1134_s20 = scalar_lea.vmem %s1133_s22, 128  ;;  %p1135_p9 = scmp.lt.s32.totalorder %s1439_s23, %s1133_s22 }
  0x49   : > { %p1130_p1 = pnand %p1128_p12, %p1398_p4  ;;  %p1136_p2 = scmp.lt.s32.totalorder %s1134_s20, %s1127_s29 }
  0x4b   : > { %p1131_p8 = pneg %p1130_p1  ;;  %p1137_p6 = por %p1136_p2, %p1135_p9 }
  0x4d   : > { %p1138_p13 = pnand %p1137_p6, %p1131_p8 }
  0x4f   : > { %1141 = shalt.err (!%p1138_p13)
}
  0x50   : > { %989 = dma.hbm_to_vmem [thread:$0]  (!%p1374_p0), %s1435_s5, 64, %s1439_s23, %s161_s10  }
  0x51   : > { %s1469_s30 = scalar_lea.hbm %s1636_s2, %s893_s8  ;;  %s200_s9 = scalar_lea.vmem [#allocation7], %s1368_s28 }
  0x52   : > { %s207_s29 = sshll.u32 %s200_s9, 4  ;;  %s1142_s1 = scalar_lea.hbm %s1469_s30, 16  ;;  %s208_s29 = int_to_ptr.vmem [resolvable:$true] %s207_s29 }
  0x53   : > { %p1143_p2 = scmp.ne.s32.totalorder %s1469_s30, %s1142_s1  ;;  %s1147_s23 = scalar_lea.hbm %s1636_s2, 32 }
  0x54   : > { %p1148_p5 = scmp.lt.u32.totalorder %s1469_s30, %s1636_s2  ;;  %p1149_p7 = scmp.lt.u32.totalorder %s1147_s23, %s1142_s1 }
  0x55   : > { %p1145_p11 = pnand %p1143_p2, %p1398_p4  ;;  %p1151_p12 = scmp.lt.u32.totalorder %s1142_s1, %s1469_s30 }
  0x56   : > { %p1150_p10 = por %p1149_p7, %p1148_p5 }
  0x57   : > { %p1146_p3 = pneg %p1145_p11 }
  0x58   : > { %p1152_p1 = por %p1151_p12, %p1150_p10 }
  0x5a   : > { %p1153_p8 = pnand %p1152_p1, %p1146_p3 }
  0x5c   : > { %1156 = shalt.err (!%p1153_p8)
}
  0x5d   : > { %s1157_s28 = scalar_lea.vmem %s208_s29, 16  ;;  %s1262_s8 = smov [#allocation7]  }
  0x5e   : > { %p1158_p9 = scmp.ne.s32.totalorder %s208_s29, %s1157_s28  ;;  %s1162_s7 = sshll.u32 %s1262_s8, 4  ;;  %s1163_s7 = int_to_ptr.vmem [resolvable:$false] %s1162_s7 }
  0x5f   : > { %s1164_s6 = scalar_lea.vmem %s1163_s7, 32  ;;  %p1165_p2 = scmp.lt.s32.totalorder %s208_s29, %s1163_s7 }
  0x60   : > { %p1160_p6 = pnand %p1158_p9, %p1398_p4  ;;  %p1166_p11 = scmp.lt.s32.totalorder %s1164_s6, %s1157_s28 }
  0x62   : > { %p1161_p13 = pneg %p1160_p6  ;;  %p1167_p0 = por %p1166_p11, %p1165_p2 }
  0x64   : > { %p1168_p5 = pnand %p1167_p0, %p1161_p13 }
  0x66   : > { %1171 = shalt.err (!%p1168_p5)
}
  0x67   : > { %p1654_p7 = scmp.ne.s32.totalorder %s1648_s4, 0  ;;  %p1655_p3 = scmp.ne.s32.totalorder %s1653_s19, 0 }
  0x68   : > { %s1493_s21 = sand.u32 (!%p1655_p3), 1, %s1242_s13   ;;  %p1656_p0 = scmp.ne.s32.totalorder (!%p1655_p3), %s1645_s24, 0 }
  0x69   : > { %995 = dma.hbm_to_vmem [thread:$0]  (!%p1654_p7), %s1469_s30, 16, %s208_s29, %s1392_s11  }
  0x6a   : > { %216 = sbr.rel (%p1655_p3) target bundleno = 1831 (0x727), region = 32  ;;  %s1496_s9 = sshll.u32 (!%p1655_p3), %s1493_s21, 2 }
  0x6b   : > { %s219_s1 = scalar_lea.sflag (!%p1655_p3), [#allocation3], %s1493_s21  ;;  %s222_s22 = scalar_lea.vmem (!%p1655_p3), [#allocation2], %s1496_s9 }
  0x71   : > { %1225 = dma.done.wait (%p1656_p0), %s219_s1, 64  }
  0x72   : > { %1227 = vsyncadd (%p1656_p0), %s219_s1, 4294967232  ;;  %s227_s4 = sand.u32 1, %s1330_s18   ;;  %s231_s19 = scalar_lea.vmem [#allocation5], %s1496_s9 }
  0x73   : > { %s228_s11 = scalar_lea.sflag [#allocation6], %s227_s4 }
  0x74   : > { %1229 = dma.done.wait (%p1656_p0), %s228_s11, 80  }
  0x75   : > { %1231 = vsyncadd (%p1656_p0), %s228_s11, 4294967216  ;;  %v1263_v0 = vmov 0.0   ;;  %vm1264_vm0 = vmmov 0   ;;  %v1516_v1 = vld [vmem:[%s231_s19] ss:$0 sps:$4 sm:$0xff]   ;;  %s1265_s18 = smov 96  }
  0x76   : > { %930 = vmatprep.subr.bf16.mxu0 %v1263_v0  ;;  %932 = vmatprep.mubr.msk.bf16.mxu0 %vm1264_vm0, %v1263_v0  ;;  %v272_v2 = vld [vmem:[%s222_s22] sm:$0xf]  ;;  %vm289_vm1 = vcmask 64512   ;;  %s1266_s24 = smov 64   ;;  %s1267_s30 = smov 88   ;;  %vm353_vm2 = vcmask 1043456  }
  0x77   : > { %936 = vmatprep.subr.bf16.mxu1 %v1263_v0  ;;  %938 = vmatprep.mubr.msk.bf16.mxu1 %vm1264_vm0, %v1263_v0  ;;  %v275_v3 = vunpack.c.l.bf16 %v272_v2  ;;  %s239_s29 = scalar_lea.vmem [#allocation7], %s1493_s21  ;;  %s1268_s5 = smov 72   ;;  %vm514_vm3 = vcmask 125952   ;;  %vm748_vm4 = vcmask 257152  }
  0x78   : > { %287 = vrot.lane.b32.xlu0 %v1516_v1, %s1265_s18  ;;  %348 = vrot.lane.b32.xlu1 %v1516_v1, %s1266_s24  ;;  %v1527_v8 = vld [vmem:[%s239_s29] ss:$0 sm:$0xff]  ;;  %s1269_s23 = smov 120   ;;  %s1270_s10 = smov 80  }
  0x79   : > { %v276_v6 = vmul.f32 0.35355338, %v275_v3  ;;  %s1271_s20 = smov 112   ;;  %s1272_s28 = smov 104  }
  0x7a   : > { %s1273_s8 = smov 56   ;;  %s1274_s7 = smov 48  }
  0x7b   : > { %v277_v7 = vpack.c.bf16 %v276_v6, %v276_v6  ;;  %s1275_s6 = smov 40   ;;  %s1276_s1 = smov 8  }
  0x7c   : > { %400 = vrot.lane.b32.xlu1 %v1516_v1, %s1267_s30  ;;  %s270_s22 = scalar_lea.vmem [#allocation8], %s1496_s9  ;;  %s1277_s4 = smov 16  }
  0x7d   : > { %s910_s11 = sshll.u32 %s1250_s15, 6  ;;  %s765_s19 = sshll.u32 %s270_s22, 4  ;;  %s1587_s19 = int_to_ptr.vmem [resolvable:$true] %s765_s19 }
  0x7e   : > { %s1585_s30 = scalar_lea.hbm %s1637_s3, %s910_s11  ;;  %s751_s9 = scalar_lea.sflag [#allocation4], %s1493_s21 }
  0x7f   : > { %s1172_s29 = scalar_lea.vmem %s1587_s19, 64  ;;  %p1657_p10 = scmp.ne.s32.totalorder %s1646_s25, 0 }
  0x80   : > { %p1173_p4 = scmp.ne.s32.totalorder %s1587_s19, %s1172_s29  ;;  %s1278_s15 = smov [#allocation8]  }
  0x82   : > { %p1174_p12 = pnand %p1173_p4, %p1657_p10 }
  0x84   : > { %p1175_p1 = pneg %p1174_p12 }
  0xea   : > { %v288_v4 = vpop.permute.xlu0 %287  ;;  %v349_v15 = vpop.permute.xlu1 %348 }
  0xeb   : > { %v294_v5 = vsel %vm289_vm1, %v288_v4, 0  ;;  %v355_v16 = vsel %vm353_vm2, %v349_v15, 0 }
  0xec   : > { %931 = vmatpush3.bf16.xpose.msra.mxu0 %v294_v5  ;;  %937 = vmatpush3.bf16.msra.mxu1 %v355_v16 }
  0xed   : > { %948 = vmatprep.subr.bf16.mxu0 %v1263_v0  ;;  %942 = vmatprep.subr.bf16.mxu1 %v1263_v0 }
  0xee   : > { %v401_v22 = vpop.permute.xlu1 %400 }
  0xef   : > { %v406_v28 = vsel %vm289_vm1, %v401_v22, 0 }
  0xf3   : > { %933 = vmatmul.mubr.msk.bf16.vlgmr.msra.gmra.mrb[0].mxu0 %vm289_vm1, %v277_v7 }
  0xf4   : > { %950 = vmatprep.mubr.msk.bf16.mxu0 %vm1264_vm0, %v1263_v0 }
 0x1c6   : > { %v330_v9 = vpop.f32.mrb[0].mxu0 }
 0x1c7   : > { %v331_v10 = vadd.f32 %v1527_v8, %v330_v9  ;;  %v934_v11 = vpop.f32.mrb[1].mxu0 }
 0x1c8   : > { %v333_v12 = vpop.f32.mrb[2].mxu0 }
 0x1c9   : > { %v935_v13 = vpop.f32.mrb[3].mxu0  ;;  %v336_v14 = vsel %vm289_vm1, %v331_v10, -inf }
 0x1ca   : > { %337 = vmax.xlane.f32.xlu0 %v336_v14 }
 0x1e0   : > { %628 = vrot.lane.b32.xlu0 %v1516_v1, %s1268_s5  ;;  %s1176_s5 = sshll.u32 %s1278_s15, 4  ;;  %s1177_s5 = int_to_ptr.vmem [resolvable:$false] %s1176_s5 }
 0x1e1   : > { %p1179_p8 = scmp.lt.s32.totalorder %s1587_s19, %s1177_s5 }
 0x257   : > { %v338_v17 = vpop.xlane.xlu0 %337 }
 0x258   : > { %v339_v18 = vsub.f32 %v331_v10, %v338_v17 }
 0x25a   : > { %v340_v19 = vmul.f32 1.442695, %v339_v18 }
 0x25b   : > { %v629_v31 = vpop.permute.xlu0 %628 }
 0x25c   : > { %1066 = vpow2.f32 %v340_v19  ;;  %v634_v33 = vsel %vm289_vm1, %v629_v31, 0 }
 0x266   : > { %v1067_v20 = vpop.eup %1066 }
 0x267   : > { %v342_v21 = vsel %vm289_vm1, %v1067_v20, 0.0 }
 0x268   : > { %343 = vadd.xlane.f32.xlu1 %v342_v21 }
 0x279   : > { %398 = vrot.lane.b32.xlu1 %v277_v7, %s1269_s23  ;;  %s1178_s23 = scalar_lea.vmem %s1177_s5, 128 }
 0x27a   : > { %p1180_p9 = scmp.lt.s32.totalorder %s1178_s23, %s1172_s29 }
 0x27c   : > { %p1181_p6 = por %p1180_p9, %p1179_p8 }
 0x27d   : > { %518 = vrot.lane.b32.xlu1 %v1516_v1, %s1270_s10 }
 0x27e   : > { %p1182_p13 = pnand %p1181_p6, %p1175_p1 }
 0x281   : > { %516 = vrot.lane.b32.xlu1 %v277_v7, %s1271_s20 }
 0x285   : > { %626 = vrot.lane.b32.xlu1 %v277_v7, %s1272_s28 }
 0x2f5   : > { %v344_v23 = vpop.xlane.xlu1 %343 }
 0x2f6   : > { %1068 = vrcp.f32 %v344_v23 }
 0x2f9   : > { %v399_v26 = vpop.permute.xlu1 %398 }
 0x2fd   : > { %v519_v29 = vpop.permute.xlu1 %518 }
 0x2fe   : > { %v524_v30 = vsel %vm289_vm1, %v519_v29, 0 }
 0x300   : > { %v1069_v24 = vpop.eup %1068 }
 0x301   : > { %v346_v25 = vmul.f32 %v1069_v24, %v1067_v20  ;;  %v517_v32 = vpop.permute.xlu1 %516 }
 0x303   : > { %v347_v27 = vpack.c.bf16 %v346_v25, %v346_v25 }
 0x305   : > { %939 = vmatmul.mubr.msk.bf16.vlgmr.msra.gmra.mrb[0].mxu1 %vm289_vm1, %v347_v27  ;;  %v627_v34 = vpop.permute.xlu1 %626 }
 0x306   : > { %943 = vmatpush3.bf16.xpose.msra.mxu1 %v406_v28  ;;  %944 = vmatprep.mubr.msk.bf16.mxu1 %vm1264_vm0, %v1263_v0 }
 0x307   : > { %954 = vmatprep.subr.bf16.mxu1 %v1263_v0 }
 0x30d   : > { %945 = vmatmul.mubr.msk.bf16.vlgmr.msra.gmra.mrb[4].mxu1 %vm289_vm1, %v399_v26 }
 0x30e   : > { %955 = vmatpush3.bf16.xpose.msra.mxu1 %v524_v30  ;;  %956 = vmatprep.mubr.msk.bf16.mxu1 %vm1264_vm0, %v1263_v0 }
 0x30f   : > { %966 = vmatprep.subr.bf16.mxu1 %v1263_v0 }
 0x315   : > { %957 = vmatmul.mubr.msk.bf16.vlgmr.msra.gmra.mrb[8].mxu1 %vm289_vm1, %v517_v32 }
 0x316   : > { %967 = vmatpush3.bf16.xpose.msra.mxu1 %v634_v33  ;;  %968 = vmatprep.mubr.msk.bf16.mxu1 %vm1264_vm0, %v1263_v0 }
 0x31d   : > { %969 = vmatmul.mubr.msk.bf16.vlgmr.msra.gmra.mrb[12].mxu1 %vm289_vm1, %v627_v34 }
 0x3d8   : > { %v1551_v35 = vpop.f32.mrb[0].mxu1 }
 0x3d9   : > { %v940_v36 = vpop.f32.mrb[1].mxu1 }
 0x3da   : > { %v394_v37 = vpop.f32.mrb[2].mxu1 }
 0x3db   : > { %v941_v38 = vpop.f32.mrb[3].mxu1 }
 0x3e0   : > { %v442_v39 = vpop.f32.mrb[4].mxu1 }
 0x3e1   : > { %v443_v40 = vadd.f32 %v1527_v8, %v442_v39  ;;  %v946_v41 = vpop.f32.mrb[5].mxu1 }
 0x3e2   : > { %v445_v42 = vpop.f32.mrb[6].mxu1 }
 0x3e3   : > { %v947_v43 = vpop.f32.mrb[7].mxu1  ;;  %v448_v44 = vsel %vm289_vm1, %v443_v40, -inf }
 0x3e4   : > { %449 = vmax.xlane.f32.xlu1 %v448_v44 }
 0x3e8   : > { %v560_v45 = vpop.f32.mrb[8].mxu1 }
 0x3e9   : > { %v561_v46 = vadd.f32 %v1527_v8, %v560_v45  ;;  %v958_v47 = vpop.f32.mrb[9].mxu1 }
 0x3ea   : > { %v563_v48 = vpop.f32.mrb[10].mxu1 }
 0x3eb   : > { %v566_v49 = vsel %vm289_vm1, %v561_v46, -inf  ;;  %v959_v50 = vpop.f32.mrb[11].mxu1 }
 0x3ec   : > { %567 = vmax.xlane.f32.xlu0 %v566_v49 }
 0x3f0   : > { %v670_v51 = vpop.f32.mrb[12].mxu1 }
 0x3f1   : > { %v671_v52 = vadd.f32 %v1527_v8, %v670_v51  ;;  %v970_v53 = vpop.f32.mrb[13].mxu1 }
 0x3f2   : > { %v673_v54 = vpop.f32.mrb[14].mxu1 }
 0x3f3   : > { %v676_v55 = vsel %vm289_vm1, %v671_v52, -inf  ;;  %v971_v56 = vpop.f32.mrb[15].mxu1 }
 0x3f4   : > { %677 = vmax.xlane.f32.xlu1 %v676_v55 }
 0x471   : > { %v450_v57 = vpop.xlane.xlu1 %449 }
 0x472   : > { %v451_v58 = vsub.f32 %v443_v40, %v450_v57 }
 0x474   : > { %v452_v59 = vmul.f32 1.442695, %v451_v58 }
 0x476   : > { %1070 = vpow2.f32 %v452_v59 }
 0x479   : > { %v568_v5 = vpop.xlane.xlu0 %567 }
 0x47a   : > { %v569_v6 = vsub.f32 %v561_v46, %v568_v5 }
 0x47c   : > { %v570_v7 = vmul.f32 1.442695, %v569_v6 }
 0x480   : > { %v1071_v60 = vpop.eup %1070 }
 0x481   : > { %v678_v61 = vpop.xlane.xlu1 %677  ;;  %v454_v62 = vsel %vm289_vm1, %v1071_v60, 0.0 }
 0x482   : > { %v679_v63 = vsub.f32 %v671_v52, %v678_v61  ;;  %455 = vadd.xlane.f32.xlu1 %v454_v62 }
 0x484   : > { %v680_v2 = vmul.f32 1.442695, %v679_v63 }
 0x486   : > { %1072 = vpow2.f32 %v680_v2 }
 0x487   : > { %1074 = vpow2.f32 %v570_v7 }
 0x490   : > { %v1073_v3 = vpop.eup %1072 }
 0x491   : > { %v682_v4 = vsel %vm289_vm1, %v1073_v3, 0.0  ;;  %v1075_v8 = vpop.eup %1074 }
 0x492   : > { %683 = vadd.xlane.f32.xlu0 %v682_v4  ;;  %v572_v9 = vsel %vm289_vm1, %v1075_v8, 0.0 }
 0x493   : > { %460 = vrot.lane.b32.xlu1 %v1516_v1, %s1273_s8 }
 0x4a8   : > { %578 = vrot.lane.b32.xlu0 %v1516_v1, %s1274_s7 }
 0x4b7   : > { %573 = vadd.xlane.f32.xlu1 %v572_v9 }
 0x4c8   : > { %688 = vrot.lane.b32.xlu1 %v1516_v1, %s1275_s6 }
 0x50f   : > { %v456_v10 = vpop.xlane.xlu1 %455 }
 0x510   : > { %1076 = vrcp.f32 %v456_v10 }
 0x513   : > { %v461_v11 = vpop.permute.xlu1 %460 }
 0x514   : > { %v466_v12 = vsel %vm353_vm2, %v461_v11, 0 }
 0x515   : > { %949 = vmatpush3.bf16.msra.mxu0 %v466_v12 }
 0x516   : > { %960 = vmatprep.subr.bf16.mxu0 %v1263_v0 }
 0x51a   : > { %v1077_v13 = vpop.eup %1076 }
 0x51b   : > { %v458_v14 = vmul.f32 %v1077_v13, %v1071_v60 }
 0x51d   : > { %v459_v15 = vpack.c.bf16 %v458_v14, %v458_v14 }
 0x51f   : > { %951 = vmatmul.mubr.msk.bf16.vlgmr.msra.gmra.mrb[4].mxu0 %vm289_vm1, %v459_v15  ;;  %v684_v16 = vpop.xlane.xlu0 %683 }
 0x520   : > { %962 = vmatprep.mubr.msk.bf16.mxu0 %vm1264_vm0, %v1263_v0 }
 0x523   : > { %v579_v17 = vpop.permute.xlu0 %578 }
 0x524   : > { %v584_v1 = vsel %vm353_vm2, %v579_v17, 0 }
 0x525   : > { %961 = vmatpush3.bf16.msra.mxu0 %v584_v1 }
 0x526   : > { %972 = vmatprep.subr.bf16.mxu0 %v1263_v0 }
 0x544   : > { %v574_v18 = vpop.xlane.xlu1 %573 }
 0x545   : > { %1078 = vrcp.f32 %v574_v18 }
 0x546   : > { %1080 = vrcp.f32 %v684_v16 }
 0x548   : > { %v689_v20 = vpop.permute.xlu1 %688 }
 0x549   : > { %v694_v22 = vsel %vm353_vm2, %v689_v20, 0 }
 0x54f   : > { %v1079_v19 = vpop.eup %1078 }
 0x550   : > { %v576_v21 = vmul.f32 %v1079_v19, %v1075_v8  ;;  %v1081_v24 = vpop.eup %1080 }
 0x551   : > { %v686_v25 = vmul.f32 %v1081_v24, %v1073_v3 }
 0x552   : > { %v577_v23 = vpack.c.bf16 %v576_v21, %v576_v21 }
 0x553   : > { %v687_v26 = vpack.c.bf16 %v686_v25, %v686_v25 }
 0x554   : > { %963 = vmatmul.mubr.msk.bf16.vlgmr.msra.gmra.mrb[8].mxu0 %vm289_vm1, %v577_v23 }
 0x555   : > { %973 = vmatpush3.bf16.msra.mxu0 %v694_v22  ;;  %974 = vmatprep.mubr.msk.bf16.mxu0 %vm1264_vm0, %v1263_v0 }
 0x55c   : > { %975 = vmatmul.mubr.msk.bf16.vlgmr.msra.gmra.mrb[12].mxu0 %vm289_vm1, %v687_v26 }
 0x5f2   : > { %v502_v27 = vpop.f32.mrb[4].mxu0 }
 0x5f3   : > { %509 = vrot.lane.b32.xlu0 %v502_v27, %s1276_s1  ;;  %v952_v28 = vpop.f32.mrb[5].mxu0 }
 0x5f4   : > { %v505_v29 = vpop.f32.mrb[6].mxu0 }
 0x5f5   : > { %v953_v30 = vpop.f32.mrb[7].mxu0 }
 0x627   : > { %v620_v31 = vpop.f32.mrb[8].mxu0 }
 0x628   : > { %v964_v32 = vpop.f32.mrb[9].mxu0 }
 0x629   : > { %v623_v33 = vpop.f32.mrb[10].mxu0 }
 0x62a   : > { %v965_v34 = vpop.f32.mrb[11].mxu0 }
 0x62f   : > { %v730_v36 = vpop.f32.mrb[12].mxu0 }
 0x630   : > { %737 = vrot.lane.b32.xlu1 %v730_v36, %s1276_s1  ;;  %v976_v37 = vpop.f32.mrb[13].mxu0 }
 0x631   : > { %v733_v0 = vpop.f32.mrb[14].mxu0 }
 0x632   : > { %v977_v38 = vpop.f32.mrb[15].mxu0 }
 0x665   : > { %v510_v39 = vpop.permute.xlu0 %509 }
 0x666   : > { %v512_v40 = vsel %vm289_vm1, %v1551_v35, %v510_v39 }
 0x667   : > { %v513_v41 = vpack.c.bf16 %v512_v40, %v512_v40 }
 0x669   : > { %515 = vst.msk [vmem:[%s270_s22] sm:$0xf] %vm514_vm3, %v513_v41 }
 0x6a2   : > { %v738_v42 = vpop.permute.xlu1 %737 }
 0x6a3   : > { %v740_v43 = vsel %vm289_vm1, %v620_v31, %v738_v42 }
 0x6a4   : > { %v913_v44 = vpack.c.bf16 %v740_v43, %v740_v43 }
 0x6a6   : > { %745 = vrot.lane.b32.xlu1 %v913_v44, %s1277_s4 }
 0x718   : > { %v746_v35 = vpop.permute.xlu1 %745 }
 0x719   : > { %749 = vst.msk [vmem:[%s270_s22] sm:$0xf] %vm748_vm4, %v746_v35 }
 0x71a   : > { %1185 = shalt.err (!%p1182_p13)
}
 0x71b   : > { %s1186_s21 = scalar_lea.hbm %s1585_s30, 64  ;;  %s1190_s28 = scalar_lea.hbm %s1637_s3, 128 }
 0x71c   : > { %p1187_p2 = scmp.ne.s32.totalorder %s1585_s30, %s1186_s21  ;;  %p1191_p7 = scmp.lt.u32.totalorder %s1585_s30, %s1637_s3 }
 0x71d   : > { %p1192_p3 = scmp.lt.u32.totalorder %s1190_s28, %s1186_s21  ;;  %p1194_p4 = scmp.lt.u32.totalorder %s1186_s21, %s1585_s30 }
 0x71e   : > { %p1188_p11 = pnand %p1187_p2, %p1657_p10 }
 0x71f   : > { %p1193_p0 = por %p1192_p3, %p1191_p7 }
 0x720   : > { %p1189_p5 = pneg %p1188_p11 }
 0x721   : > { %p1195_p12 = por %p1194_p4, %p1193_p0 }
 0x723   : > { %p1196_p1 = pnand %p1195_p12, %p1189_p5 }
 0x725   : > { %1199 = shalt.err (!%p1196_p1)
}
 0x726   : > { %984 = dma.vmem_to_hbm [thread:$0]  (%p1657_p10), %s1587_s19, 64, %s1585_s30, %s751_s9  }
 0x727 PF: > { %s777_s6 = sand.u32 1, %s1238_s12   ;;  %p1658_p8 = scmp.ne.s32.totalorder %s1647_s27, 0 }
 0x728   : > { %p1659_p9 = scmp.ge.s32.totalorder %s1258_s17, 2  ;;  %s778_s1 = scalar_lea.sflag [#allocation4], %s777_s6 }
 0x72a   : > { %p997_p6 = pnand %p1659_p9, %p1658_p8 }
 0x72c   : > { %1233 = dma.done.wait (!%p997_p6), %s778_s1, 64  }
 0x72d   : > { %1235 = vsyncadd (!%p997_p6), %s778_s1, 4294967232  ;;  %s22_s17 = sadd.s32 1, %s1258_s17   ;;  %s1660_s25 = sld [smem:[#allocation12_spill]] }
 0x72e   : > { %p19_p13 = scmp.ge.s32.totalorder %s22_s17, 4   ;;  %s1661_s12 = smov %s1242_s13 }
 0x72f   : > { %s1662_s13 = smov %s1246_s14  ;;  %s1663_s14 = smov %s1359_s26 }
 0x730   : > { %s1664_s15 = smov %s1254_s16  ;;  %21 = sbr.rel (!%p19_p13) target bundleno = 10 (0xa), region = 101 }
 0x733   : > { %s1665_s16 = smov %s1660_s25 }
 0x737   :  { %783 = vsyncpa [#allocation3], 1 }
 0x738   :  { %785 = vsyncpa [#allocation3 + $0x1], 1 }
 0x739   :  { %786 = vsyncpa [#allocation6], 1 }
 0x73a   :  { %788 = vsyncpa [#allocation6 + $0x1], 1 }
 0x73b   :  { %789 = vsyncpa [#allocation4], 1 }
 0x73c   :  { %791 = vsyncpa [#allocation4 + $0x1], 1 }

</bundles_post_ra>
